<compile_context>
chip_gen: v7x
topology: tpu7x:2x2x1
jax: 0.10.0
libtpu: 0.0.40
codegen_flags: <defaults>
</compile_context>

<pallas_src>
import functools
import math

import jax
import jax.numpy as jnp
from jax.experimental import pallas as pl
from jax.experimental.pallas import tpu as pltpu


# ----------------------------------------------------------------------------
# Kernel
# ----------------------------------------------------------------------------

def _layernorm(y, g, b):
    """Post-norm LayerNorm with f32 statistics (eps matches nn.LayerNorm)."""
    mu = jnp.mean(y, axis=-1, keepdims=True)
    var = jnp.mean((y - mu) ** 2, axis=-1, keepdims=True)
    inv = jax.lax.rsqrt(var + 1e-5)
    return (y - mu) * inv * g + b


def _fused_layer_kernel(q_ref, k_ref, v_ref, qp_ref, kp_ref,
                        wsa_ref, bsa_ref, wca_ref, bca_ref,
                        w1_ref, b1_ref, w2_ref, b2_ref,
                        lng_ref, lnb_ref, o_ref, *, num_heads):
    """One grid step = one batch element = the whole transformer layer.

    q/qp blocks are (1, Lq, E); k/v/kp blocks are (1, Lk, E).
    wsa/wca: (4, E, E) bf16 packed [wq*scale, wk, wv, wo];
    bsa/bca: (4, E) f32 packed [bq*scale, bk, bv, bo];
    lng/lnb: (3, E) f32 LayerNorm gamma/beta for norm0..norm2.
    """

    def mha(x, x_pos, key_, key_pos, value_, residual, w_ref, b_ref):
        # Positional-encoding adds fused in (VPU f32), then bf16 for the MXU.
        q_in = (x + x_pos).astype(jnp.bfloat16)                 # (Lq, E)
        k_in = (key_ + key_pos).astype(jnp.bfloat16)            # (Lk, E)
        v_in = value_.astype(jnp.bfloat16)                      # (Lk, E)

        # Q/K/V projections (scale already folded into wq / bq).
        q = jnp.dot(q_in, w_ref[0], preferred_element_type=jnp.float32) + b_ref[0:1, :]
        k = jnp.dot(k_in, w_ref[1], preferred_element_type=jnp.float32) + b_ref[1:2, :]
        v = jnp.dot(v_in, w_ref[2], preferred_element_type=jnp.float32) + b_ref[2:3, :]

        e = q.shape[-1]
        dh = e // num_heads

        # Per-head attention, fully resident in VMEM (static unrolled loop).
        # TODO(synk): for very long Lk add Lk tiling with an online-softmax
        #             accumulator; not needed at decoder shapes.
        head_outs = []
        for h in range(num_heads):
            lo, hi = h * dh, (h + 1) * dh
            qh = q[:, lo:hi].astype(jnp.bfloat16)               # (Lq, dh)
            kh = k[:, lo:hi].astype(jnp.bfloat16)               # (Lk, dh)
            vh = v[:, lo:hi].astype(jnp.bfloat16)               # (Lk, dh)
            s = jax.lax.dot_general(qh, kh, (((1,), (1,)), ((), ())),
                                    preferred_element_type=jnp.float32)  # (Lq, Lk)
            m = jnp.max(s, axis=-1, keepdims=True)
            p = jnp.exp(s - m)
            denom = jnp.sum(p, axis=-1, keepdims=True)
            p = p * pl.reciprocal(denom, approx=True)           # EUP slot
            oh = jnp.dot(p.astype(jnp.bfloat16), vh,
                         preferred_element_type=jnp.float32)    # (Lq, dh)
            head_outs.append(oh)
        attn = jnp.concatenate(head_outs, axis=-1)              # (Lq, E) f32

        # Output projection + residual (identity = input before pos add).
        proj = jnp.dot(attn.astype(jnp.bfloat16), w_ref[3],
                       preferred_element_type=jnp.float32) + b_ref[3:4, :]
        return proj + residual

    x0 = q_ref[0]                                               # (Lq, E) raw query
    qp = qp_ref[0]

    # ---- self_attn (temp_key = temp_value = query) + norm0 ----
    y = mha(x0, qp, x0, qp, x0, x0, wsa_ref, bsa_ref)
    x1 = _layernorm(y, lng_ref[0:1, :], lnb_ref[0:1, :])

    # ---- cross_attn (key/value = memory) + norm1 ----
    y = mha(x1, qp, k_ref[0], kp_ref[0], v_ref[0], x1, wca_ref, bca_ref)
    x2 = _layernorm(y, lng_ref[1:2, :], lnb_ref[1:2, :])

    # ---- ffn: Linear -> ReLU -> Linear + residual + norm2 ----
    h = jnp.dot(x2.astype(jnp.bfloat16), w1_ref[...],
                preferred_element_type=jnp.float32) + b1_ref[...]
    h = jnp.maximum(h, 0.0)
    y = jnp.dot(h.astype(jnp.bfloat16), w2_ref[...],
                preferred_element_type=jnp.float32) + b2_ref[...] + x2

    o_ref[0] = _layernorm(y, lng_ref[2:3, :], lnb_ref[2:3, :]).astype(o_ref.dtype)


# ----------------------------------------------------------------------------
# Wrapper: BaseTransformerLayer forward
#   operation_order = ('self_attn','norm','cross_attn','norm','ffn','norm')
# ----------------------------------------------------------------------------

def base_transformer_layer_forward(query, key, value, query_pos, key_pos,
                                   params, num_heads):
    """
    query/query_pos: [Lq, B, E]   (batch_first=False, like the PyTorch module)
    key/value/key_pos: [Lk, B, E]
    returns          [Lq, B, E]
    """
    # Single batch-major transpose at entry / exit (cheap, handled by XLA).
    q = jnp.transpose(query, (1, 0, 2))        # [B, Lq, E]
    k = jnp.transpose(key, (1, 0, 2))          # [B, Lk, E]
    v = jnp.transpose(value, (1, 0, 2))
    qp = jnp.transpose(query_pos, (1, 0, 2))
    kp = jnp.transpose(key_pos, (1, 0, 2))

    b, lq, e = q.shape
    lk = k.shape[1]
    assert e % num_heads == 0
    dh = e // num_heads
    scale = 1.0 / math.sqrt(dh)

    def pack_attn(p):
        # Fold the softmax scale into the Q projection; bf16 for the MXU.
        w = jnp.stack([p["wq"] * scale, p["wk"], p["wv"], p["wo"]]
                      ).astype(jnp.bfloat16)                      # (4, E, E)
        bias = jnp.stack([p["bq"] * scale, p["bk"], p["bv"], p["bo"]]
                         ).astype(jnp.float32)                    # (4, E)
        return w, bias

    wsa, bsa = pack_attn(params["self_attn"])
    wca, bca = pack_attn(params["cross_attn"])

    ffn_p = params["ffn"]
    f = ffn_p["w1"].shape[1]
    w1 = ffn_p["w1"].astype(jnp.bfloat16)
    b1 = ffn_p["b1"].reshape(1, f).astype(jnp.float32)
    w2 = ffn_p["w2"].astype(jnp.bfloat16)
    b2 = ffn_p["b2"].reshape(1, e).astype(jnp.float32)

    lng = jnp.stack([params["norm0"]["g"], params["norm1"]["g"],
                     params["norm2"]["g"]]).astype(jnp.float32)   # (3, E)
    lnb = jnp.stack([params["norm0"]["b"], params["norm1"]["b"],
                     params["norm2"]["b"]]).astype(jnp.float32)   # (3, E)

    kernel = functools.partial(_fused_layer_kernel, num_heads=num_heads)
    out = pl.pallas_call(
        kernel,
        out_shape=jax.ShapeDtypeStruct((b, lq, e), jnp.float32),
        grid=(b,),
        in_specs=[
            pl.BlockSpec((1, lq, e), lambda i: (i, 0, 0)),   # query
            pl.BlockSpec((1, lk, e), lambda i: (i, 0, 0)),   # key (memory)
            pl.BlockSpec((1, lk, e), lambda i: (i, 0, 0)),   # value (memory)
            pl.BlockSpec((1, lq, e), lambda i: (i, 0, 0)),   # query_pos
            pl.BlockSpec((1, lk, e), lambda i: (i, 0, 0)),   # key_pos
            pl.BlockSpec((4, e, e), lambda i: (0, 0, 0)),    # self-attn weights
            pl.BlockSpec((4, e), lambda i: (0, 0)),          # self-attn biases
            pl.BlockSpec((4, e, e), lambda i: (0, 0, 0)),    # cross-attn weights
            pl.BlockSpec((4, e), lambda i: (0, 0)),          # cross-attn biases
            pl.BlockSpec((e, f), lambda i: (0, 0)),          # ffn w1
            pl.BlockSpec((1, f), lambda i: (0, 0)),          # ffn b1
            pl.BlockSpec((f, e), lambda i: (0, 0)),          # ffn w2
            pl.BlockSpec((1, e), lambda i: (0, 0)),          # ffn b2
            pl.BlockSpec((3, e), lambda i: (0, 0)),          # LN gammas
            pl.BlockSpec((3, e), lambda i: (0, 0)),          # LN betas
        ],
        out_specs=pl.BlockSpec((1, lq, e), lambda i: (i, 0, 0)),
        compiler_params=pltpu.CompilerParams(
            dimension_semantics=("parallel",)),
    )(q, k, v, qp, kp, wsa, bsa, wca, bca, w1, b1, w2, b2, lng, lnb)

    return jnp.transpose(out, (1, 0, 2))       # back to [Lq, B, E]

    # TODO(synk): attn_masks / key_padding_mask / dropout not wired (None /
    #             eval-mode in this config).


# ----------------------------------------------------------------------------
# Deterministic parameter construction + demo
# ----------------------------------------------------------------------------

def _init_params(key, embed_dims, ffn_dims):
    ks = jax.random.split(key, 16)
    i = 0

    def nxt():
        nonlocal i
        kk = ks[i]
        i += 1
        return kk

    def attn_params():
        return dict(
            wq=jax.random.normal(nxt(), (embed_dims, embed_dims), jnp.float32) * 0.05,
            bq=jnp.zeros((embed_dims,), jnp.float32),
            wk=jax.random.normal(nxt(), (embed_dims, embed_dims), jnp.float32) * 0.05,
            bk=jnp.zeros((embed_dims,), jnp.float32),
            wv=jax.random.normal(nxt(), (embed_dims, embed_dims), jnp.float32) * 0.05,
            bv=jnp.zeros((embed_dims,), jnp.float32),
            wo=jax.random.normal(nxt(), (embed_dims, embed_dims), jnp.float32) * 0.05,
            bo=jnp.zeros((embed_dims,), jnp.float32),
        )

    return dict(
        self_attn=attn_params(),
        cross_attn=attn_params(),
        norm0=dict(g=jnp.ones((embed_dims,), jnp.float32),
                   b=jnp.zeros((embed_dims,), jnp.float32)),
        norm1=dict(g=jnp.ones((embed_dims,), jnp.float32),
                   b=jnp.zeros((embed_dims,), jnp.float32)),
        norm2=dict(g=jnp.ones((embed_dims,), jnp.float32),
                   b=jnp.zeros((embed_dims,), jnp.float32)),
        ffn=dict(
            w1=jax.random.normal(nxt(), (embed_dims, ffn_dims), jnp.float32) * 0.05,
            b1=jnp.zeros((ffn_dims,), jnp.float32),
            w2=jax.random.normal(nxt(), (ffn_dims, embed_dims), jnp.float32) * 0.05,
            b2=jnp.zeros((embed_dims,), jnp.float32),
        ),
    )


if __name__ == "__main__":
    # Lane-dense small demo shapes (last dims are multiples of 128).
    EMBED = 128
    HEADS = 8
    FFN_DIM = 256
    LQ = 16      # num_queries
    LK = 32      # num_keys (memory length)
    B = 2        # batch

    root = jax.random.PRNGKey(0)
    k_q, k_k, k_v, k_qp, k_kp, k_p = jax.random.split(root, 6)

    query = jax.random.normal(k_q, (LQ, B, EMBED), jnp.float32)
    key = jax.random.normal(k_k, (LK, B, EMBED), jnp.float32)
    value = jax.random.normal(k_v, (LK, B, EMBED), jnp.float32)
    query_pos = jax.random.normal(k_qp, (LQ, B, EMBED), jnp.float32)
    key_pos = jax.random.normal(k_kp, (LK, B, EMBED), jnp.float32)

    params = _init_params(k_p, EMBED, FFN_DIM)

    fwd = jax.jit(base_transformer_layer_forward, static_argnums=(6,))
    out = fwd(query, key, value, query_pos, key_pos, params, HEADS)
    out = jax.block_until_ready(out)
    assert out.shape == (LQ, B, EMBED)
    assert bool(jnp.all(jnp.isfinite(out)))
    print("KERNEL_OK")
</pallas_src>

<mosaic_0001>
module attributes {stable_mosaic.version = 11 : i64} {
  func.func @_fused_layer_kernel(%arg0: i32, %arg1: memref<1x16x128xf32, #tpu.memory_space<vmem>>, %arg2: memref<1x32x128xf32, #tpu.memory_space<vmem>>, %arg3: memref<1x32x128xf32, #tpu.memory_space<vmem>>, %arg4: memref<1x16x128xf32, #tpu.memory_space<vmem>>, %arg5: memref<1x32x128xf32, #tpu.memory_space<vmem>>, %arg6: memref<4x128x128xbf16, #tpu.memory_space<vmem>>, %arg7: memref<4x128xf32, #tpu.memory_space<vmem>>, %arg8: memref<4x128x128xbf16, #tpu.memory_space<vmem>>, %arg9: memref<4x128xf32, #tpu.memory_space<vmem>>, %arg10: memref<128x256xbf16, #tpu.memory_space<vmem>>, %arg11: memref<1x256xf32, #tpu.memory_space<vmem>>, %arg12: memref<256x128xbf16, #tpu.memory_space<vmem>>, %arg13: memref<1x128xf32, #tpu.memory_space<vmem>>, %arg14: memref<3x128xf32, #tpu.memory_space<vmem>>, %arg15: memref<3x128xf32, #tpu.memory_space<vmem>>, %arg16: memref<1x16x128xf32, #tpu.memory_space<vmem>>) attributes {dimension_semantics = [#tpu.dimension_semantics<parallel>], iteration_bounds = array<i64: 2>, scalar_prefetch = 0 : i64, scratch_operands = 0 : i64, tpu.core_type = #tpu.core_type<tc>, window_params = [{transform_indices = @transform_0, window_bounds = array<i64: 1, 16, 128>}, {transform_indices = @transform_1, window_bounds = array<i64: 1, 32, 128>}, {transform_indices = @transform_2, window_bounds = array<i64: 1, 32, 128>}, {transform_indices = @transform_3, window_bounds = array<i64: 1, 16, 128>}, {transform_indices = @transform_4, window_bounds = array<i64: 1, 32, 128>}, {pipeline_mode = #tpu.pipeline_mode<synchronous>, transform_indices = @transform_5, window_bounds = array<i64: 4, 128, 128>}, {pipeline_mode = #tpu.pipeline_mode<synchronous>, transform_indices = @transform_6, window_bounds = array<i64: 4, 128>}, {pipeline_mode = #tpu.pipeline_mode<synchronous>, transform_indices = @transform_7, window_bounds = array<i64: 4, 128, 128>}, {pipeline_mode = #tpu.pipeline_mode<synchronous>, transform_indices = @transform_8, window_bounds = array<i64: 4, 128>}, {pipeline_mode = #tpu.pipeline_mode<synchronous>, transform_indices = @transform_9, window_bounds = array<i64: 128, 256>}, {pipeline_mode = #tpu.pipeline_mode<synchronous>, transform_indices = @transform_10, window_bounds = array<i64: 1, 256>}, {pipeline_mode = #tpu.pipeline_mode<synchronous>, transform_indices = @transform_11, window_bounds = array<i64: 256, 128>}, {pipeline_mode = #tpu.pipeline_mode<synchronous>, transform_indices = @transform_12, window_bounds = array<i64: 1, 128>}, {pipeline_mode = #tpu.pipeline_mode<synchronous>, transform_indices = @transform_13, window_bounds = array<i64: 3, 128>}, {pipeline_mode = #tpu.pipeline_mode<synchronous>, transform_indices = @transform_14, window_bounds = array<i64: 3, 128>}, {transform_indices = @transform_15, window_bounds = array<i64: 1, 16, 128>}]} {
    %c0 = arith.constant 0 : index
    %c0_0 = arith.constant 0 : index
    %c0_1 = arith.constant 0 : index
    %0 = vector.load %arg1[%c0, %c0_0, %c0_1] : memref<1x16x128xf32, #tpu.memory_space<vmem>>, vector<1x16x128xf32>
    %1 = vector.shape_cast %0 : vector<1x16x128xf32> to vector<16x128xf32>
    %c0_2 = arith.constant 0 : index
    %c0_3 = arith.constant 0 : index
    %c0_4 = arith.constant 0 : index
    %2 = vector.load %arg4[%c0_2, %c0_3, %c0_4] : memref<1x16x128xf32, #tpu.memory_space<vmem>>, vector<1x16x128xf32>
    %3 = vector.shape_cast %2 : vector<1x16x128xf32> to vector<16x128xf32>
    %4 = arith.addf %1, %3 : vector<16x128xf32>
    %5 = arith.truncf %4 : vector<16x128xf32> to vector<16x128xbf16>
    %6 = arith.addf %1, %3 : vector<16x128xf32>
    %7 = arith.truncf %6 : vector<16x128xf32> to vector<16x128xbf16>
    %8 = arith.truncf %1 : vector<16x128xf32> to vector<16x128xbf16>
    %c0_5 = arith.constant 0 : index
    %c0_6 = arith.constant 0 : index
    %c0_7 = arith.constant 0 : index
    %9 = vector.load %arg6[%c0_5, %c0_6, %c0_7] : memref<4x128x128xbf16, #tpu.memory_space<vmem>>, vector<1x128x128xbf16>
    %10 = vector.shape_cast %9 : vector<1x128x128xbf16> to vector<128x128xbf16>
    %cst = arith.constant dense<0.000000e+00> : vector<16x128xf32>
    %11 = tpu.matmul %5, %10, %cst {dimension_numbers = #tpu.dot_dimension_numbers<[1], [0], [0], [1], [0, 0, 1, 1], [], []>} : vector<16x128xbf16>, vector<128x128xbf16>, vector<16x128xf32> -> vector<16x128xf32>
    %c0_8 = arith.constant 0 : index
    %c0_9 = arith.constant 0 : index
    %12 = vector.load %arg7[%c0_8, %c0_9] : memref<4x128xf32, #tpu.memory_space<vmem>>, vector<1x128xf32>
    %13 = vector.broadcast %12 : vector<1x128xf32> to vector<16x128xf32>
    %14 = arith.addf %11, %13 : vector<16x128xf32>
    %c1 = arith.constant 1 : index
    %c0_10 = arith.constant 0 : index
    %c0_11 = arith.constant 0 : index
    %15 = vector.load %arg6[%c1, %c0_10, %c0_11] : memref<4x128x128xbf16, #tpu.memory_space<vmem>>, vector<1x128x128xbf16>
    %16 = vector.shape_cast %15 : vector<1x128x128xbf16> to vector<128x128xbf16>
    %cst_12 = arith.constant dense<0.000000e+00> : vector<16x128xf32>
    %17 = tpu.matmul %7, %16, %cst_12 {dimension_numbers = #tpu.dot_dimension_numbers<[1], [0], [0], [1], [0, 0, 1, 1], [], []>} : vector<16x128xbf16>, vector<128x128xbf16>, vector<16x128xf32> -> vector<16x128xf32>
    %c1_13 = arith.constant 1 : index
    %c0_14 = arith.constant 0 : index
    %18 = vector.load %arg7[%c1_13, %c0_14] : memref<4x128xf32, #tpu.memory_space<vmem>>, vector<1x128xf32>
    %19 = vector.broadcast %18 : vector<1x128xf32> to vector<16x128xf32>
    %20 = arith.addf %17, %19 : vector<16x128xf32>
    %c2 = arith.constant 2 : index
    %c0_15 = arith.constant 0 : index
    %c0_16 = arith.constant 0 : index
    %21 = vector.load %arg6[%c2, %c0_15, %c0_16] : memref<4x128x128xbf16, #tpu.memory_space<vmem>>, vector<1x128x128xbf16>
    %22 = vector.shape_cast %21 : vector<1x128x128xbf16> to vector<128x128xbf16>
    %cst_17 = arith.constant dense<0.000000e+00> : vector<16x128xf32>
    %23 = tpu.matmul %8, %22, %cst_17 {dimension_numbers = #tpu.dot_dimension_numbers<[1], [0], [0], [1], [0, 0, 1, 1], [], []>} : vector<16x128xbf16>, vector<128x128xbf16>, vector<16x128xf32> -> vector<16x128xf32>
    %c2_18 = arith.constant 2 : index
    %c0_19 = arith.constant 0 : index
    %24 = vector.load %arg7[%c2_18, %c0_19] : memref<4x128xf32, #tpu.memory_space<vmem>>, vector<1x128xf32>
    %25 = vector.broadcast %24 : vector<1x128xf32> to vector<16x128xf32>
    %26 = arith.addf %23, %25 : vector<16x128xf32>
    %27 = vector.extract_strided_slice %14 {offsets = [0, 0], sizes = [16, 16], strides = [1, 1]} : vector<16x128xf32> to vector<16x16xf32>
    %28 = arith.truncf %27 : vector<16x16xf32> to vector<16x16xbf16>
    %29 = vector.extract_strided_slice %20 {offsets = [0, 0], sizes = [16, 16], strides = [1, 1]} : vector<16x128xf32> to vector<16x16xf32>
    %30 = arith.truncf %29 : vector<16x16xf32> to vector<16x16xbf16>
    %31 = vector.extract_strided_slice %26 {offsets = [0, 0], sizes = [16, 16], strides = [1, 1]} : vector<16x128xf32> to vector<16x16xf32>
    %32 = arith.truncf %31 : vector<16x16xf32> to vector<16x16xbf16>
    %cst_20 = arith.constant dense<0.000000e+00> : vector<16x16xf32>
    %33 = tpu.matmul %28, %30, %cst_20 {dimension_numbers = #tpu.dot_dimension_numbers<[1], [1], [0], [0], [0, 0, 1, 0], [], []>} : vector<16x16xbf16>, vector<16x16xbf16>, vector<16x16xf32> -> vector<16x16xf32>
    %cst_21 = arith.constant dense<0xFF800000> : vector<16xf32>
    %34 = vector.multi_reduction <maximumf>, %33, %cst_21 [1] : vector<16x16xf32> to vector<16xf32>
    %35 = vector.shape_cast %34 : vector<16xf32> to vector<16x1xf32>
    %36 = vector.broadcast %35 : vector<16x1xf32> to vector<16x16xf32>
    %37 = arith.subf %33, %36 : vector<16x16xf32>
    %38 = math.exp %37 : vector<16x16xf32>
    %cst_22 = arith.constant dense<0.000000e+00> : vector<16xf32>
    %39 = vector.multi_reduction <add>, %38, %cst_22 [1] : vector<16x16xf32> to vector<16xf32>
    %40 = vector.shape_cast %39 : vector<16xf32> to vector<16x1xf32>
    %41 = tpu.reciprocal %40 {approx = true} : vector<16x1xf32> -> vector<16x1xf32>
    %42 = vector.broadcast %41 : vector<16x1xf32> to vector<16x16xf32>
    %43 = arith.mulf %38, %42 : vector<16x16xf32>
    %44 = arith.truncf %43 : vector<16x16xf32> to vector<16x16xbf16>
    %cst_23 = arith.constant dense<0.000000e+00> : vector<16x16xf32>
    %45 = tpu.matmul %44, %32, %cst_23 {dimension_numbers = #tpu.dot_dimension_numbers<[1], [0], [0], [1], [0, 0, 1, 1], [], []>} : vector<16x16xbf16>, vector<16x16xbf16>, vector<16x16xf32> -> vector<16x16xf32>
    %46 = vector.extract_strided_slice %14 {offsets = [0, 16], sizes = [16, 16], strides = [1, 1]} : vector<16x128xf32> to vector<16x16xf32>
    %47 = arith.truncf %46 : vector<16x16xf32> to vector<16x16xbf16>
    %48 = vector.extract_strided_slice %20 {offsets = [0, 16], sizes = [16, 16], strides = [1, 1]} : vector<16x128xf32> to vector<16x16xf32>
    %49 = arith.truncf %48 : vector<16x16xf32> to vector<16x16xbf16>
    %50 = vector.extract_strided_slice %26 {offsets = [0, 16], sizes = [16, 16], strides = [1, 1]} : vector<16x128xf32> to vector<16x16xf32>
    %51 = arith.truncf %50 : vector<16x16xf32> to vector<16x16xbf16>
    %cst_24 = arith.constant dense<0.000000e+00> : vector<16x16xf32>
    %52 = tpu.matmul %47, %49, %cst_24 {dimension_numbers = #tpu.dot_dimension_numbers<[1], [1], [0], [0], [0, 0, 1, 0], [], []>} : vector<16x16xbf16>, vector<16x16xbf16>, vector<16x16xf32> -> vector<16x16xf32>
    %cst_25 = arith.constant dense<0xFF800000> : vector<16xf32>
    %53 = vector.multi_reduction <maximumf>, %52, %cst_25 [1] : vector<16x16xf32> to vector<16xf32>
    %54 = vector.shape_cast %53 : vector<16xf32> to vector<16x1xf32>
    %55 = vector.broadcast %54 : vector<16x1xf32> to vector<16x16xf32>
    %56 = arith.subf %52, %55 : vector<16x16xf32>
    %57 = math.exp %56 : vector<16x16xf32>
    %cst_26 = arith.constant dense<0.000000e+00> : vector<16xf32>
    %58 = vector.multi_reduction <add>, %57, %cst_26 [1] : vector<16x16xf32> to vector<16xf32>
    %59 = vector.shape_cast %58 : vector<16xf32> to vector<16x1xf32>
    %60 = tpu.reciprocal %59 {approx = true} : vector<16x1xf32> -> vector<16x1xf32>
    %61 = vector.broadcast %60 : vector<16x1xf32> to vector<16x16xf32>
    %62 = arith.mulf %57, %61 : vector<16x16xf32>
    %63 = arith.truncf %62 : vector<16x16xf32> to vector<16x16xbf16>
    %cst_27 = arith.constant dense<0.000000e+00> : vector<16x16xf32>
    %64 = tpu.matmul %63, %51, %cst_27 {dimension_numbers = #tpu.dot_dimension_numbers<[1], [0], [0], [1], [0, 0, 1, 1], [], []>} : vector<16x16xbf16>, vector<16x16xbf16>, vector<16x16xf32> -> vector<16x16xf32>
    %65 = vector.extract_strided_slice %14 {offsets = [0, 32], sizes = [16, 16], strides = [1, 1]} : vector<16x128xf32> to vector<16x16xf32>
    %66 = arith.truncf %65 : vector<16x16xf32> to vector<16x16xbf16>
    %67 = vector.extract_strided_slice %20 {offsets = [0, 32], sizes = [16, 16], strides = [1, 1]} : vector<16x128xf32> to vector<16x16xf32>
    %68 = arith.truncf %67 : vector<16x16xf32> to vector<16x16xbf16>
    %69 = vector.extract_strided_slice %26 {offsets = [0, 32], sizes = [16, 16], strides = [1, 1]} : vector<16x128xf32> to vector<16x16xf32>
    %70 = arith.truncf %69 : vector<16x16xf32> to vector<16x16xbf16>
    %cst_28 = arith.constant dense<0.000000e+00> : vector<16x16xf32>
    %71 = tpu.matmul %66, %68, %cst_28 {dimension_numbers = #tpu.dot_dimension_numbers<[1], [1], [0], [0], [0, 0, 1, 0], [], []>} : vector<16x16xbf16>, vector<16x16xbf16>, vector<16x16xf32> -> vector<16x16xf32>
    %cst_29 = arith.constant dense<0xFF800000> : vector<16xf32>
    %72 = vector.multi_reduction <maximumf>, %71, %cst_29 [1] : vector<16x16xf32> to vector<16xf32>
    %73 = vector.shape_cast %72 : vector<16xf32> to vector<16x1xf32>
    %74 = vector.broadcast %73 : vector<16x1xf32> to vector<16x16xf32>
    %75 = arith.subf %71, %74 : vector<16x16xf32>
    %76 = math.exp %75 : vector<16x16xf32>
    %cst_30 = arith.constant dense<0.000000e+00> : vector<16xf32>
    %77 = vector.multi_reduction <add>, %76, %cst_30 [1] : vector<16x16xf32> to vector<16xf32>
    %78 = vector.shape_cast %77 : vector<16xf32> to vector<16x1xf32>
    %79 = tpu.reciprocal %78 {approx = true} : vector<16x1xf32> -> vector<16x1xf32>
    %80 = vector.broadcast %79 : vector<16x1xf32> to vector<16x16xf32>
    %81 = arith.mulf %76, %80 : vector<16x16xf32>
    %82 = arith.truncf %81 : vector<16x16xf32> to vector<16x16xbf16>
    %cst_31 = arith.constant dense<0.000000e+00> : vector<16x16xf32>
    %83 = tpu.matmul %82, %70, %cst_31 {dimension_numbers = #tpu.dot_dimension_numbers<[1], [0], [0], [1], [0, 0, 1, 1], [], []>} : vector<16x16xbf16>, vector<16x16xbf16>, vector<16x16xf32> -> vector<16x16xf32>
    %84 = vector.extract_strided_slice %14 {offsets = [0, 48], sizes = [16, 16], strides = [1, 1]} : vector<16x128xf32> to vector<16x16xf32>
    %85 = arith.truncf %84 : vector<16x16xf32> to vector<16x16xbf16>
    %86 = vector.extract_strided_slice %20 {offsets = [0, 48], sizes = [16, 16], strides = [1, 1]} : vector<16x128xf32> to vector<16x16xf32>
    %87 = arith.truncf %86 : vector<16x16xf32> to vector<16x16xbf16>
    %88 = vector.extract_strided_slice %26 {offsets = [0, 48], sizes = [16, 16], strides = [1, 1]} : vector<16x128xf32> to vector<16x16xf32>
    %89 = arith.truncf %88 : vector<16x16xf32> to vector<16x16xbf16>
    %cst_32 = arith.constant dense<0.000000e+00> : vector<16x16xf32>
    %90 = tpu.matmul %85, %87, %cst_32 {dimension_numbers = #tpu.dot_dimension_numbers<[1], [1], [0], [0], [0, 0, 1, 0], [], []>} : vector<16x16xbf16>, vector<16x16xbf16>, vector<16x16xf32> -> vector<16x16xf32>
    %cst_33 = arith.constant dense<0xFF800000> : vector<16xf32>
    %91 = vector.multi_reduction <maximumf>, %90, %cst_33 [1] : vector<16x16xf32> to vector<16xf32>
    %92 = vector.shape_cast %91 : vector<16xf32> to vector<16x1xf32>
    %93 = vector.broadcast %92 : vector<16x1xf32> to vector<16x16xf32>
    %94 = arith.subf %90, %93 : vector<16x16xf32>
    %95 = math.exp %94 : vector<16x16xf32>
    %cst_34 = arith.constant dense<0.000000e+00> : vector<16xf32>
    %96 = vector.multi_reduction <add>, %95, %cst_34 [1] : vector<16x16xf32> to vector<16xf32>
    %97 = vector.shape_cast %96 : vector<16xf32> to vector<16x1xf32>
    %98 = tpu.reciprocal %97 {approx = true} : vector<16x1xf32> -> vector<16x1xf32>
    %99 = vector.broadcast %98 : vector<16x1xf32> to vector<16x16xf32>
    %100 = arith.mulf %95, %99 : vector<16x16xf32>
    %101 = arith.truncf %100 : vector<16x16xf32> to vector<16x16xbf16>
    %cst_35 = arith.constant dense<0.000000e+00> : vector<16x16xf32>
    %102 = tpu.matmul %101, %89, %cst_35 {dimension_numbers = #tpu.dot_dimension_numbers<[1], [0], [0], [1], [0, 0, 1, 1], [], []>} : vector<16x16xbf16>, vector<16x16xbf16>, vector<16x16xf32> -> vector<16x16xf32>
    %103 = vector.extract_strided_slice %14 {offsets = [0, 64], sizes = [16, 16], strides = [1, 1]} : vector<16x128xf32> to vector<16x16xf32>
    %104 = arith.truncf %103 : vector<16x16xf32> to vector<16x16xbf16>
    %105 = vector.extract_strided_slice %20 {offsets = [0, 64], sizes = [16, 16], strides = [1, 1]} : vector<16x128xf32> to vector<16x16xf32>
    %106 = arith.truncf %105 : vector<16x16xf32> to vector<16x16xbf16>
    %107 = vector.extract_strided_slice %26 {offsets = [0, 64], sizes = [16, 16], strides = [1, 1]} : vector<16x128xf32> to vector<16x16xf32>
    %108 = arith.truncf %107 : vector<16x16xf32> to vector<16x16xbf16>
    %cst_36 = arith.constant dense<0.000000e+00> : vector<16x16xf32>
    %109 = tpu.matmul %104, %106, %cst_36 {dimension_numbers = #tpu.dot_dimension_numbers<[1], [1], [0], [0], [0, 0, 1, 0], [], []>} : vector<16x16xbf16>, vector<16x16xbf16>, vector<16x16xf32> -> vector<16x16xf32>
    %cst_37 = arith.constant dense<0xFF800000> : vector<16xf32>
    %110 = vector.multi_reduction <maximumf>, %109, %cst_37 [1] : vector<16x16xf32> to vector<16xf32>
    %111 = vector.shape_cast %110 : vector<16xf32> to vector<16x1xf32>
    %112 = vector.broadcast %111 : vector<16x1xf32> to vector<16x16xf32>
    %113 = arith.subf %109, %112 : vector<16x16xf32>
    %114 = math.exp %113 : vector<16x16xf32>
    %cst_38 = arith.constant dense<0.000000e+00> : vector<16xf32>
    %115 = vector.multi_reduction <add>, %114, %cst_38 [1] : vector<16x16xf32> to vector<16xf32>
    %116 = vector.shape_cast %115 : vector<16xf32> to vector<16x1xf32>
    %117 = tpu.reciprocal %116 {approx = true} : vector<16x1xf32> -> vector<16x1xf32>
    %118 = vector.broadcast %117 : vector<16x1xf32> to vector<16x16xf32>
    %119 = arith.mulf %114, %118 : vector<16x16xf32>
    %120 = arith.truncf %119 : vector<16x16xf32> to vector<16x16xbf16>
    %cst_39 = arith.constant dense<0.000000e+00> : vector<16x16xf32>
    %121 = tpu.matmul %120, %108, %cst_39 {dimension_numbers = #tpu.dot_dimension_numbers<[1], [0], [0], [1], [0, 0, 1, 1], [], []>} : vector<16x16xbf16>, vector<16x16xbf16>, vector<16x16xf32> -> vector<16x16xf32>
    %122 = vector.extract_strided_slice %14 {offsets = [0, 80], sizes = [16, 16], strides = [1, 1]} : vector<16x128xf32> to vector<16x16xf32>
    %123 = arith.truncf %122 : vector<16x16xf32> to vector<16x16xbf16>
    %124 = vector.extract_strided_slice %20 {offsets = [0, 80], sizes = [16, 16], strides = [1, 1]} : vector<16x128xf32> to vector<16x16xf32>
    %125 = arith.truncf %124 : vector<16x16xf32> to vector<16x16xbf16>
    %126 = vector.extract_strided_slice %26 {offsets = [0, 80], sizes = [16, 16], strides = [1, 1]} : vector<16x128xf32> to vector<16x16xf32>
    %127 = arith.truncf %126 : vector<16x16xf32> to vector<16x16xbf16>
    %cst_40 = arith.constant dense<0.000000e+00> : vector<16x16xf32>
    %128 = tpu.matmul %123, %125, %cst_40 {dimension_numbers = #tpu.dot_dimension_numbers<[1], [1], [0], [0], [0, 0, 1, 0], [], []>} : vector<16x16xbf16>, vector<16x16xbf16>, vector<16x16xf32> -> vector<16x16xf32>
    %cst_41 = arith.constant dense<0xFF800000> : vector<16xf32>
    %129 = vector.multi_reduction <maximumf>, %128, %cst_41 [1] : vector<16x16xf32> to vector<16xf32>
    %130 = vector.shape_cast %129 : vector<16xf32> to vector<16x1xf32>
    %131 = vector.broadcast %130 : vector<16x1xf32> to vector<16x16xf32>
    %132 = arith.subf %128, %131 : vector<16x16xf32>
    %133 = math.exp %132 : vector<16x16xf32>
    %cst_42 = arith.constant dense<0.000000e+00> : vector<16xf32>
    %134 = vector.multi_reduction <add>, %133, %cst_42 [1] : vector<16x16xf32> to vector<16xf32>
    %135 = vector.shape_cast %134 : vector<16xf32> to vector<16x1xf32>
    %136 = tpu.reciprocal %135 {approx = true} : vector<16x1xf32> -> vector<16x1xf32>
    %137 = vector.broadcast %136 : vector<16x1xf32> to vector<16x16xf32>
    %138 = arith.mulf %133, %137 : vector<16x16xf32>
    %139 = arith.truncf %138 : vector<16x16xf32> to vector<16x16xbf16>
    %cst_43 = arith.constant dense<0.000000e+00> : vector<16x16xf32>
    %140 = tpu.matmul %139, %127, %cst_43 {dimension_numbers = #tpu.dot_dimension_numbers<[1], [0], [0], [1], [0, 0, 1, 1], [], []>} : vector<16x16xbf16>, vector<16x16xbf16>, vector<16x16xf32> -> vector<16x16xf32>
    %141 = vector.extract_strided_slice %14 {offsets = [0, 96], sizes = [16, 16], strides = [1, 1]} : vector<16x128xf32> to vector<16x16xf32>
    %142 = arith.truncf %141 : vector<16x16xf32> to vector<16x16xbf16>
    %143 = vector.extract_strided_slice %20 {offsets = [0, 96], sizes = [16, 16], strides = [1, 1]} : vector<16x128xf32> to vector<16x16xf32>
    %144 = arith.truncf %143 : vector<16x16xf32> to vector<16x16xbf16>
    %145 = vector.extract_strided_slice %26 {offsets = [0, 96], sizes = [16, 16], strides = [1, 1]} : vector<16x128xf32> to vector<16x16xf32>
    %146 = arith.truncf %145 : vector<16x16xf32> to vector<16x16xbf16>
    %cst_44 = arith.constant dense<0.000000e+00> : vector<16x16xf32>
    %147 = tpu.matmul %142, %144, %cst_44 {dimension_numbers = #tpu.dot_dimension_numbers<[1], [1], [0], [0], [0, 0, 1, 0], [], []>} : vector<16x16xbf16>, vector<16x16xbf16>, vector<16x16xf32> -> vector<16x16xf32>
    %cst_45 = arith.constant dense<0xFF800000> : vector<16xf32>
    %148 = vector.multi_reduction <maximumf>, %147, %cst_45 [1] : vector<16x16xf32> to vector<16xf32>
    %149 = vector.shape_cast %148 : vector<16xf32> to vector<16x1xf32>
    %150 = vector.broadcast %149 : vector<16x1xf32> to vector<16x16xf32>
    %151 = arith.subf %147, %150 : vector<16x16xf32>
    %152 = math.exp %151 : vector<16x16xf32>
    %cst_46 = arith.constant dense<0.000000e+00> : vector<16xf32>
    %153 = vector.multi_reduction <add>, %152, %cst_46 [1] : vector<16x16xf32> to vector<16xf32>
    %154 = vector.shape_cast %153 : vector<16xf32> to vector<16x1xf32>
    %155 = tpu.reciprocal %154 {approx = true} : vector<16x1xf32> -> vector<16x1xf32>
    %156 = vector.broadcast %155 : vector<16x1xf32> to vector<16x16xf32>
    %157 = arith.mulf %152, %156 : vector<16x16xf32>
    %158 = arith.truncf %157 : vector<16x16xf32> to vector<16x16xbf16>
    %cst_47 = arith.constant dense<0.000000e+00> : vector<16x16xf32>
    %159 = tpu.matmul %158, %146, %cst_47 {dimension_numbers = #tpu.dot_dimension_numbers<[1], [0], [0], [1], [0, 0, 1, 1], [], []>} : vector<16x16xbf16>, vector<16x16xbf16>, vector<16x16xf32> -> vector<16x16xf32>
    %160 = vector.extract_strided_slice %14 {offsets = [0, 112], sizes = [16, 16], strides = [1, 1]} : vector<16x128xf32> to vector<16x16xf32>
    %161 = arith.truncf %160 : vector<16x16xf32> to vector<16x16xbf16>
    %162 = vector.extract_strided_slice %20 {offsets = [0, 112], sizes = [16, 16], strides = [1, 1]} : vector<16x128xf32> to vector<16x16xf32>
    %163 = arith.truncf %162 : vector<16x16xf32> to vector<16x16xbf16>
    %164 = vector.extract_strided_slice %26 {offsets = [0, 112], sizes = [16, 16], strides = [1, 1]} : vector<16x128xf32> to vector<16x16xf32>
    %165 = arith.truncf %164 : vector<16x16xf32> to vector<16x16xbf16>
    %cst_48 = arith.constant dense<0.000000e+00> : vector<16x16xf32>
    %166 = tpu.matmul %161, %163, %cst_48 {dimension_numbers = #tpu.dot_dimension_numbers<[1], [1], [0], [0], [0, 0, 1, 0], [], []>} : vector<16x16xbf16>, vector<16x16xbf16>, vector<16x16xf32> -> vector<16x16xf32>
    %cst_49 = arith.constant dense<0xFF800000> : vector<16xf32>
    %167 = vector.multi_reduction <maximumf>, %166, %cst_49 [1] : vector<16x16xf32> to vector<16xf32>
    %168 = vector.shape_cast %167 : vector<16xf32> to vector<16x1xf32>
    %169 = vector.broadcast %168 : vector<16x1xf32> to vector<16x16xf32>
    %170 = arith.subf %166, %169 : vector<16x16xf32>
    %171 = math.exp %170 : vector<16x16xf32>
    %cst_50 = arith.constant dense<0.000000e+00> : vector<16xf32>
    %172 = vector.multi_reduction <add>, %171, %cst_50 [1] : vector<16x16xf32> to vector<16xf32>
    %173 = vector.shape_cast %172 : vector<16xf32> to vector<16x1xf32>
    %174 = tpu.reciprocal %173 {approx = true} : vector<16x1xf32> -> vector<16x1xf32>
    %175 = vector.broadcast %174 : vector<16x1xf32> to vector<16x16xf32>
    %176 = arith.mulf %171, %175 : vector<16x16xf32>
    %177 = arith.truncf %176 : vector<16x16xf32> to vector<16x16xbf16>
    %cst_51 = arith.constant dense<0.000000e+00> : vector<16x16xf32>
    %178 = tpu.matmul %177, %165, %cst_51 {dimension_numbers = #tpu.dot_dimension_numbers<[1], [0], [0], [1], [0, 0, 1, 1], [], []>} : vector<16x16xbf16>, vector<16x16xbf16>, vector<16x16xf32> -> vector<16x16xf32>
    %179 = tpu.concatenate %45, %64, %83, %102, %121, %140, %159, %178 in 1 : vector<16x16xf32>, vector<16x16xf32>, vector<16x16xf32>, vector<16x16xf32>, vector<16x16xf32>, vector<16x16xf32>, vector<16x16xf32>, vector<16x16xf32> -> vector<16x128xf32>
    %180 = arith.truncf %179 : vector<16x128xf32> to vector<16x128xbf16>
    %c3 = arith.constant 3 : index
    %c0_52 = arith.constant 0 : index
    %c0_53 = arith.constant 0 : index
    %181 = vector.load %arg6[%c3, %c0_52, %c0_53] : memref<4x128x128xbf16, #tpu.memory_space<vmem>>, vector<1x128x128xbf16>
    %182 = vector.shape_cast %181 : vector<1x128x128xbf16> to vector<128x128xbf16>
    %cst_54 = arith.constant dense<0.000000e+00> : vector<16x128xf32>
    %183 = tpu.matmul %180, %182, %cst_54 {dimension_numbers = #tpu.dot_dimension_numbers<[1], [0], [0], [1], [0, 0, 1, 1], [], []>} : vector<16x128xbf16>, vector<128x128xbf16>, vector<16x128xf32> -> vector<16x128xf32>
    %c3_55 = arith.constant 3 : index
    %c0_56 = arith.constant 0 : index
    %184 = vector.load %arg7[%c3_55, %c0_56] : memref<4x128xf32, #tpu.memory_space<vmem>>, vector<1x128xf32>
    %185 = vector.broadcast %184 : vector<1x128xf32> to vector<16x128xf32>
    %186 = arith.addf %183, %185 : vector<16x128xf32>
    %187 = arith.addf %186, %1 : vector<16x128xf32>
    %c0_57 = arith.constant 0 : index
    %c0_58 = arith.constant 0 : index
    %188 = vector.load %arg14[%c0_57, %c0_58] : memref<3x128xf32, #tpu.memory_space<vmem>>, vector<1x128xf32>
    %c0_59 = arith.constant 0 : index
    %c0_60 = arith.constant 0 : index
    %189 = vector.load %arg15[%c0_59, %c0_60] : memref<3x128xf32, #tpu.memory_space<vmem>>, vector<1x128xf32>
    %cst_61 = arith.constant dense<0.000000e+00> : vector<16xf32>
    %190 = vector.multi_reduction <add>, %187, %cst_61 [1] : vector<16x128xf32> to vector<16xf32>
    %191 = vector.shape_cast %190 : vector<16xf32> to vector<16x1xf32>
    %cst_62 = arith.constant 1.280000e+02 : f32
    %192 = vector.broadcast %cst_62 : f32 to vector<16x1xf32>
    %193 = arith.divf %191, %192 : vector<16x1xf32>
    %194 = vector.broadcast %193 : vector<16x1xf32> to vector<16x128xf32>
    %195 = arith.subf %187, %194 : vector<16x128xf32>
    %196 = arith.mulf %195, %195 : vector<16x128xf32>
    %cst_63 = arith.constant dense<0.000000e+00> : vector<16xf32>
    %197 = vector.multi_reduction <add>, %196, %cst_63 [1] : vector<16x128xf32> to vector<16xf32>
    %198 = vector.shape_cast %197 : vector<16xf32> to vector<16x1xf32>
    %cst_64 = arith.constant 1.280000e+02 : f32
    %199 = vector.broadcast %cst_64 : f32 to vector<16x1xf32>
    %200 = arith.divf %198, %199 : vector<16x1xf32>
    %cst_65 = arith.constant 9.99999974E-6 : f32
    %201 = vector.broadcast %cst_65 : f32 to vector<16x1xf32>
    %202 = arith.addf %200, %201 : vector<16x1xf32>
    %203 = math.rsqrt %202 : vector<16x1xf32>
    %204 = vector.broadcast %193 : vector<16x1xf32> to vector<16x128xf32>
    %205 = arith.subf %187, %204 : vector<16x128xf32>
    %206 = vector.broadcast %203 : vector<16x1xf32> to vector<16x128xf32>
    %207 = arith.mulf %205, %206 : vector<16x128xf32>
    %208 = vector.broadcast %188 : vector<1x128xf32> to vector<16x128xf32>
    %209 = arith.mulf %207, %208 : vector<16x128xf32>
    %210 = vector.broadcast %189 : vector<1x128xf32> to vector<16x128xf32>
    %211 = arith.addf %209, %210 : vector<16x128xf32>
    %c0_66 = arith.constant 0 : index
    %c0_67 = arith.constant 0 : index
    %c0_68 = arith.constant 0 : index
    %212 = vector.load %arg2[%c0_66, %c0_67, %c0_68] : memref<1x32x128xf32, #tpu.memory_space<vmem>>, vector<1x32x128xf32>
    %213 = vector.shape_cast %212 : vector<1x32x128xf32> to vector<32x128xf32>
    %c0_69 = arith.constant 0 : index
    %c0_70 = arith.constant 0 : index
    %c0_71 = arith.constant 0 : index
    %214 = vector.load %arg5[%c0_69, %c0_70, %c0_71] : memref<1x32x128xf32, #tpu.memory_space<vmem>>, vector<1x32x128xf32>
    %215 = vector.shape_cast %214 : vector<1x32x128xf32> to vector<32x128xf32>
    %c0_72 = arith.constant 0 : index
    %c0_73 = arith.constant 0 : index
    %c0_74 = arith.constant 0 : index
    %216 = vector.load %arg3[%c0_72, %c0_73, %c0_74] : memref<1x32x128xf32, #tpu.memory_space<vmem>>, vector<1x32x128xf32>
    %217 = vector.shape_cast %216 : vector<1x32x128xf32> to vector<32x128xf32>
    %218 = arith.addf %211, %3 : vector<16x128xf32>
    %219 = arith.truncf %218 : vector<16x128xf32> to vector<16x128xbf16>
    %220 = arith.addf %213, %215 : vector<32x128xf32>
    %221 = arith.truncf %220 : vector<32x128xf32> to vector<32x128xbf16>
    %222 = arith.truncf %217 : vector<32x128xf32> to vector<32x128xbf16>
    %c0_75 = arith.constant 0 : index
    %c0_76 = arith.constant 0 : index
    %c0_77 = arith.constant 0 : index
    %223 = vector.load %arg8[%c0_75, %c0_76, %c0_77] : memref<4x128x128xbf16, #tpu.memory_space<vmem>>, vector<1x128x128xbf16>
    %224 = vector.shape_cast %223 : vector<1x128x128xbf16> to vector<128x128xbf16>
    %cst_78 = arith.constant dense<0.000000e+00> : vector<16x128xf32>
    %225 = tpu.matmul %219, %224, %cst_78 {dimension_numbers = #tpu.dot_dimension_numbers<[1], [0], [0], [1], [0, 0, 1, 1], [], []>} : vector<16x128xbf16>, vector<128x128xbf16>, vector<16x128xf32> -> vector<16x128xf32>
    %c0_79 = arith.constant 0 : index
    %c0_80 = arith.constant 0 : index
    %226 = vector.load %arg9[%c0_79, %c0_80] : memref<4x128xf32, #tpu.memory_space<vmem>>, vector<1x128xf32>
    %227 = vector.broadcast %226 : vector<1x128xf32> to vector<16x128xf32>
    %228 = arith.addf %225, %227 : vector<16x128xf32>
    %c1_81 = arith.constant 1 : index
    %c0_82 = arith.constant 0 : index
    %c0_83 = arith.constant 0 : index
    %229 = vector.load %arg8[%c1_81, %c0_82, %c0_83] : memref<4x128x128xbf16, #tpu.memory_space<vmem>>, vector<1x128x128xbf16>
    %230 = vector.shape_cast %229 : vector<1x128x128xbf16> to vector<128x128xbf16>
    %cst_84 = arith.constant dense<0.000000e+00> : vector<32x128xf32>
    %231 = tpu.matmul %221, %230, %cst_84 {dimension_numbers = #tpu.dot_dimension_numbers<[1], [0], [0], [1], [0, 0, 1, 1], [], []>} : vector<32x128xbf16>, vector<128x128xbf16>, vector<32x128xf32> -> vector<32x128xf32>
    %c1_85 = arith.constant 1 : index
    %c0_86 = arith.constant 0 : index
    %232 = vector.load %arg9[%c1_85, %c0_86] : memref<4x128xf32, #tpu.memory_space<vmem>>, vector<1x128xf32>
    %233 = vector.broadcast %232 : vector<1x128xf32> to vector<32x128xf32>
    %234 = arith.addf %231, %233 : vector<32x128xf32>
    %c2_87 = arith.constant 2 : index
    %c0_88 = arith.constant 0 : index
    %c0_89 = arith.constant 0 : index
    %235 = vector.load %arg8[%c2_87, %c0_88, %c0_89] : memref<4x128x128xbf16, #tpu.memory_space<vmem>>, vector<1x128x128xbf16>
    %236 = vector.shape_cast %235 : vector<1x128x128xbf16> to vector<128x128xbf16>
    %cst_90 = arith.constant dense<0.000000e+00> : vector<32x128xf32>
    %237 = tpu.matmul %222, %236, %cst_90 {dimension_numbers = #tpu.dot_dimension_numbers<[1], [0], [0], [1], [0, 0, 1, 1], [], []>} : vector<32x128xbf16>, vector<128x128xbf16>, vector<32x128xf32> -> vector<32x128xf32>
    %c2_91 = arith.constant 2 : index
    %c0_92 = arith.constant 0 : index
    %238 = vector.load %arg9[%c2_91, %c0_92] : memref<4x128xf32, #tpu.memory_space<vmem>>, vector<1x128xf32>
    %239 = vector.broadcast %238 : vector<1x128xf32> to vector<32x128xf32>
    %240 = arith.addf %237, %239 : vector<32x128xf32>
    %241 = vector.extract_strided_slice %228 {offsets = [0, 0], sizes = [16, 16], strides = [1, 1]} : vector<16x128xf32> to vector<16x16xf32>
    %242 = arith.truncf %241 : vector<16x16xf32> to vector<16x16xbf16>
    %243 = vector.extract_strided_slice %234 {offsets = [0, 0], sizes = [32, 16], strides = [1, 1]} : vector<32x128xf32> to vector<32x16xf32>
    %244 = arith.truncf %243 : vector<32x16xf32> to vector<32x16xbf16>
    %245 = vector.extract_strided_slice %240 {offsets = [0, 0], sizes = [32, 16], strides = [1, 1]} : vector<32x128xf32> to vector<32x16xf32>
    %246 = arith.truncf %245 : vector<32x16xf32> to vector<32x16xbf16>
    %cst_93 = arith.constant dense<0.000000e+00> : vector<16x32xf32>
    %247 = tpu.matmul %242, %244, %cst_93 {dimension_numbers = #tpu.dot_dimension_numbers<[1], [1], [0], [0], [0, 0, 1, 0], [], []>} : vector<16x16xbf16>, vector<32x16xbf16>, vector<16x32xf32> -> vector<16x32xf32>
    %cst_94 = arith.constant dense<0xFF800000> : vector<16xf32>
    %248 = vector.multi_reduction <maximumf>, %247, %cst_94 [1] : vector<16x32xf32> to vector<16xf32>
    %249 = vector.shape_cast %248 : vector<16xf32> to vector<16x1xf32>
    %250 = vector.broadcast %249 : vector<16x1xf32> to vector<16x32xf32>
    %251 = arith.subf %247, %250 : vector<16x32xf32>
    %252 = math.exp %251 : vector<16x32xf32>
    %cst_95 = arith.constant dense<0.000000e+00> : vector<16xf32>
    %253 = vector.multi_reduction <add>, %252, %cst_95 [1] : vector<16x32xf32> to vector<16xf32>
    %254 = vector.shape_cast %253 : vector<16xf32> to vector<16x1xf32>
    %255 = tpu.reciprocal %254 {approx = true} : vector<16x1xf32> -> vector<16x1xf32>
    %256 = vector.broadcast %255 : vector<16x1xf32> to vector<16x32xf32>
    %257 = arith.mulf %252, %256 : vector<16x32xf32>
    %258 = arith.truncf %257 : vector<16x32xf32> to vector<16x32xbf16>
    %cst_96 = arith.constant dense<0.000000e+00> : vector<16x16xf32>
    %259 = tpu.matmul %258, %246, %cst_96 {dimension_numbers = #tpu.dot_dimension_numbers<[1], [0], [0], [1], [0, 0, 1, 1], [], []>} : vector<16x32xbf16>, vector<32x16xbf16>, vector<16x16xf32> -> vector<16x16xf32>
    %260 = vector.extract_strided_slice %228 {offsets = [0, 16], sizes = [16, 16], strides = [1, 1]} : vector<16x128xf32> to vector<16x16xf32>
    %261 = arith.truncf %260 : vector<16x16xf32> to vector<16x16xbf16>
    %262 = vector.extract_strided_slice %234 {offsets = [0, 16], sizes = [32, 16], strides = [1, 1]} : vector<32x128xf32> to vector<32x16xf32>
    %263 = arith.truncf %262 : vector<32x16xf32> to vector<32x16xbf16>
    %264 = vector.extract_strided_slice %240 {offsets = [0, 16], sizes = [32, 16], strides = [1, 1]} : vector<32x128xf32> to vector<32x16xf32>
    %265 = arith.truncf %264 : vector<32x16xf32> to vector<32x16xbf16>
    %cst_97 = arith.constant dense<0.000000e+00> : vector<16x32xf32>
    %266 = tpu.matmul %261, %263, %cst_97 {dimension_numbers = #tpu.dot_dimension_numbers<[1], [1], [0], [0], [0, 0, 1, 0], [], []>} : vector<16x16xbf16>, vector<32x16xbf16>, vector<16x32xf32> -> vector<16x32xf32>
    %cst_98 = arith.constant dense<0xFF800000> : vector<16xf32>
    %267 = vector.multi_reduction <maximumf>, %266, %cst_98 [1] : vector<16x32xf32> to vector<16xf32>
    %268 = vector.shape_cast %267 : vector<16xf32> to vector<16x1xf32>
    %269 = vector.broadcast %268 : vector<16x1xf32> to vector<16x32xf32>
    %270 = arith.subf %266, %269 : vector<16x32xf32>
    %271 = math.exp %270 : vector<16x32xf32>
    %cst_99 = arith.constant dense<0.000000e+00> : vector<16xf32>
    %272 = vector.multi_reduction <add>, %271, %cst_99 [1] : vector<16x32xf32> to vector<16xf32>
    %273 = vector.shape_cast %272 : vector<16xf32> to vector<16x1xf32>
    %274 = tpu.reciprocal %273 {approx = true} : vector<16x1xf32> -> vector<16x1xf32>
    %275 = vector.broadcast %274 : vector<16x1xf32> to vector<16x32xf32>
    %276 = arith.mulf %271, %275 : vector<16x32xf32>
    %277 = arith.truncf %276 : vector<16x32xf32> to vector<16x32xbf16>
    %cst_100 = arith.constant dense<0.000000e+00> : vector<16x16xf32>
    %278 = tpu.matmul %277, %265, %cst_100 {dimension_numbers = #tpu.dot_dimension_numbers<[1], [0], [0], [1], [0, 0, 1, 1], [], []>} : vector<16x32xbf16>, vector<32x16xbf16>, vector<16x16xf32> -> vector<16x16xf32>
    %279 = vector.extract_strided_slice %228 {offsets = [0, 32], sizes = [16, 16], strides = [1, 1]} : vector<16x128xf32> to vector<16x16xf32>
    %280 = arith.truncf %279 : vector<16x16xf32> to vector<16x16xbf16>
    %281 = vector.extract_strided_slice %234 {offsets = [0, 32], sizes = [32, 16], strides = [1, 1]} : vector<32x128xf32> to vector<32x16xf32>
    %282 = arith.truncf %281 : vector<32x16xf32> to vector<32x16xbf16>
    %283 = vector.extract_strided_slice %240 {offsets = [0, 32], sizes = [32, 16], strides = [1, 1]} : vector<32x128xf32> to vector<32x16xf32>
    %284 = arith.truncf %283 : vector<32x16xf32> to vector<32x16xbf16>
    %cst_101 = arith.constant dense<0.000000e+00> : vector<16x32xf32>
    %285 = tpu.matmul %280, %282, %cst_101 {dimension_numbers = #tpu.dot_dimension_numbers<[1], [1], [0], [0], [0, 0, 1, 0], [], []>} : vector<16x16xbf16>, vector<32x16xbf16>, vector<16x32xf32> -> vector<16x32xf32>
    %cst_102 = arith.constant dense<0xFF800000> : vector<16xf32>
    %286 = vector.multi_reduction <maximumf>, %285, %cst_102 [1] : vector<16x32xf32> to vector<16xf32>
    %287 = vector.shape_cast %286 : vector<16xf32> to vector<16x1xf32>
    %288 = vector.broadcast %287 : vector<16x1xf32> to vector<16x32xf32>
    %289 = arith.subf %285, %288 : vector<16x32xf32>
    %290 = math.exp %289 : vector<16x32xf32>
    %cst_103 = arith.constant dense<0.000000e+00> : vector<16xf32>
    %291 = vector.multi_reduction <add>, %290, %cst_103 [1] : vector<16x32xf32> to vector<16xf32>
    %292 = vector.shape_cast %291 : vector<16xf32> to vector<16x1xf32>
    %293 = tpu.reciprocal %292 {approx = true} : vector<16x1xf32> -> vector<16x1xf32>
    %294 = vector.broadcast %293 : vector<16x1xf32> to vector<16x32xf32>
    %295 = arith.mulf %290, %294 : vector<16x32xf32>
    %296 = arith.truncf %295 : vector<16x32xf32> to vector<16x32xbf16>
    %cst_104 = arith.constant dense<0.000000e+00> : vector<16x16xf32>
    %297 = tpu.matmul %296, %284, %cst_104 {dimension_numbers = #tpu.dot_dimension_numbers<[1], [0], [0], [1], [0, 0, 1, 1], [], []>} : vector<16x32xbf16>, vector<32x16xbf16>, vector<16x16xf32> -> vector<16x16xf32>
    %298 = vector.extract_strided_slice %228 {offsets = [0, 48], sizes = [16, 16], strides = [1, 1]} : vector<16x128xf32> to vector<16x16xf32>
    %299 = arith.truncf %298 : vector<16x16xf32> to vector<16x16xbf16>
    %300 = vector.extract_strided_slice %234 {offsets = [0, 48], sizes = [32, 16], strides = [1, 1]} : vector<32x128xf32> to vector<32x16xf32>
    %301 = arith.truncf %300 : vector<32x16xf32> to vector<32x16xbf16>
    %302 = vector.extract_strided_slice %240 {offsets = [0, 48], sizes = [32, 16], strides = [1, 1]} : vector<32x128xf32> to vector<32x16xf32>
    %303 = arith.truncf %302 : vector<32x16xf32> to vector<32x16xbf16>
    %cst_105 = arith.constant dense<0.000000e+00> : vector<16x32xf32>
    %304 = tpu.matmul %299, %301, %cst_105 {dimension_numbers = #tpu.dot_dimension_numbers<[1], [1], [0], [0], [0, 0, 1, 0], [], []>} : vector<16x16xbf16>, vector<32x16xbf16>, vector<16x32xf32> -> vector<16x32xf32>
    %cst_106 = arith.constant dense<0xFF800000> : vector<16xf32>
    %305 = vector.multi_reduction <maximumf>, %304, %cst_106 [1] : vector<16x32xf32> to vector<16xf32>
    %306 = vector.shape_cast %305 : vector<16xf32> to vector<16x1xf32>
    %307 = vector.broadcast %306 : vector<16x1xf32> to vector<16x32xf32>
    %308 = arith.subf %304, %307 : vector<16x32xf32>
    %309 = math.exp %308 : vector<16x32xf32>
    %cst_107 = arith.constant dense<0.000000e+00> : vector<16xf32>
    %310 = vector.multi_reduction <add>, %309, %cst_107 [1] : vector<16x32xf32> to vector<16xf32>
    %311 = vector.shape_cast %310 : vector<16xf32> to vector<16x1xf32>
    %312 = tpu.reciprocal %311 {approx = true} : vector<16x1xf32> -> vector<16x1xf32>
    %313 = vector.broadcast %312 : vector<16x1xf32> to vector<16x32xf32>
    %314 = arith.mulf %309, %313 : vector<16x32xf32>
    %315 = arith.truncf %314 : vector<16x32xf32> to vector<16x32xbf16>
    %cst_108 = arith.constant dense<0.000000e+00> : vector<16x16xf32>
    %316 = tpu.matmul %315, %303, %cst_108 {dimension_numbers = #tpu.dot_dimension_numbers<[1], [0], [0], [1], [0, 0, 1, 1], [], []>} : vector<16x32xbf16>, vector<32x16xbf16>, vector<16x16xf32> -> vector<16x16xf32>
    %317 = vector.extract_strided_slice %228 {offsets = [0, 64], sizes = [16, 16], strides = [1, 1]} : vector<16x128xf32> to vector<16x16xf32>
    %318 = arith.truncf %317 : vector<16x16xf32> to vector<16x16xbf16>
    %319 = vector.extract_strided_slice %234 {offsets = [0, 64], sizes = [32, 16], strides = [1, 1]} : vector<32x128xf32> to vector<32x16xf32>
    %320 = arith.truncf %319 : vector<32x16xf32> to vector<32x16xbf16>
    %321 = vector.extract_strided_slice %240 {offsets = [0, 64], sizes = [32, 16], strides = [1, 1]} : vector<32x128xf32> to vector<32x16xf32>
    %322 = arith.truncf %321 : vector<32x16xf32> to vector<32x16xbf16>
    %cst_109 = arith.constant dense<0.000000e+00> : vector<16x32xf32>
    %323 = tpu.matmul %318, %320, %cst_109 {dimension_numbers = #tpu.dot_dimension_numbers<[1], [1], [0], [0], [0, 0, 1, 0], [], []>} : vector<16x16xbf16>, vector<32x16xbf16>, vector<16x32xf32> -> vector<16x32xf32>
    %cst_110 = arith.constant dense<0xFF800000> : vector<16xf32>
    %324 = vector.multi_reduction <maximumf>, %323, %cst_110 [1] : vector<16x32xf32> to vector<16xf32>
    %325 = vector.shape_cast %324 : vector<16xf32> to vector<16x1xf32>
    %326 = vector.broadcast %325 : vector<16x1xf32> to vector<16x32xf32>
    %327 = arith.subf %323, %326 : vector<16x32xf32>
    %328 = math.exp %327 : vector<16x32xf32>
    %cst_111 = arith.constant dense<0.000000e+00> : vector<16xf32>
    %329 = vector.multi_reduction <add>, %328, %cst_111 [1] : vector<16x32xf32> to vector<16xf32>
    %330 = vector.shape_cast %329 : vector<16xf32> to vector<16x1xf32>
    %331 = tpu.reciprocal %330 {approx = true} : vector<16x1xf32> -> vector<16x1xf32>
    %332 = vector.broadcast %331 : vector<16x1xf32> to vector<16x32xf32>
    %333 = arith.mulf %328, %332 : vector<16x32xf32>
    %334 = arith.truncf %333 : vector<16x32xf32> to vector<16x32xbf16>
    %cst_112 = arith.constant dense<0.000000e+00> : vector<16x16xf32>
    %335 = tpu.matmul %334, %322, %cst_112 {dimension_numbers = #tpu.dot_dimension_numbers<[1], [0], [0], [1], [0, 0, 1, 1], [], []>} : vector<16x32xbf16>, vector<32x16xbf16>, vector<16x16xf32> -> vector<16x16xf32>
    %336 = vector.extract_strided_slice %228 {offsets = [0, 80], sizes = [16, 16], strides = [1, 1]} : vector<16x128xf32> to vector<16x16xf32>
    %337 = arith.truncf %336 : vector<16x16xf32> to vector<16x16xbf16>
    %338 = vector.extract_strided_slice %234 {offsets = [0, 80], sizes = [32, 16], strides = [1, 1]} : vector<32x128xf32> to vector<32x16xf32>
    %339 = arith.truncf %338 : vector<32x16xf32> to vector<32x16xbf16>
    %340 = vector.extract_strided_slice %240 {offsets = [0, 80], sizes = [32, 16], strides = [1, 1]} : vector<32x128xf32> to vector<32x16xf32>
    %341 = arith.truncf %340 : vector<32x16xf32> to vector<32x16xbf16>
    %cst_113 = arith.constant dense<0.000000e+00> : vector<16x32xf32>
    %342 = tpu.matmul %337, %339, %cst_113 {dimension_numbers = #tpu.dot_dimension_numbers<[1], [1], [0], [0], [0, 0, 1, 0], [], []>} : vector<16x16xbf16>, vector<32x16xbf16>, vector<16x32xf32> -> vector<16x32xf32>
    %cst_114 = arith.constant dense<0xFF800000> : vector<16xf32>
    %343 = vector.multi_reduction <maximumf>, %342, %cst_114 [1] : vector<16x32xf32> to vector<16xf32>
    %344 = vector.shape_cast %343 : vector<16xf32> to vector<16x1xf32>
    %345 = vector.broadcast %344 : vector<16x1xf32> to vector<16x32xf32>
    %346 = arith.subf %342, %345 : vector<16x32xf32>
    %347 = math.exp %346 : vector<16x32xf32>
    %cst_115 = arith.constant dense<0.000000e+00> : vector<16xf32>
    %348 = vector.multi_reduction <add>, %347, %cst_115 [1] : vector<16x32xf32> to vector<16xf32>
    %349 = vector.shape_cast %348 : vector<16xf32> to vector<16x1xf32>
    %350 = tpu.reciprocal %349 {approx = true} : vector<16x1xf32> -> vector<16x1xf32>
    %351 = vector.broadcast %350 : vector<16x1xf32> to vector<16x32xf32>
    %352 = arith.mulf %347, %351 : vector<16x32xf32>
    %353 = arith.truncf %352 : vector<16x32xf32> to vector<16x32xbf16>
    %cst_116 = arith.constant dense<0.000000e+00> : vector<16x16xf32>
    %354 = tpu.matmul %353, %341, %cst_116 {dimension_numbers = #tpu.dot_dimension_numbers<[1], [0], [0], [1], [0, 0, 1, 1], [], []>} : vector<16x32xbf16>, vector<32x16xbf16>, vector<16x16xf32> -> vector<16x16xf32>
    %355 = vector.extract_strided_slice %228 {offsets = [0, 96], sizes = [16, 16], strides = [1, 1]} : vector<16x128xf32> to vector<16x16xf32>
    %356 = arith.truncf %355 : vector<16x16xf32> to vector<16x16xbf16>
    %357 = vector.extract_strided_slice %234 {offsets = [0, 96], sizes = [32, 16], strides = [1, 1]} : vector<32x128xf32> to vector<32x16xf32>
    %358 = arith.truncf %357 : vector<32x16xf32> to vector<32x16xbf16>
    %359 = vector.extract_strided_slice %240 {offsets = [0, 96], sizes = [32, 16], strides = [1, 1]} : vector<32x128xf32> to vector<32x16xf32>
    %360 = arith.truncf %359 : vector<32x16xf32> to vector<32x16xbf16>
    %cst_117 = arith.constant dense<0.000000e+00> : vector<16x32xf32>
    %361 = tpu.matmul %356, %358, %cst_117 {dimension_numbers = #tpu.dot_dimension_numbers<[1], [1], [0], [0], [0, 0, 1, 0], [], []>} : vector<16x16xbf16>, vector<32x16xbf16>, vector<16x32xf32> -> vector<16x32xf32>
    %cst_118 = arith.constant dense<0xFF800000> : vector<16xf32>
    %362 = vector.multi_reduction <maximumf>, %361, %cst_118 [1] : vector<16x32xf32> to vector<16xf32>
    %363 = vector.shape_cast %362 : vector<16xf32> to vector<16x1xf32>
    %364 = vector.broadcast %363 : vector<16x1xf32> to vector<16x32xf32>
    %365 = arith.subf %361, %364 : vector<16x32xf32>
    %366 = math.exp %365 : vector<16x32xf32>
    %cst_119 = arith.constant dense<0.000000e+00> : vector<16xf32>
    %367 = vector.multi_reduction <add>, %366, %cst_119 [1] : vector<16x32xf32> to vector<16xf32>
    %368 = vector.shape_cast %367 : vector<16xf32> to vector<16x1xf32>
    %369 = tpu.reciprocal %368 {approx = true} : vector<16x1xf32> -> vector<16x1xf32>
    %370 = vector.broadcast %369 : vector<16x1xf32> to vector<16x32xf32>
    %371 = arith.mulf %366, %370 : vector<16x32xf32>
    %372 = arith.truncf %371 : vector<16x32xf32> to vector<16x32xbf16>
    %cst_120 = arith.constant dense<0.000000e+00> : vector<16x16xf32>
    %373 = tpu.matmul %372, %360, %cst_120 {dimension_numbers = #tpu.dot_dimension_numbers<[1], [0], [0], [1], [0, 0, 1, 1], [], []>} : vector<16x32xbf16>, vector<32x16xbf16>, vector<16x16xf32> -> vector<16x16xf32>
    %374 = vector.extract_strided_slice %228 {offsets = [0, 112], sizes = [16, 16], strides = [1, 1]} : vector<16x128xf32> to vector<16x16xf32>
    %375 = arith.truncf %374 : vector<16x16xf32> to vector<16x16xbf16>
    %376 = vector.extract_strided_slice %234 {offsets = [0, 112], sizes = [32, 16], strides = [1, 1]} : vector<32x128xf32> to vector<32x16xf32>
    %377 = arith.truncf %376 : vector<32x16xf32> to vector<32x16xbf16>
    %378 = vector.extract_strided_slice %240 {offsets = [0, 112], sizes = [32, 16], strides = [1, 1]} : vector<32x128xf32> to vector<32x16xf32>
    %379 = arith.truncf %378 : vector<32x16xf32> to vector<32x16xbf16>
    %cst_121 = arith.constant dense<0.000000e+00> : vector<16x32xf32>
    %380 = tpu.matmul %375, %377, %cst_121 {dimension_numbers = #tpu.dot_dimension_numbers<[1], [1], [0], [0], [0, 0, 1, 0], [], []>} : vector<16x16xbf16>, vector<32x16xbf16>, vector<16x32xf32> -> vector<16x32xf32>
    %cst_122 = arith.constant dense<0xFF800000> : vector<16xf32>
    %381 = vector.multi_reduction <maximumf>, %380, %cst_122 [1] : vector<16x32xf32> to vector<16xf32>
    %382 = vector.shape_cast %381 : vector<16xf32> to vector<16x1xf32>
    %383 = vector.broadcast %382 : vector<16x1xf32> to vector<16x32xf32>
    %384 = arith.subf %380, %383 : vector<16x32xf32>
    %385 = math.exp %384 : vector<16x32xf32>
    %cst_123 = arith.constant dense<0.000000e+00> : vector<16xf32>
    %386 = vector.multi_reduction <add>, %385, %cst_123 [1] : vector<16x32xf32> to vector<16xf32>
    %387 = vector.shape_cast %386 : vector<16xf32> to vector<16x1xf32>
    %388 = tpu.reciprocal %387 {approx = true} : vector<16x1xf32> -> vector<16x1xf32>
    %389 = vector.broadcast %388 : vector<16x1xf32> to vector<16x32xf32>
    %390 = arith.mulf %385, %389 : vector<16x32xf32>
    %391 = arith.truncf %390 : vector<16x32xf32> to vector<16x32xbf16>
    %cst_124 = arith.constant dense<0.000000e+00> : vector<16x16xf32>
    %392 = tpu.matmul %391, %379, %cst_124 {dimension_numbers = #tpu.dot_dimension_numbers<[1], [0], [0], [1], [0, 0, 1, 1], [], []>} : vector<16x32xbf16>, vector<32x16xbf16>, vector<16x16xf32> -> vector<16x16xf32>
    %393 = tpu.concatenate %259, %278, %297, %316, %335, %354, %373, %392 in 1 : vector<16x16xf32>, vector<16x16xf32>, vector<16x16xf32>, vector<16x16xf32>, vector<16x16xf32>, vector<16x16xf32>, vector<16x16xf32>, vector<16x16xf32> -> vector<16x128xf32>
    %394 = arith.truncf %393 : vector<16x128xf32> to vector<16x128xbf16>
    %c3_125 = arith.constant 3 : index
    %c0_126 = arith.constant 0 : index
    %c0_127 = arith.constant 0 : index
    %395 = vector.load %arg8[%c3_125, %c0_126, %c0_127] : memref<4x128x128xbf16, #tpu.memory_space<vmem>>, vector<1x128x128xbf16>
    %396 = vector.shape_cast %395 : vector<1x128x128xbf16> to vector<128x128xbf16>
    %cst_128 = arith.constant dense<0.000000e+00> : vector<16x128xf32>
    %397 = tpu.matmul %394, %396, %cst_128 {dimension_numbers = #tpu.dot_dimension_numbers<[1], [0], [0], [1], [0, 0, 1, 1], [], []>} : vector<16x128xbf16>, vector<128x128xbf16>, vector<16x128xf32> -> vector<16x128xf32>
    %c3_129 = arith.constant 3 : index
    %c0_130 = arith.constant 0 : index
    %398 = vector.load %arg9[%c3_129, %c0_130] : memref<4x128xf32, #tpu.memory_space<vmem>>, vector<1x128xf32>
    %399 = vector.broadcast %398 : vector<1x128xf32> to vector<16x128xf32>
    %400 = arith.addf %397, %399 : vector<16x128xf32>
    %401 = arith.addf %400, %211 : vector<16x128xf32>
    %c1_131 = arith.constant 1 : index
    %c0_132 = arith.constant 0 : index
    %402 = vector.load %arg14[%c1_131, %c0_132] : memref<3x128xf32, #tpu.memory_space<vmem>>, vector<1x128xf32>
    %c1_133 = arith.constant 1 : index
    %c0_134 = arith.constant 0 : index
    %403 = vector.load %arg15[%c1_133, %c0_134] : memref<3x128xf32, #tpu.memory_space<vmem>>, vector<1x128xf32>
    %cst_135 = arith.constant dense<0.000000e+00> : vector<16xf32>
    %404 = vector.multi_reduction <add>, %401, %cst_135 [1] : vector<16x128xf32> to vector<16xf32>
    %405 = vector.shape_cast %404 : vector<16xf32> to vector<16x1xf32>
    %cst_136 = arith.constant 1.280000e+02 : f32
    %406 = vector.broadcast %cst_136 : f32 to vector<16x1xf32>
    %407 = arith.divf %405, %406 : vector<16x1xf32>
    %408 = vector.broadcast %407 : vector<16x1xf32> to vector<16x128xf32>
    %409 = arith.subf %401, %408 : vector<16x128xf32>
    %410 = arith.mulf %409, %409 : vector<16x128xf32>
    %cst_137 = arith.constant dense<0.000000e+00> : vector<16xf32>
    %411 = vector.multi_reduction <add>, %410, %cst_137 [1] : vector<16x128xf32> to vector<16xf32>
    %412 = vector.shape_cast %411 : vector<16xf32> to vector<16x1xf32>
    %cst_138 = arith.constant 1.280000e+02 : f32
    %413 = vector.broadcast %cst_138 : f32 to vector<16x1xf32>
    %414 = arith.divf %412, %413 : vector<16x1xf32>
    %cst_139 = arith.constant 9.99999974E-6 : f32
    %415 = vector.broadcast %cst_139 : f32 to vector<16x1xf32>
    %416 = arith.addf %414, %415 : vector<16x1xf32>
    %417 = math.rsqrt %416 : vector<16x1xf32>
    %418 = vector.broadcast %407 : vector<16x1xf32> to vector<16x128xf32>
    %419 = arith.subf %401, %418 : vector<16x128xf32>
    %420 = vector.broadcast %417 : vector<16x1xf32> to vector<16x128xf32>
    %421 = arith.mulf %419, %420 : vector<16x128xf32>
    %422 = vector.broadcast %402 : vector<1x128xf32> to vector<16x128xf32>
    %423 = arith.mulf %421, %422 : vector<16x128xf32>
    %424 = vector.broadcast %403 : vector<1x128xf32> to vector<16x128xf32>
    %425 = arith.addf %423, %424 : vector<16x128xf32>
    %426 = arith.truncf %425 : vector<16x128xf32> to vector<16x128xbf16>
    %c0_140 = arith.constant 0 : index
    %c0_141 = arith.constant 0 : index
    %427 = vector.load %arg10[%c0_140, %c0_141] : memref<128x256xbf16, #tpu.memory_space<vmem>>, vector<128x256xbf16>
    %cst_142 = arith.constant dense<0.000000e+00> : vector<16x256xf32>
    %428 = tpu.matmul %426, %427, %cst_142 {dimension_numbers = #tpu.dot_dimension_numbers<[1], [0], [0], [1], [0, 0, 1, 1], [], []>} : vector<16x128xbf16>, vector<128x256xbf16>, vector<16x256xf32> -> vector<16x256xf32>
    %c0_143 = arith.constant 0 : index
    %c0_144 = arith.constant 0 : index
    %429 = vector.load %arg11[%c0_143, %c0_144] : memref<1x256xf32, #tpu.memory_space<vmem>>, vector<1x256xf32>
    %430 = vector.broadcast %429 : vector<1x256xf32> to vector<16x256xf32>
    %431 = arith.addf %428, %430 : vector<16x256xf32>
    %cst_145 = arith.constant 0.000000e+00 : f32
    %432 = vector.broadcast %cst_145 : f32 to vector<16x256xf32>
    %433 = arith.maximumf %431, %432 : vector<16x256xf32>
    %434 = arith.truncf %433 : vector<16x256xf32> to vector<16x256xbf16>
    %c0_146 = arith.constant 0 : index
    %c0_147 = arith.constant 0 : index
    %435 = vector.load %arg12[%c0_146, %c0_147] : memref<256x128xbf16, #tpu.memory_space<vmem>>, vector<256x128xbf16>
    %cst_148 = arith.constant dense<0.000000e+00> : vector<16x128xf32>
    %436 = tpu.matmul %434, %435, %cst_148 {dimension_numbers = #tpu.dot_dimension_numbers<[1], [0], [0], [1], [0, 0, 1, 1], [], []>} : vector<16x256xbf16>, vector<256x128xbf16>, vector<16x128xf32> -> vector<16x128xf32>
    %c0_149 = arith.constant 0 : index
    %c0_150 = arith.constant 0 : index
    %437 = vector.load %arg13[%c0_149, %c0_150] : memref<1x128xf32, #tpu.memory_space<vmem>>, vector<1x128xf32>
    %438 = vector.broadcast %437 : vector<1x128xf32> to vector<16x128xf32>
    %439 = arith.addf %436, %438 : vector<16x128xf32>
    %440 = arith.addf %439, %425 : vector<16x128xf32>
    %c2_151 = arith.constant 2 : index
    %c0_152 = arith.constant 0 : index
    %441 = vector.load %arg14[%c2_151, %c0_152] : memref<3x128xf32, #tpu.memory_space<vmem>>, vector<1x128xf32>
    %c2_153 = arith.constant 2 : index
    %c0_154 = arith.constant 0 : index
    %442 = vector.load %arg15[%c2_153, %c0_154] : memref<3x128xf32, #tpu.memory_space<vmem>>, vector<1x128xf32>
    %cst_155 = arith.constant dense<0.000000e+00> : vector<16xf32>
    %443 = vector.multi_reduction <add>, %440, %cst_155 [1] : vector<16x128xf32> to vector<16xf32>
    %444 = vector.shape_cast %443 : vector<16xf32> to vector<16x1xf32>
    %cst_156 = arith.constant 1.280000e+02 : f32
    %445 = vector.broadcast %cst_156 : f32 to vector<16x1xf32>
    %446 = arith.divf %444, %445 : vector<16x1xf32>
    %447 = vector.broadcast %446 : vector<16x1xf32> to vector<16x128xf32>
    %448 = arith.subf %440, %447 : vector<16x128xf32>
    %449 = arith.mulf %448, %448 : vector<16x128xf32>
    %cst_157 = arith.constant dense<0.000000e+00> : vector<16xf32>
    %450 = vector.multi_reduction <add>, %449, %cst_157 [1] : vector<16x128xf32> to vector<16xf32>
    %451 = vector.shape_cast %450 : vector<16xf32> to vector<16x1xf32>
    %cst_158 = arith.constant 1.280000e+02 : f32
    %452 = vector.broadcast %cst_158 : f32 to vector<16x1xf32>
    %453 = arith.divf %451, %452 : vector<16x1xf32>
    %cst_159 = arith.constant 9.99999974E-6 : f32
    %454 = vector.broadcast %cst_159 : f32 to vector<16x1xf32>
    %455 = arith.addf %453, %454 : vector<16x1xf32>
    %456 = math.rsqrt %455 : vector<16x1xf32>
    %457 = vector.broadcast %446 : vector<16x1xf32> to vector<16x128xf32>
    %458 = arith.subf %440, %457 : vector<16x128xf32>
    %459 = vector.broadcast %456 : vector<16x1xf32> to vector<16x128xf32>
    %460 = arith.mulf %458, %459 : vector<16x128xf32>
    %461 = vector.broadcast %441 : vector<1x128xf32> to vector<16x128xf32>
    %462 = arith.mulf %460, %461 : vector<16x128xf32>
    %463 = vector.broadcast %442 : vector<1x128xf32> to vector<16x128xf32>
    %464 = arith.addf %462, %463 : vector<16x128xf32>
    %c0_160 = arith.constant 0 : index
    %c0_161 = arith.constant 0 : index
    %c0_162 = arith.constant 0 : index
    %465 = vector.load %arg16[%c0_160, %c0_161, %c0_162] : memref<1x16x128xf32, #tpu.memory_space<vmem>>, vector<1x16x128xf32>
    %466 = vector.shape_cast %465 : vector<1x16x128xf32> to vector<16x128xf32>
    %467 = vector.shape_cast %464 : vector<16x128xf32> to vector<1x16x128xf32>
    tpu.vector_store %arg16[%c0_160, %c0_161, %c0_162], %467 {strides = array<i32>} : memref<1x16x128xf32, #tpu.memory_space<vmem>>, vector<1x16x128xf32>,
    return
  }
  func.func @transform_0(%arg0: i32) -> (i32, i32, i32) {
    %c0_i32 = arith.constant 0 : i32
    %c0_i32_0 = arith.constant 0 : i32
    %c0_i32_1 = arith.constant 0 : i32
    return %arg0, %c0_i32, %c0_i32_0 : i32, i32, i32
  }
  func.func @transform_1(%arg0: i32) -> (i32, i32, i32) {
    %c0_i32 = arith.constant 0 : i32
    %c0_i32_0 = arith.constant 0 : i32
    %c0_i32_1 = arith.constant 0 : i32
    return %arg0, %c0_i32, %c0_i32_0 : i32, i32, i32
  }
  func.func @transform_2(%arg0: i32) -> (i32, i32, i32) {
    %c0_i32 = arith.constant 0 : i32
    %c0_i32_0 = arith.constant 0 : i32
    %c0_i32_1 = arith.constant 0 : i32
    return %arg0, %c0_i32, %c0_i32_0 : i32, i32, i32
  }
  func.func @transform_3(%arg0: i32) -> (i32, i32, i32) {
    %c0_i32 = arith.constant 0 : i32
    %c0_i32_0 = arith.constant 0 : i32
    %c0_i32_1 = arith.constant 0 : i32
    return %arg0, %c0_i32, %c0_i32_0 : i32, i32, i32
  }
  func.func @transform_4(%arg0: i32) -> (i32, i32, i32) {
    %c0_i32 = arith.constant 0 : i32
    %c0_i32_0 = arith.constant 0 : i32
    %c0_i32_1 = arith.constant 0 : i32
    return %arg0, %c0_i32, %c0_i32_0 : i32, i32, i32
  }
  func.func @transform_5(%arg0: i32) -> (i32, i32, i32) {
    %c0_i32 = arith.constant 0 : i32
    %c0_i32_0 = arith.constant 0 : i32
    %c0_i32_1 = arith.constant 0 : i32
    %c0_i32_2 = arith.constant 0 : i32
    return %c0_i32, %c0_i32_0, %c0_i32_1 : i32, i32, i32
  }
  func.func @transform_6(%arg0: i32) -> (i32, i32) {
    %c0_i32 = arith.constant 0 : i32
    %c0_i32_0 = arith.constant 0 : i32
    %c0_i32_1 = arith.constant 0 : i32
    return %c0_i32, %c0_i32_0 : i32, i32
  }
  func.func @transform_7(%arg0: i32) -> (i32, i32, i32) {
    %c0_i32 = arith.constant 0 : i32
    %c0_i32_0 = arith.constant 0 : i32
    %c0_i32_1 = arith.constant 0 : i32
    %c0_i32_2 = arith.constant 0 : i32
    return %c0_i32, %c0_i32_0, %c0_i32_1 : i32, i32, i32
  }
  func.func @transform_8(%arg0: i32) -> (i32, i32) {
    %c0_i32 = arith.constant 0 : i32
    %c0_i32_0 = arith.constant 0 : i32
    %c0_i32_1 = arith.constant 0 : i32
    return %c0_i32, %c0_i32_0 : i32, i32
  }
  func.func @transform_9(%arg0: i32) -> (i32, i32) {
    %c0_i32 = arith.constant 0 : i32
    %c0_i32_0 = arith.constant 0 : i32
    %c0_i32_1 = arith.constant 0 : i32
    return %c0_i32, %c0_i32_0 : i32, i32
  }
  func.func @transform_10(%arg0: i32) -> (i32, i32) {
    %c0_i32 = arith.constant 0 : i32
    %c0_i32_0 = arith.constant 0 : i32
    %c0_i32_1 = arith.constant 0 : i32
    return %c0_i32, %c0_i32_0 : i32, i32
  }
  func.func @transform_11(%arg0: i32) -> (i32, i32) {
    %c0_i32 = arith.constant 0 : i32
    %c0_i32_0 = arith.constant 0 : i32
    %c0_i32_1 = arith.constant 0 : i32
    return %c0_i32, %c0_i32_0 : i32, i32
  }
  func.func @transform_12(%arg0: i32) -> (i32, i32) {
    %c0_i32 = arith.constant 0 : i32
    %c0_i32_0 = arith.constant 0 : i32
    %c0_i32_1 = arith.constant 0 : i32
    return %c0_i32, %c0_i32_0 : i32, i32
  }
  func.func @transform_13(%arg0: i32) -> (i32, i32) {
    %c0_i32 = arith.constant 0 : i32
    %c0_i32_0 = arith.constant 0 : i32
    %c0_i32_1 = arith.constant 0 : i32
    return %c0_i32, %c0_i32_0 : i32, i32
  }
  func.func @transform_14(%arg0: i32) -> (i32, i32) {
    %c0_i32 = arith.constant 0 : i32
    %c0_i32_0 = arith.constant 0 : i32
    %c0_i32_1 = arith.constant 0 : i32
    return %c0_i32, %c0_i32_0 : i32, i32
  }
  func.func @transform_15(%arg0: i32) -> (i32, i32, i32) {
    %c0_i32 = arith.constant 0 : i32
    %c0_i32_0 = arith.constant 0 : i32
    %c0_i32_1 = arith.constant 0 : i32
    return %arg0, %c0_i32, %c0_i32_0 : i32, i32, i32
  }
}

</mosaic_0001>

<bundles_post_ra>
// kernel: base_transformer_layer_forward.1
= control target key start
LH: loop header
LB: loop body
LE: loop exit
PB: predicated region body
PF: predicated region fallthrough
CT: control target
= control target key end

     0   :  { %s5467_s18 = smov 0   ;;  %s6523_s0 = inlined_call_operand.vmem [shape: f32[2,16,128], index: 0, kind: input, shape index: {}]   ;;  %s6524_s1 = inlined_call_operand.vmem [shape: f32[2,32,128], index: 1, kind: input, shape index: {}]   ;;  %s6525_s2 = inlined_call_operand.vmem [shape: f32[2,32,128], index: 2, kind: input, shape index: {}]   ;;  %s6526_s3 = inlined_call_operand.vmem [shape: f32[2,16,128], index: 3, kind: input, shape index: {}]   ;;  %s6527_s4 = inlined_call_operand.vmem [shape: f32[2,32,128], index: 4, kind: input, shape index: {}]   ;;  %s6528_s5 = inlined_call_operand.vmem [shape: bf16[4,128,128], index: 5, kind: input, shape index: {}]   ;;  %s6529_s6 = inlined_call_operand.vmem [shape: f32[4,128], index: 6, kind: input, shape index: {}]   ;;  %s6530_s7 = inlined_call_operand.vmem [shape: bf16[4,128,128], index: 7, kind: input, shape index: {}]   ;;  %s6531_s8 = inlined_call_operand.vmem [shape: f32[4,128], index: 8, kind: input, shape index: {}]   ;;  %s6532_s9 = inlined_call_operand.vmem [shape: bf16[128,256], index: 9, kind: input, shape index: {}]   ;;  %s6533_s10 = inlined_call_operand.vmem [shape: f32[1,256], index: 10, kind: input, shape index: {}]   ;;  %s6534_s11 = inlined_call_operand.vmem [shape: bf16[256,128], index: 11, kind: input, shape index: {}]   ;;  %s6535_s12 = inlined_call_operand.vmem [shape: f32[1,128], index: 12, kind: input, shape index: {}]   ;;  %s6536_s13 = inlined_call_operand.vmem [shape: f32[3,128], index: 13, kind: input, shape index: {}]   ;;  %s6537_s14 = inlined_call_operand.vmem [shape: f32[3,128], index: 14, kind: input, shape index: {}]   ;;  %s6538_s15 = inlined_call_operand.vmem [shape: f32[2,16,128], index: 15, kind: output, shape index: {}]  }
   0x1 LB: > { %s4209_s19 = sadd.s32 4294967295, %s5375_s18   ;;  %p4213_p0 = scmp.ge.s32.totalorder %s5375_s18, 1  ;;  %s5375_s18 = sphi %s5467_s18, %s25_s18  }
   0x2   : > { %p477_p1 = scmp.lt.s32.totalorder %s5375_s18, 3 }
   0x4   : > { %p478_p2 = pnand %p4213_p0, %p477_p1 }
   0x5   : > { %v5121_v0 = vld [vmem:[%s6528_s5 + $0x40] sm:$0xff] (!%p478_p2)   ;;  %v5377_v1 = vmov (!%p478_p2), 0.0   ;;  %v5122_v2 = vld [vmem:[%s6528_s5 + $0x48] sm:$0xff] (!%p478_p2)   ;;  %vm5378_vm0 = vmmov (!%p478_p2), 0   ;;  %v5124_v5 = vld [vmem:[%s6528_s5 + $0x50] sm:$0xff] (!%p478_p2)   ;;  %p545_p3 = scmp.lt.s32.totalorder (!%p478_p2), %s4209_s19, 1 }
   0x6   : > { %481 = sbr.rel (%p478_p2) target bundleno = 8519 (0x2147), region = 80  ;;  %4669 = vmatprep.subr.bf16.mxu1 (!%p478_p2), %v5377_v1  ;;  %4649 = vmatprep.subr.bf16.mxu0 (!%p478_p2), %v5377_v1  ;;  %v5123_v3 = vld [vmem:[%s6528_s5] sm:$0xff] (!%p478_p2)   ;;  %v5125_v4 = vld [vmem:[%s6528_s5 + $0x8] sm:$0xff] (!%p478_p2)   ;;  %v5127_v6 = vld [vmem:[%s6528_s5 + $0x10] sm:$0xff] (!%p478_p2)   ;;  %vm919_vm1 = vcmask (!%p478_p2), 130048   ;;  %s6543_s23 = smov (!%p478_p2), 112  }
   0x7   : > { %4670 = vmatpush3.bf16.msra.mxu1 (!%p478_p2), %v5121_v0  ;;  %4685 = vmatprep.mubr.msk.bf16.mxu1 (!%p478_p2), %vm5378_vm0, %v5377_v1  ;;  %v5126_v7 = vld [vmem:[%s6528_s5 + $0x58] sm:$0xff] (!%p478_p2)   ;;  %v5128_v9 = vld [vmem:[%s6528_s5 + $0x60] sm:$0xff] (!%p478_p2)   ;;  %v5130_v11 = vld [vmem:[%s6528_s5 + $0x68] sm:$0xff] (!%p478_p2)   ;;  %s6549_s24 = smov (!%p478_p2), 80   ;;  %s6547_s26 = smov (!%p478_p2), 64   ;;  %vm1942_vm2 = vcmask (!%p478_p2), 261120  }
   0x8   : > { %4671 = vmatprep.subr.bf16.mxu1 (!%p478_p2), %v5377_v1  ;;  %4665 = vmatprep.mubr.msk.bf16.mxu0 (!%p478_p2), %vm5378_vm0, %v5377_v1  ;;  %v5129_v8 = vld [vmem:[%s6528_s5 + $0x18] sm:$0xff] (!%p478_p2)   ;;  %v5131_v10 = vld [vmem:[%s6528_s5 + $0x20] sm:$0xff] (!%p478_p2)   ;;  %v5133_v12 = vld [vmem:[%s6528_s5 + $0x28] sm:$0xff] (!%p478_p2)   ;;  %s6545_s27 = smov (!%p478_p2), 48   ;;  %s6541_s28 = smov (!%p478_p2), 32   ;;  %vm1945_vm3 = vcmask (!%p478_p2), 392192  }
   0x9   : > { %4650 = vmatpush3.bf16.msra.mxu0 (!%p478_p2), %v5123_v3  ;;  %v5132_v13 = vld [vmem:[%s6528_s5 + $0x70] sm:$0xff] (!%p478_p2)   ;;  %v5134_v19 = vld [vmem:[%s6528_s5 + $0x78] sm:$0xff] (!%p478_p2)   ;;  %v4251_v24 = vld [vmem:[%s6529_s6 + $0x1] ss:$0 sm:$0xff] (!%p478_p2)  ;;  %s6539_s29 = smov (!%p478_p2), 16   ;;  %s5385_s20 = smov (!%p478_p2), 96  }
   0xa   : > { %4651 = vmatprep.subr.bf16.mxu0 (!%p478_p2), %v5377_v1  ;;  %v5135_v18 = vld [vmem:[%s6528_s5 + $0x30] sm:$0xff] (!%p478_p2)   ;;  %v5136_v22 = vld [vmem:[%s6528_s5 + $0x38] sm:$0xff] (!%p478_p2)   ;;  %v4226_v26 = vld [vmem:[%s6529_s6] ss:$0 sm:$0xff] (!%p478_p2)  ;;  %vm1948_vm4 = vcmask (!%p478_p2), 523264   ;;  %vm1951_vm5 = vcmask (!%p478_p2), 654336  }
   0xb   : > { %4672 = vmatpush3.bf16.msra.mxu1 (!%p478_p2), %v5122_v2  ;;  %v5137_v41 = vld [vmem:[%s6528_s5 + $0x80] sm:$0xff] (!%p478_p2)   ;;  %v5138_v42 = vld [vmem:[%s6528_s5 + $0x88] sm:$0xff] (!%p478_p2)   ;;  %v5139_v43 = vld [vmem:[%s6528_s5 + $0x90] sm:$0xff] (!%p478_p2)   ;;  %vm1954_vm6 = vcmask (!%p478_p2), 785408   ;;  %vm1957_vm7 = vcmask (!%p478_p2), 916480   ;;  %s6553_s16 = smov (!%p478_p2), 64  }
   0xc   : > { %4673 = vmatprep.subr.bf16.mxu1 (!%p478_p2), %v5377_v1  ;;  %v5140_v44 = vld [vmem:[%s6528_s5 + $0x98] sm:$0xff] (!%p478_p2)   ;;  %v5141_v45 = vld [vmem:[%s6528_s5 + $0xa0] sm:$0xff] (!%p478_p2)   ;;  %v5142_v46 = vld [vmem:[%s6528_s5 + $0xa8] sm:$0xff] (!%p478_p2)  }
   0xd   : > { %4652 = vmatpush3.bf16.msra.mxu0 %v5125_v4  ;;  %s6558_s19 = smov (!%p545_p3, %s4209_s19), 1  ;;  %v5143_v47 = vld [vmem:[%s6528_s5 + $0xb0] sm:$0xff]   ;;  %v5144_v48 = vld [vmem:[%s6528_s5 + $0xb8] sm:$0xff]  }
   0xe   : > { %4653 = vmatprep.subr.bf16.mxu0 %v5377_v1  ;;  %s5517_s25 = sshll.u32 %s6558_s19, 4  ;;  %s5969_s21 = sshll.u32 %s6558_s19, 5 }
   0xf   : > { %4674 = vmatpush3.bf16.msra.mxu1 %v5124_v5  ;;  %s5531_s17 = scalar_lea.vmem %s6523_s0, %s5517_s25  ;;  %s5537_s22 = scalar_lea.vmem %s6526_s3, %s5517_s25 }
  0x10   : > { %4675 = vmatprep.subr.bf16.mxu1 %v5377_v1  ;;  %v5547_v14 = vld [vmem:[%s5531_s17] sm:$0xff]  ;;  %v5550_v15 = vld [vmem:[%s5531_s17 + $0x8] sm:$0xff] }
  0x11   : > { %4654 = vmatpush3.bf16.msra.mxu0 %v5127_v6  ;;  %v578_v16 = vld [vmem:[%s5537_s22] sm:$0xff]  ;;  %v579_v17 = vld [vmem:[%s5537_s22 + $0x8] sm:$0xff]  ;;  %v583_v49 = vpack.c.bf16 %v5550_v15, %v5547_v14 }
  0x12   : > { %4655 = vmatprep.subr.bf16.mxu0 %v5377_v1  ;;  %v580_v20 = vadd.f32 %v578_v16, %v5547_v14  ;;  %v581_v21 = vadd.f32 %v579_v17, %v5550_v15  ;;  %v4276_v6 = vld [vmem:[%s6529_s6 + $0x2] ss:$0 sm:$0xff] }
  0x13   : > { %4676 = vmatpush3.bf16.msra.mxu1 %v5126_v7 }
  0x14   : > { %4677 = vmatprep.subr.bf16.mxu1 %v5377_v1  ;;  %v582_v23 = vpack.c.bf16 %v581_v21, %v580_v20 }
  0x15   : > { %4656 = vmatpush3.bf16.msra.mxu0 %v5129_v8 }
  0x16   : > { %4657 = vmatprep.subr.bf16.mxu0 %v5377_v1 }
  0x17   : > { %4678 = vmatpush3.bf16.msra.mxu1 %v5128_v9 }
  0x18   : > { %4679 = vmatprep.subr.bf16.mxu1 %v5377_v1 }
  0x19   : > { %4658 = vmatpush3.bf16.msra.mxu0 %v5131_v10 }
  0x1a   : > { %4659 = vmatprep.subr.bf16.mxu0 %v5377_v1 }
  0x1b   : > { %4680 = vmatpush3.bf16.msra.mxu1 %v5130_v11 }
  0x1c   : > { %4681 = vmatprep.subr.bf16.mxu1 %v5377_v1 }
  0x1d   : > { %4660 = vmatpush3.bf16.msra.mxu0 %v5133_v12 }
  0x1e   : > { %4661 = vmatprep.subr.bf16.mxu0 %v5377_v1 }
  0x1f   : > { %4682 = vmatpush3.bf16.msra.mxu1 %v5132_v13 }
  0x20   : > { %4683 = vmatprep.subr.bf16.mxu1 %v5377_v1 }
  0x21   : > { %4662 = vmatpush3.bf16.msra.mxu0 %v5135_v18 }
  0x22   : > { %4663 = vmatprep.subr.bf16.mxu0 %v5377_v1 }
  0x23   : > { %4684 = vmatpush3.bf16.msra.mxu1 %v5134_v19 }
  0x24   : > { %4709 = vmatprep.subr.bf16.mxu1 %v5377_v1 }
  0x25   : > { %4664 = vmatpush3.bf16.msra.mxu0 %v5136_v22 }
  0x26   : > { %4686 = vmatmul.mubr.bf16.vlgmr.msra.gmra.mrb[0].mxu1 %v582_v23  ;;  %4689 = vmatprep.subr.bf16.mxu0 %v5377_v1 }
  0x27   : > { %4711 = vmatprep.mubr.msk.bf16.mxu1 %vm5378_vm0, %v5377_v1 }
  0x28   : > { %4666 = vmatmul.mubr.bf16.vlgmr.msra.gmra.mrb[0].mxu0 %v582_v23 }
  0x29   : > { %4705 = vmatprep.mubr.msk.bf16.mxu0 %vm5378_vm0, %v5377_v1  ;;  %4690 = vmatpush3.bf16.msra.mxu0 %v5137_v41 }
  0x2a   : > { %4691 = vmatprep.subr.bf16.mxu0 %v5377_v1 }
  0x2d   : > { %4692 = vmatpush3.bf16.msra.mxu0 %v5138_v42 }
  0x2e   : > { %4693 = vmatprep.subr.bf16.mxu0 %v5377_v1 }
  0x31   : > { %4694 = vmatpush3.bf16.msra.mxu0 %v5139_v43 }
  0x32   : > { %4695 = vmatprep.subr.bf16.mxu0 %v5377_v1 }
  0x35   : > { %4696 = vmatpush3.bf16.msra.mxu0 %v5140_v44 }
  0x36   : > { %4697 = vmatprep.subr.bf16.mxu0 %v5377_v1 }
  0x39   : > { %4698 = vmatpush3.bf16.msra.mxu0 %v5141_v45 }
  0x3a   : > { %4699 = vmatprep.subr.bf16.mxu0 %v5377_v1 }
  0x3d   : > { %4700 = vmatpush3.bf16.msra.mxu0 %v5142_v46 }
  0x3e   : > { %4701 = vmatprep.subr.bf16.mxu0 %v5377_v1 }
  0x41   : > { %4702 = vmatpush3.bf16.msra.mxu0 %v5143_v47 }
  0x42   : > { %4703 = vmatprep.subr.bf16.mxu0 %v5377_v1 }
  0x45   : > { %4704 = vmatpush3.bf16.msra.mxu0 %v5144_v48 }
  0x46   : > { %4733 = vmatprep.subr.bf16.mxu0 %v5377_v1 }
  0x48   : > { %4706 = vmatmul.mubr.bf16.vlgmr.msra.gmra.mrb[4].mxu0 %v583_v49 }
  0x49   : > { %4735 = vmatprep.mubr.msk.bf16.mxu0 %vm5378_vm0, %v5377_v1 }
  0xf9   : > { %v798_v25 = vpop.f32.mrb[0].mxu1 }
  0xfa   : > { %v4687_v27 = vpop.f32.mrb[1].mxu1  ;;  %v799_v30 = vadd.f32 %v4251_v24, %v798_v25 }
  0xfb   : > { %v801_v28 = vpop.f32.mrb[2].mxu1  ;;  %v687_v29 = vpop.f32.mrb[0].mxu0 }
  0xfc   : > { %v802_v31 = vadd.f32 %v4251_v24, %v801_v28  ;;  %v4688_v32 = vpop.f32.mrb[3].mxu1  ;;  %v688_v33 = vadd.f32 %v4226_v26, %v687_v29  ;;  %v4667_v34 = vpop.f32.mrb[1].mxu0 }
  0xfd   : > { %v690_v35 = vpop.f32.mrb[2].mxu0 }
  0xfe   : > { %v5582_v36 = vpack.c.bf16 %v802_v31, %v799_v30  ;;  %v691_v37 = vadd.f32 %v4226_v26, %v690_v35  ;;  %v4668_v38 = vpop.f32.mrb[3].mxu0 }
 0x100   : > { %v5584_v39 = vpack.c.bf16 %v691_v37, %v688_v33  ;;  %v924_v40 = vsel %vm919_vm1, %v5582_v36, 0 }
 0x101   : > { %4710 = vmatpush3.bf16.xpose.msra.mxu1 %v924_v40 }
 0x102   : > { %4715 = vmatprep.subr.bf16.mxu1 %v5377_v1 }
 0x108   : > { %4712 = vmatmul.mubr.msk.bf16.vlgmr.msra.gmra.mrb[4].mxu1 %vm919_vm1, %v5584_v39 }
 0x109   : > { %4717 = vmatprep.mubr.msk.bf16.mxu1 %vm5378_vm0, %v5377_v1 }
 0x11b   : > { %v909_v3 = vpop.f32.mrb[4].mxu0 }
 0x11c   : > { %v4707_v4 = vpop.f32.mrb[5].mxu0  ;;  %v910_v8 = vadd.f32 %v4276_v6, %v909_v3 }
 0x11d   : > { %v912_v5 = vpop.f32.mrb[6].mxu0 }
 0x11e   : > { %v4708_v7 = vpop.f32.mrb[7].mxu0  ;;  %v913_v9 = vadd.f32 %v4276_v6, %v912_v5 }
 0x120   : > { %v5650_v10 = vpack.c.bf16 %v913_v9, %v910_v8 }
 0x122   : > { %4716 = vmatpush3.bf16.msra.mxu1 %v5650_v10 }
 0x123   : > { %4721 = vmatprep.subr.bf16.mxu1 %v5377_v1 }
 0x1db   : > { %v960_v50 = vpop.f32.mrb[4].mxu1 }
 0x1dc   : > { %v4713_v51 = vpop.f32.mrb[5].mxu1  ;;  %v967_v52 = vsel %vm919_vm1, %v960_v50, -inf }
 0x1dd   : > { %968 = vmax.xlane.f32.xlu0 %v967_v52  ;;  %v963_v53 = vpop.f32.mrb[6].mxu1 }
 0x1de   : > { %v4714_v54 = vpop.f32.mrb[7].mxu1  ;;  %v970_v55 = vsel %vm919_vm1, %v963_v53, -inf }
 0x1e1   : > { %971 = vmax.xlane.f32.xlu0 %v970_v55 }
 0x1f7   : > { %1038 = vrot.lane.b32.xlu0 %v5582_v36, %s6543_s23 }
 0x1fb   : > { %1281 = vrot.lane.b32.xlu0 %v5582_v36, %s6549_s24 }
 0x1ff   : > { %1402 = vrot.lane.b32.xlu0 %v5582_v36, %s6547_s26 }
 0x203   : > { %1523 = vrot.lane.b32.xlu0 %v5582_v36, %s6545_s27 }
 0x207   : > { %1644 = vrot.lane.b32.xlu0 %v5582_v36, %s6541_s28 }
 0x20b   : > { %1765 = vrot.lane.b32.xlu0 %v5582_v36, %s6539_s29 }
 0x26a   : > { %v969_v56 = vpop.xlane.xlu0 %968 }
 0x26b   : > { %v973_v57 = vsub.f32 %v960_v50, %v969_v56 }
 0x26d   : > { %v975_v58 = vmul.f32 1.442695, %v973_v57 }
 0x26e   : > { %v972_v59 = vpop.xlane.xlu0 %971 }
 0x26f   : > { %5225 = vpow2.f32 %v975_v58  ;;  %v974_v60 = vsub.f32 %v963_v53, %v972_v59 }
 0x271   : > { %v977_v61 = vmul.f32 1.442695, %v974_v60 }
 0x272   : > { %v1039_v14 = vpop.permute.xlu0 %1038 }
 0x273   : > { %5227 = vpow2.f32 %v977_v61  ;;  %v1044_v23 = vsel %vm919_vm1, %v1039_v14, 0 }
 0x276   : > { %v1282_v21 = vpop.permute.xlu0 %1281 }
 0x277   : > { %v1287_v25 = vsel %vm919_vm1, %v1282_v21, 0 }
 0x279   : > { %v5226_v62 = vpop.eup %5225 }
 0x27a   : > { %v979_v63 = vsel %vm919_vm1, %v5226_v62, 0.0  ;;  %v1403_v26 = vpop.permute.xlu0 %1402 }
 0x27b   : > { %980 = vadd.xlane.f32.xlu1 %v979_v63  ;;  %v1408_v28 = vsel %vm919_vm1, %v1403_v26, 0 }
 0x27d   : > { %v5228_v0 = vpop.eup %5227 }
 0x27e   : > { %v982_v2 = vsel %vm919_vm1, %v5228_v0, 0.0  ;;  %v1524_v29 = vpop.permute.xlu0 %1523 }
 0x27f   : > { %983 = vadd.xlane.f32.xlu1 %v982_v2  ;;  %v1529_v31 = vsel %vm919_vm1, %v1524_v29, 0 }
 0x282   : > { %v1645_v32 = vpop.permute.xlu0 %1644 }
 0x283   : > { %v1650_v34 = vsel %vm919_vm1, %v1645_v32, 0 }
 0x286   : > { %v1766_v35 = vpop.permute.xlu0 %1765 }
 0x287   : > { %v1771_v37 = vsel %vm919_vm1, %v1766_v35, 0 }
 0x290   : > { %1035 = vrot.lane.b32.xlu1 %v5584_v39, %s6543_s23 }
 0x294   : > { %1160 = vrot.lane.b32.xlu1 %v5582_v36, %s5385_s20 }
 0x298   : > { %1158 = vrot.lane.b32.xlu1 %v5584_v39, %s5385_s20 }
 0x29c   : > { %1279 = vrot.lane.b32.xlu1 %v5584_v39, %s6549_s24 }
 0x2a0   : > { %1400 = vrot.lane.b32.xlu1 %v5584_v39, %s6547_s26 }
 0x2a4   : > { %1521 = vrot.lane.b32.xlu1 %v5584_v39, %s6545_s27 }
 0x2a8   : > { %1642 = vrot.lane.b32.xlu1 %v5584_v39, %s6541_s28 }
 0x2ac   : > { %1763 = vrot.lane.b32.xlu1 %v5584_v39, %s6539_s29 }
 0x308   : > { %v981_v11 = vpop.xlane.xlu1 %980 }
 0x309   : > { %5229 = vrcp.f32 %v981_v11 }
 0x30c   : > { %v984_v12 = vpop.xlane.xlu1 %983 }
 0x30d   : > { %5231 = vrcp.f32 %v984_v12 }
 0x310   : > { %v1036_v13 = vpop.permute.xlu1 %1035 }
 0x313   : > { %v5230_v16 = vpop.eup %5229 }
 0x314   : > { %v1161_v15 = vpop.permute.xlu1 %1160  ;;  %v987_v19 = vmul.f32 %v5230_v16, %v5226_v62 }
 0x315   : > { %v1166_v17 = vsel %vm919_vm1, %v1161_v15, 0 }
 0x316   : > { %4734 = vmatpush3.bf16.xpose.msra.mxu0 %v1166_v17 }
 0x317   : > { %v5232_v18 = vpop.eup %5231  ;;  %4745 = vmatprep.subr.bf16.mxu0 %v5377_v1 }
 0x318   : > { %v988_v20 = vmul.f32 %v5232_v18, %v5228_v0  ;;  %v1159_v24 = vpop.permute.xlu1 %1158 }
 0x31a   : > { %v989_v22 = vpack.c.bf16 %v988_v20, %v987_v19 }
 0x31c   : > { %4718 = vmatmul.mubr.msk.bf16.vlgmr.msra.gmra.mrb[8].mxu1 %vm919_vm1, %v989_v22  ;;  %v1280_v27 = vpop.permute.xlu1 %1279 }
 0x31d   : > { %4722 = vmatpush3.bf16.xpose.msra.mxu1 %v1044_v23  ;;  %4736 = vmatmul.mubr.msk.bf16.vlgmr.msra.gmra.mrb[8].mxu0 %vm919_vm1, %v1159_v24 }
 0x31e   : > { %4746 = vmatpush3.bf16.xpose.msra.mxu0 %v1287_v25  ;;  %4723 = vmatprep.mubr.msk.bf16.mxu1 %vm5378_vm0, %v5377_v1 }
 0x31f   : > { %4747 = vmatprep.mubr.msk.bf16.mxu0 %vm5378_vm0, %v5377_v1  ;;  %4757 = vmatprep.subr.bf16.mxu0 %v5377_v1 }
 0x320   : > { %4727 = vmatprep.subr.bf16.mxu1 %v5377_v1  ;;  %v1401_v30 = vpop.permute.xlu1 %1400 }
 0x324   : > { %4724 = vmatmul.mubr.msk.bf16.vlgmr.msra.gmra.mrb[12].mxu1 %vm919_vm1, %v1036_v13  ;;  %v1522_v33 = vpop.permute.xlu1 %1521 }
 0x325   : > { %4748 = vmatmul.mubr.msk.bf16.vlgmr.msra.gmra.mrb[12].mxu0 %vm919_vm1, %v1280_v27  ;;  %4729 = vmatprep.mubr.msk.bf16.mxu1 %vm5378_vm0, %v5377_v1 }
 0x326   : > { %4758 = vmatpush3.bf16.xpose.msra.mxu0 %v1408_v28  ;;  %4759 = vmatprep.mubr.msk.bf16.mxu0 %vm5378_vm0, %v5377_v1 }
 0x327   : > { %4769 = vmatprep.subr.bf16.mxu0 %v5377_v1 }
 0x328   : > { %v1643_v36 = vpop.permute.xlu1 %1642 }
 0x32c   : > { %v1764_v38 = vpop.permute.xlu1 %1763 }
 0x32d   : > { %4760 = vmatmul.mubr.msk.bf16.vlgmr.msra.gmra.mrb[16].mxu0 %vm919_vm1, %v1401_v30 }
 0x32e   : > { %4770 = vmatpush3.bf16.xpose.msra.mxu0 %v1529_v31  ;;  %4771 = vmatprep.mubr.msk.bf16.mxu0 %vm5378_vm0, %v5377_v1 }
 0x32f   : > { %4781 = vmatprep.subr.bf16.mxu0 %v5377_v1 }
 0x335   : > { %4772 = vmatmul.mubr.msk.bf16.vlgmr.msra.gmra.mrb[20].mxu0 %vm919_vm1, %v1522_v33 }
 0x336   : > { %4782 = vmatpush3.bf16.xpose.msra.mxu0 %v1650_v34  ;;  %4783 = vmatprep.mubr.msk.bf16.mxu0 %vm5378_vm0, %v5377_v1 }
 0x337   : > { %4793 = vmatprep.subr.bf16.mxu0 %v5377_v1 }
 0x33d   : > { %4784 = vmatmul.mubr.msk.bf16.vlgmr.msra.gmra.mrb[24].mxu0 %vm919_vm1, %v1643_v36 }
 0x33e   : > { %4794 = vmatpush3.bf16.xpose.msra.mxu0 %v1771_v37  ;;  %4795 = vmatprep.mubr.msk.bf16.mxu0 %vm5378_vm0, %v5377_v1 }
 0x33f   : > { %4805 = vmatprep.subr.bf16.mxu0 %v5377_v1 }
 0x345   : > { %4796 = vmatmul.mubr.msk.bf16.vlgmr.msra.gmra.mrb[28].mxu0 %vm919_vm1, %v1764_v38 }
 0x346   : > { %4821 = vmatprep.mubr.msk.bf16.mxu0 %vm5378_vm0, %v5377_v1 }
 0x3ef   : > { %v5706_v39 = vpop.f32.mrb[8].mxu1 }
 0x3f0   : > { %v4719_v40 = vpop.f32.mrb[9].mxu1  ;;  %v5708_v41 = vpop.f32.mrb[8].mxu0 }
 0x3f1   : > { %v5710_v42 = vpop.f32.mrb[10].mxu1  ;;  %v4737_v43 = vpop.f32.mrb[9].mxu0  ;;  %v1209_v57 = vsel %vm919_vm1, %v5708_v41, -inf }
 0x3f2   : > { %v4720_v44 = vpop.f32.mrb[11].mxu1  ;;  %v5712_v45 = vpop.f32.mrb[10].mxu0 }
 0x3f3   : > { %v4738_v46 = vpop.f32.mrb[11].mxu0  ;;  %v1212_v60 = vsel %vm919_vm1, %v5712_v45, -inf }
 0x3f7   : > { %v5714_v47 = vpop.f32.mrb[12].mxu1 }
 0x3f8   : > { %v4725_v48 = vpop.f32.mrb[13].mxu1  ;;  %v5716_v49 = vpop.f32.mrb[12].mxu0  ;;  %v1087_v50 = vsel %vm919_vm1, %v5714_v47, -inf }
 0x3f9   : > { %1088 = vmax.xlane.f32.xlu0 %v1087_v50  ;;  %v5720_v51 = vpop.f32.mrb[14].mxu1  ;;  %v4749_v52 = vpop.f32.mrb[13].mxu0  ;;  %v1330_v2 = vsel %vm919_vm1, %v5716_v49, -inf }
 0x3fa   : > { %v4726_v53 = vpop.f32.mrb[15].mxu1  ;;  %v1326_v54 = vpop.f32.mrb[14].mxu0  ;;  %v1090_v55 = vsel %vm919_vm1, %v5720_v51, -inf }
 0x3fb   : > { %1091 = vmax.xlane.f32.xlu1 %v1090_v55  ;;  %v4750_v56 = vpop.f32.mrb[15].mxu0  ;;  %v1333_v58 = vsel %vm919_vm1, %v1326_v54, -inf }
 0x3fd   : > { %1210 = vmax.xlane.f32.xlu0 %v1209_v57 }
 0x3ff   : > { %1334 = vmax.xlane.f32.xlu1 %v1333_v58 }
 0x400   : > { %v5727_v59 = vpop.f32.mrb[16].mxu0 }
 0x401   : > { %1213 = vmax.xlane.f32.xlu0 %v1212_v60  ;;  %v4761_v61 = vpop.f32.mrb[17].mxu0  ;;  %v1451_v4 = vsel %vm919_vm1, %v5727_v59, -inf }
 0x402   : > { %v1447_v62 = vpop.f32.mrb[18].mxu0 }
 0x403   : > { %v4762_v63 = vpop.f32.mrb[19].mxu0  ;;  %v1454_v0 = vsel %vm919_vm1, %v1447_v62, -inf }
 0x404   : > { %1455 = vmax.xlane.f32.xlu1 %v1454_v0 }
 0x405   : > { %1331 = vmax.xlane.f32.xlu0 %v1330_v2 }
 0x408   : > { %v5734_v3 = vpop.f32.mrb[20].mxu0 }
 0x409   : > { %1452 = vmax.xlane.f32.xlu0 %v1451_v4  ;;  %v4773_v5 = vpop.f32.mrb[21].mxu0  ;;  %v1572_v9 = vsel %vm919_vm1, %v5734_v3, -inf }
 0x40a   : > { %v1568_v6 = vpop.f32.mrb[22].mxu0 }
 0x40b   : > { %v4774_v7 = vpop.f32.mrb[23].mxu0  ;;  %v1575_v8 = vsel %vm919_vm1, %v1568_v6, -inf }
 0x40c   : > { %1576 = vmax.xlane.f32.xlu1 %v1575_v8 }
 0x40d   : > { %1573 = vmax.xlane.f32.xlu0 %v1572_v9 }
 0x410   : > { %v5741_v11 = vpop.f32.mrb[24].mxu0 }
 0x411   : > { %v4785_v12 = vpop.f32.mrb[25].mxu0  ;;  %v1693_v13 = vsel %vm919_vm1, %v5741_v11, -inf }
 0x412   : > { %1694 = vmax.xlane.f32.xlu0 %v1693_v13  ;;  %v5745_v14 = vpop.f32.mrb[26].mxu0 }
 0x413   : > { %v4786_v15 = vpop.f32.mrb[27].mxu0  ;;  %v1696_v16 = vsel %vm919_vm1, %v5745_v14, -inf }
 0x414   : > { %1697 = vmax.xlane.f32.xlu1 %v1696_v16 }
 0x418   : > { %v5749_v17 = vpop.f32.mrb[28].mxu0 }
 0x419   : > { %v4797_v18 = vpop.f32.mrb[29].mxu0  ;;  %v1814_v19 = vsel %vm919_vm1, %v5749_v17, -inf }
 0x41a   : > { %1815 = vmax.xlane.f32.xlu0 %v1814_v19  ;;  %v5753_v20 = vpop.f32.mrb[30].mxu0 }
 0x41b   : > { %v4798_v21 = vpop.f32.mrb[31].mxu0  ;;  %v1817_v22 = vsel %vm919_vm1, %v5753_v20, -inf }
 0x41c   : > { %1818 = vmax.xlane.f32.xlu1 %v1817_v22 }
 0x486   : > { %v1089_v23 = vpop.xlane.xlu0 %1088 }
 0x487   : > { %v1093_v38 = vsub.f32 %v5714_v47, %v1089_v23 }
 0x488   : > { %v1092_v24 = vpop.xlane.xlu1 %1091 }
 0x489   : > { %v1094_v55 = vsub.f32 %v5720_v51, %v1092_v24 }
 0x48a   : > { %v1211_v25 = vpop.xlane.xlu0 %1210 }
 0x48b   : > { %v1215_v26 = vsub.f32 %v5708_v41, %v1211_v25  ;;  %v1097_v61 = vmul.f32 1.442695, %v1094_v55 }
 0x48c   : > { %v1335_v27 = vpop.xlane.xlu1 %1334 }
 0x48d   : > { %v1217_v28 = vmul.f32 1.442695, %v1215_v26  ;;  %v1337_v29 = vsub.f32 %v1326_v54, %v1335_v27 }
 0x48e   : > { %v1214_v30 = vpop.xlane.xlu0 %1213 }
 0x48f   : > { %5233 = vpow2.f32 %v1217_v28  ;;  %v1216_v31 = vsub.f32 %v5712_v45, %v1214_v30  ;;  %v1340_v32 = vmul.f32 1.442695, %v1337_v29  ;;  %v1095_v45 = vmul.f32 1.442695, %v1093_v38 }
 0x491   : > { %v1219_v33 = vmul.f32 1.442695, %v1216_v31  ;;  %v1456_v34 = vpop.xlane.xlu1 %1455 }
 0x492   : > { %v1458_v35 = vsub.f32 %v1447_v62, %v1456_v34  ;;  %v1332_v36 = vpop.xlane.xlu0 %1331 }
 0x493   : > { %5235 = vpow2.f32 %v1219_v33  ;;  %v1336_v37 = vsub.f32 %v5716_v49, %v1332_v36 }
 0x494   : > { %5237 = vpow2.f32 %v1340_v32  ;;  %v1461_v40 = vmul.f32 1.442695, %v1458_v35 }
 0x495   : > { %v1338_v41 = vmul.f32 1.442695, %v1336_v37 }
 0x496   : > { %v1453_v43 = vpop.xlane.xlu0 %1452 }
 0x497   : > { %5239 = vpow2.f32 %v1338_v41  ;;  %v1457_v44 = vsub.f32 %v5727_v59, %v1453_v43 }
 0x498   : > { %5241 = vpow2.f32 %v1461_v40 }
 0x499   : > { %v5762_v46 = vpop.eup %5233  ;;  %v1459_v48 = vmul.f32 1.442695, %v1457_v44  ;;  %v1577_v50 = vpop.xlane.xlu1 %1576 }
 0x49a   : > { %v1579_v52 = vsub.f32 %v1568_v6, %v1577_v50  ;;  %v1574_v53 = vpop.xlane.xlu0 %1573  ;;  %v1221_v49 = vsel %vm919_vm1, %v5762_v46, 0.0 }
 0x49b   : > { %5243 = vpow2.f32 %v1459_v48  ;;  %v1578_v47 = vsub.f32 %v5734_v3, %v1574_v53  ;;  %1222 = vadd.xlane.f32.xlu0 %v1221_v49 }
 0x49c   : > { %5245 = vpow2.f32 %v1095_v45  ;;  %v1582_v56 = vmul.f32 1.442695, %v1579_v52 }
 0x49d   : > { %v5767_v54 = vpop.eup %5235  ;;  %v1580_v57 = vmul.f32 1.442695, %v1578_v47 }
 0x49e   : > { %v1224_v58 = vsel %vm919_vm1, %v5767_v54, 0.0  ;;  %v5772_v59 = vpop.eup %5237 }
 0x49f   : > { %5247 = vpow2.f32 %v1580_v57  ;;  %1225 = vadd.xlane.f32.xlu1 %v1224_v58  ;;  %v1345_v63 = vsel %vm919_vm1, %v5772_v59, 0.0  ;;  %v1695_v15 = vpop.xlane.xlu0 %1694 }
 0x4a0   : > { %5249 = vpow2.f32 %v1582_v56  ;;  %v1699_v16 = vsub.f32 %v5741_v11, %v1695_v15 }
 0x4a1   : > { %v5774_v60 = vpop.eup %5239  ;;  %5251 = vpow2.f32 %v1097_v61  ;;  %v1698_v19 = vpop.xlane.xlu1 %1697 }
 0x4a2   : > { %v1342_v62 = vsel %vm919_vm1, %v5774_v60, 0.0  ;;  %v5780_v51 = vpop.eup %5241  ;;  %v1701_v18 = vmul.f32 1.442695, %v1699_v16  ;;  %v1700_v21 = vsub.f32 %v5745_v14, %v1698_v19 }
 0x4a3   : > { %1343 = vadd.xlane.f32.xlu0 %v1342_v62  ;;  %1346 = vadd.xlane.f32.xlu1 %v1345_v63  ;;  %v1466_v3 = vsel %vm919_vm1, %v5780_v51, 0.0 }
 0x4a4   : > { %5253 = vpow2.f32 %v1701_v18  ;;  %v1703_v23 = vmul.f32 1.442695, %v1700_v21 }
 0x4a5   : > { %v5782_v0 = vpop.eup %5243 }
 0x4a6   : > { %v1463_v2 = vsel %vm919_vm1, %v5782_v0, 0.0  ;;  %v5788_v4 = vpop.eup %5245  ;;  %5255 = vpow2.f32 %v1703_v23 }
 0x4a7   : > { %1464 = vadd.xlane.f32.xlu0 %v1463_v2  ;;  %1467 = vadd.xlane.f32.xlu1 %v1466_v3  ;;  %v1099_v6 = vsel %vm919_vm1, %v5788_v4, 0.0  ;;  %v1816_v22 = vpop.xlane.xlu0 %1815 }
 0x4a8   : > { %v1820_v24 = vsub.f32 %v5749_v17, %v1816_v22 }
 0x4a9   : > { %v5790_v5 = vpop.eup %5247  ;;  %v1819_v25 = vpop.xlane.xlu1 %1818 }
 0x4aa   : > { %v1584_v7 = vsel %vm919_vm1, %v5790_v5, 0.0  ;;  %v5796_v8 = vpop.eup %5249  ;;  %v1822_v26 = vmul.f32 1.442695, %v1820_v24  ;;  %v1821_v27 = vsub.f32 %v5753_v20, %v1819_v25 }
 0x4ab   : > { %1100 = vadd.xlane.f32.xlu0 %v1099_v6  ;;  %1585 = vadd.xlane.f32.xlu1 %v1584_v7  ;;  %v1587_v9 = vsel %vm919_vm1, %v5796_v8, 0.0  ;;  %v5252_v12 = vpop.eup %5251 }
 0x4ac   : > { %v1102_v13 = vsel %vm919_vm1, %v5252_v12, 0.0  ;;  %5257 = vpow2.f32 %v1822_v26  ;;  %v1824_v29 = vmul.f32 1.442695, %v1821_v27 }
 0x4ae   : > { %v5809_v28 = vpop.eup %5253  ;;  %5259 = vpow2.f32 %v1824_v29 }
 0x4af   : > { %1588 = vadd.xlane.f32.xlu1 %v1587_v9  ;;  %v1705_v11 = vsel %vm919_vm1, %v5809_v28, 0.0 }
 0x4b0   : > { %v5813_v30 = vpop.eup %5255 }
 0x4b1   : > { %v1708_v14 = vsel %vm919_vm1, %v5813_v30, 0.0 }
 0x4b3   : > { %1103 = vadd.xlane.f32.xlu1 %v1102_v13 }
 0x4b6   : > { %v5817_v17 = vpop.eup %5257 }
 0x4b7   : > { %v1826_v20 = vsel %vm919_vm1, %v5817_v17, 0.0 }
 0x4b8   : > { %v5821_v31 = vpop.eup %5259 }
 0x4b9   : > { %v1829_v32 = vsel %vm919_vm1, %v5821_v31, 0.0 }
 0x4c1   : > { %1111 = vrot.lane.b32.xlu0 %v5650_v10, %s6543_s23  ;;  %s6551_s23 = smov 112  }
 0x4c4   : > { %1232 = vrot.lane.b32.xlu1 %v5650_v10, %s5385_s20 }
 0x4e0   : > { %1706 = vadd.xlane.f32.xlu0 %v1705_v11 }
 0x4e8   : > { %1709 = vadd.xlane.f32.xlu1 %v1708_v14 }
 0x4ec   : > { %1827 = vadd.xlane.f32.xlu1 %v1826_v20 }
 0x4f0   : > { %1830 = vadd.xlane.f32.xlu1 %v1829_v32 }
 0x4f6   : > { %1353 = vrot.lane.b32.xlu0 %v5650_v10, %s6549_s24 }
 0x4fa   : > { %1595 = vrot.lane.b32.xlu0 %v5650_v10, %s6545_s27 }
 0x4fe   : > { %1716 = vrot.lane.b32.xlu0 %v5650_v10, %s6541_s28 }
 0x501   : > { %1474 = vrot.lane.b32.xlu1 %v5650_v10, %s6547_s26 }
 0x502   : > { %1837 = vrot.lane.b32.xlu0 %v5650_v10, %s6539_s29 }
 0x528   : > { %v1223_v33 = vpop.xlane.xlu0 %1222 }
 0x52c   : > { %v1226_v34 = vpop.xlane.xlu1 %1225 }
 0x530   : > { %v1344_v35 = vpop.xlane.xlu0 %1343  ;;  %v1347_v36 = vpop.xlane.xlu1 %1346 }
 0x534   : > { %v1465_v37 = vpop.xlane.xlu0 %1464  ;;  %v1468_v38 = vpop.xlane.xlu1 %1467 }
 0x538   : > { %v1101_v40 = vpop.xlane.xlu0 %1100  ;;  %v1586_v41 = vpop.xlane.xlu1 %1585 }
 0x539   : > { %5261 = vrcp.f32 %v1101_v40 }
 0x53c   : > { %v1112_v43 = vpop.permute.xlu0 %1111  ;;  %v1589_v44 = vpop.xlane.xlu1 %1588 }
 0x53d   : > { %4728 = vmatpush3.bf16.msra.mxu1 %v1112_v43 }
 0x53e   : > { %4739 = vmatprep.subr.bf16.mxu1 %v5377_v1 }
 0x540   : > { %v1104_v45 = vpop.xlane.xlu1 %1103 }
 0x541   : > { %5263 = vrcp.f32 %v1104_v45 }
 0x542   : > { %5265 = vrcp.f32 %v1226_v34 }
 0x543   : > { %5267 = vrcp.f32 %v1223_v33  ;;  %v5262_v48 = vpop.eup %5261 }
 0x544   : > { %v1107_v50 = vmul.f32 %v5262_v48, %v5788_v4  ;;  %v1233_v47 = vpop.permute.xlu1 %1232  ;;  %5269 = vrcp.f32 %v1344_v35  ;;  %v5146_v48 = vld [vmem:[%s6528_s5 + $0xc8] sm:$0xff]  }
 0x545   : > { %5271 = vrcp.f32 %v1347_v36 }
 0x546   : > { %5273 = vrcp.f32 %v1465_v37 }
 0x547   : > { %5275 = vrcp.f32 %v1468_v38 }
 0x548   : > { %5277 = vrcp.f32 %v1589_v44 }
 0x549   : > { %5279 = vrcp.f32 %v1586_v41 }
 0x54b   : > { %v5264_v10 = vpop.eup %5263 }
 0x54c   : > { %v1108_v52 = vmul.f32 %v5264_v10, %v5252_v12  ;;  %v5266_v49 = vpop.eup %5265  ;;  %v5147_v10 = vld [vmem:[%s6528_s5 + $0xd0] sm:$0xff]  }
 0x54d   : > { %v5268_v55 = vpop.eup %5267  ;;  %v1230_v56 = vmul.f32 %v5266_v49, %v5767_v54 }
 0x54e   : > { %v1109_v53 = vpack.c.bf16 %v1108_v52, %v1107_v50  ;;  %v1229_v57 = vmul.f32 %v5268_v55, %v5762_v46  ;;  %v5270_v61 = vpop.eup %5269 }
 0x54f   : > { %v5272_v62 = vpop.eup %5271  ;;  %v1350_v2 = vmul.f32 %v5270_v61, %v5774_v60  ;;  %v5150_v61 = vld [vmem:[%s6528_s5 + $0xe8] sm:$0xff]  }
 0x550   : > { %4730 = vmatmul.mubr.msk.bf16.vlgmr.msra.gmra.mrb[16].mxu1 %vm919_vm1, %v1109_v53  ;;  %v1231_v58 = vpack.c.bf16 %v1230_v56, %v1229_v57  ;;  %v1351_v3 = vmul.f32 %v5272_v62, %v5772_v59  ;;  %v5274_v7 = vpop.eup %5273  ;;  %v5148_v53 = vld [vmem:[%s6528_s5 + $0xd8] sm:$0xff]   ;;  %v5149_v56 = vld [vmem:[%s6528_s5 + $0xe0] sm:$0xff]  }
 0x551   : > { %4740 = vmatpush3.bf16.msra.mxu1 %v1233_v47  ;;  %4741 = vmatprep.mubr.msk.bf16.mxu1 %vm5378_vm0, %v5377_v1  ;;  %v5276_v9 = vpop.eup %5275  ;;  %v1471_v59 = vmul.f32 %v5274_v7, %v5782_v0 }
 0x552   : > { %4751 = vmatprep.subr.bf16.mxu1 %v5377_v1  ;;  %v1352_v46 = vpack.c.bf16 %v1351_v3, %v1350_v2  ;;  %v1472_v12 = vmul.f32 %v5276_v9, %v5780_v51  ;;  %v5278_v16 = vpop.eup %5277  ;;  %v5151_v3 = vld [vmem:[%s6528_s5 + $0xf0] sm:$0xff]  }
 0x553   : > { %v5280_v19 = vpop.eup %5279  ;;  %v1593_v0 = vmul.f32 %v5278_v16, %v5796_v8 }
 0x554   : > { %v1473_v15 = vpack.c.bf16 %v1472_v12, %v1471_v59  ;;  %v1592_v51 = vmul.f32 %v5280_v19, %v5790_v5 }
 0x556   : > { %v1594_v21 = vpack.c.bf16 %v1593_v0, %v1592_v51 }
 0x558   : > { %4742 = vmatmul.mubr.msk.bf16.vlgmr.msra.gmra.mrb[20].mxu1 %vm919_vm1, %v1231_v58 }
 0x559   : > { %4753 = vmatprep.mubr.msk.bf16.mxu1 %vm5378_vm0, %v5377_v1 }
 0x56d   : > { %v1707_v63 = vpop.xlane.xlu0 %1706 }
 0x571   : > { %v1354_v54 = vpop.permute.xlu0 %1353 }
 0x572   : > { %4752 = vmatpush3.bf16.msra.mxu1 %v1354_v54 }
 0x573   : > { %4763 = vmatprep.subr.bf16.mxu1 %v5377_v1 }
 0x575   : > { %4754 = vmatmul.mubr.msk.bf16.vlgmr.msra.gmra.mrb[24].mxu1 %vm919_vm1, %v1352_v46  ;;  %v1710_v4 = vpop.xlane.xlu1 %1709  ;;  %v1596_v18 = vpop.permute.xlu0 %1595 }
 0x576   : > { %4765 = vmatprep.mubr.msk.bf16.mxu1 %vm5378_vm0, %v5377_v1  ;;  %5281 = vrcp.f32 %v1710_v4  ;;  %v5152_v4 = vld [vmem:[%s6528_s5 + $0xf8] sm:$0xff]  }
 0x577   : > { %5283 = vrcp.f32 %v1707_v63 }
 0x579   : > { %v1828_v6 = vpop.xlane.xlu1 %1827  ;;  %v1717_v23 = vpop.permute.xlu0 %1716 }
 0x57d   : > { %v1831_v60 = vpop.xlane.xlu1 %1830  ;;  %v1838_v27 = vpop.permute.xlu0 %1837 }
 0x57e   : > { %5285 = vrcp.f32 %v1831_v60 }
 0x57f   : > { %5287 = vrcp.f32 %v1828_v6 }
 0x580   : > { %v5282_v22 = vpop.eup %5281 }
 0x581   : > { %v1475_v13 = vpop.permute.xlu1 %1474  ;;  %v5284_v24 = vpop.eup %5283  ;;  %v1714_v25 = vmul.f32 %v5282_v22, %v5813_v30 }
 0x582   : > { %4764 = vmatpush3.bf16.msra.mxu1 %v1475_v13  ;;  %v1713_v8 = vmul.f32 %v5284_v24, %v5809_v28 }
 0x583   : > { %4775 = vmatprep.subr.bf16.mxu1 %v5377_v1 }
 0x584   : > { %v1715_v26 = vpack.c.bf16 %v1714_v25, %v1713_v8 }
 0x585   : > { %4766 = vmatmul.mubr.msk.bf16.vlgmr.msra.gmra.mrb[28].mxu1 %vm919_vm1, %v1473_v15 }
 0x586   : > { %4776 = vmatpush3.bf16.msra.mxu1 %v1596_v18  ;;  %4777 = vmatprep.mubr.msk.bf16.mxu1 %vm5378_vm0, %v5377_v1 }
 0x587   : > { %4787 = vmatprep.subr.bf16.mxu1 %v5377_v1 }
 0x588   : > { %v5286_v5 = vpop.eup %5285 }
 0x589   : > { %v5288_v29 = vpop.eup %5287  ;;  %v1835_v11 = vmul.f32 %v5286_v5, %v5821_v31 }
 0x58a   : > { %v1834_v30 = vmul.f32 %v5288_v29, %v5817_v17  ;;  %v5145_v17 = vld [vmem:[%s6528_s5 + $0xc0] sm:$0xff]  }
 0x58b   : > { %4806 = vmatpush3.bf16.msra.mxu0 %v5145_v17 }
 0x58c   : > { %v1836_v14 = vpack.c.bf16 %v1835_v11, %v1834_v30  ;;  %4807 = vmatprep.subr.bf16.mxu0 %v5377_v1 }
 0x58d   : > { %4778 = vmatmul.mubr.msk.bf16.vlgmr.msra.gmra.mrb[32].mxu1 %vm919_vm1, %v1594_v21 }
 0x58e   : > { %4788 = vmatpush3.bf16.msra.mxu1 %v1717_v23  ;;  %4789 = vmatprep.mubr.msk.bf16.mxu1 %vm5378_vm0, %v5377_v1 }
 0x58f   : > { %4799 = vmatprep.subr.bf16.mxu1 %v5377_v1  ;;  %4808 = vmatpush3.bf16.msra.mxu0 %v5146_v48  ;;  %v4317_v48 = vld [vmem:[%s6529_s6 + $0x3] ss:$0 sm:$0xff] }
 0x590   : > { %4809 = vmatprep.subr.bf16.mxu0 %v5377_v1 }
 0x593   : > { %4810 = vmatpush3.bf16.msra.mxu0 %v5147_v10 }
 0x594   : > { %4811 = vmatprep.subr.bf16.mxu0 %v5377_v1 }
 0x595   : > { %4790 = vmatmul.mubr.msk.bf16.vlgmr.msra.gmra.mrb[36].mxu1 %vm919_vm1, %v1715_v26 }
 0x596   : > { %4800 = vmatpush3.bf16.msra.mxu1 %v1838_v27  ;;  %4801 = vmatprep.mubr.msk.bf16.mxu1 %vm5378_vm0, %v5377_v1 }
 0x597   : > { %4825 = vmatprep.subr.bf16.mxu1 %v5377_v1  ;;  %4812 = vmatpush3.bf16.msra.mxu0 %v5148_v53 }
 0x598   : > { %4813 = vmatprep.subr.bf16.mxu0 %v5377_v1 }
 0x59b   : > { %4814 = vmatpush3.bf16.msra.mxu0 %v5149_v56 }
 0x59c   : > { %4815 = vmatprep.subr.bf16.mxu0 %v5377_v1 }
 0x59d   : > { %4802 = vmatmul.mubr.msk.bf16.vlgmr.msra.gmra.mrb[40].mxu1 %vm919_vm1, %v1836_v14 }
 0x59e   : > { %4841 = vmatprep.mubr.msk.bf16.mxu1 %vm5378_vm0, %v5377_v1 }
 0x59f   : > { %4816 = vmatpush3.bf16.msra.mxu0 %v5150_v61  ;;  %v5153_v61 = vld [vmem:[%s6530_s7 + $0x40] sm:$0xff]  }
 0x5a0   : > { %4817 = vmatprep.subr.bf16.mxu0 %v5377_v1 }
 0x5a3   : > { %4818 = vmatpush3.bf16.msra.mxu0 %v5151_v3  ;;  %v5156_v3 = vld [vmem:[%s6530_s7 + $0x58] sm:$0xff]  }
 0x5a4   : > { %4819 = vmatprep.subr.bf16.mxu0 %v5377_v1 }
 0x5a7   : > { %4820 = vmatpush3.bf16.msra.mxu0 %v5152_v4  ;;  %v5160_v4 = vld [vmem:[%s6530_s7 + $0x70] sm:$0xff]  }
 0x5a8   : > { %4845 = vmatprep.subr.bf16.mxu0 %v5153_v61 }
 0x623   : > { %v1151_v28 = vpop.f32.mrb[16].mxu1 }
 0x624   : > { %v4731_v20 = vpop.f32.mrb[17].mxu1 }
 0x625   : > { %v1154_v32 = vpop.f32.mrb[18].mxu1 }
 0x626   : > { %v5051_v33 = vpack.i.bf16 %v1154_v32, %v1151_v28  ;;  %v4732_v34 = vpop.f32.mrb[19].mxu1 }
 0x628   : > { %5052 = vrot.lane.b32.xlu1 %v5051_v33, %s6539_s29  ;;  %s6027_s29 = scalar_lea.vmem %s6525_s2, %s5969_s21 }
 0x62b   : > { %v1272_v35 = vpop.f32.mrb[20].mxu1 }
 0x62c   : > { %v4743_v36 = vpop.f32.mrb[21].mxu1 }
 0x62d   : > { %v1275_v31 = vpop.f32.mrb[22].mxu1 }
 0x62e   : > { %v5056_v37 = vpack.i.bf16 %v1275_v31, %v1272_v35  ;;  %v4744_v38 = vpop.f32.mrb[23].mxu1 }
 0x630   : > { %5057 = vrot.lane.b32.xlu0 %v5056_v37, %s6541_s28 }
 0x648   : > { %v1393_v40 = vpop.f32.mrb[24].mxu1 }
 0x649   : > { %v4755_v41 = vpop.f32.mrb[25].mxu1 }
 0x64a   : > { %v1396_v43 = vpop.f32.mrb[26].mxu1 }
 0x64b   : > { %v5061_v44 = vpack.i.bf16 %v1396_v43, %v1393_v40  ;;  %v4756_v45 = vpop.f32.mrb[27].mxu1 }
 0x64d   : > { %5062 = vrot.lane.b32.xlu1 %v5061_v44, %s6545_s27  ;;  %s554_s27 = scalar_lea.vmem %s6524_s1, %s5969_s21 }
 0x658   : > { %v1514_v50 = vpop.f32.mrb[28].mxu1 }
 0x659   : > { %v4767_v52 = vpop.f32.mrb[29].mxu1 }
 0x65a   : > { %v1517_v49 = vpop.f32.mrb[30].mxu1 }
 0x65b   : > { %v5066_v47 = vpack.i.bf16 %v1517_v49, %v1514_v50  ;;  %v4768_v55 = vpop.f32.mrb[31].mxu1 }
 0x65c   : > { %v5365_v55 = vld [vmem:[%s5531_s17] sm:$0xff] }
 0x65d   : > { %5067 = vrot.lane.b32.xlu0 %v5066_v47, %s6547_s26  ;;  %s6556_s26 = smov 16  }
 0x660   : > { %v1635_v57 = vpop.f32.mrb[32].mxu1 }
 0x661   : > { %v4779_v58 = vpop.f32.mrb[33].mxu1 }
 0x662   : > { %v1638_v62 = vpop.f32.mrb[34].mxu1 }
 0x663   : > { %v5071_v63 = vpack.i.bf16 %v1638_v62, %v1635_v57  ;;  %v4780_v2 = vpop.f32.mrb[35].mxu1  ;;  %v5366_v57 = vld [vmem:[%s5531_s17 + $0x8] sm:$0xff]  ;;  %s574_s17 = scalar_lea.vmem %s6538_s15, %s5517_s25 }
 0x664   : > { %v5154_v62 = vld [vmem:[%s6530_s7 + $0x48] sm:$0xff]   ;;  %v5155_v2 = vld [vmem:[%s6530_s7 + $0x50] sm:$0xff]  }
 0x665   : > { %5072 = vrot.lane.b32.xlu1 %v5071_v63, %s6549_s24  ;;  %v5159_v63 = vld [vmem:[%s6530_s7] sm:$0xff]   ;;  %s569_s24 = scalar_lea.vmem %s6527_s4, %s5969_s21  ;;  %s6554_s21 = smov 48  }
 0x666   : > { %4826 = vmatpush3.bf16.msra.mxu1 %v5159_v63  ;;  %v5172_v63 = vld [vmem:[%s6530_s7 + $0x98] sm:$0xff]  }
 0x667   : > { %4827 = vmatprep.subr.bf16.mxu1 %v5377_v1 }
 0x668   : > { %v1756_v54 = vpop.f32.mrb[36].mxu1 }
 0x669   : > { %v4791_v46 = vpop.f32.mrb[37].mxu1 }
 0x66a   : > { %v1759_v6 = vpop.f32.mrb[38].mxu1  ;;  %v5158_v46 = vld [vmem:[%s6530_s7 + $0x68] sm:$0xff]  }
 0x66b   : > { %v5076_v7 = vpack.i.bf16 %v1759_v6, %v1756_v54  ;;  %v4792_v9 = vpop.f32.mrb[39].mxu1  ;;  %v5157_v54 = vld [vmem:[%s6530_s7 + $0x60] sm:$0xff]  }
 0x66d   : > { %5077 = vrot.lane.b32.xlu0 %v5076_v7, %s5385_s20 }
 0x670   : > { %v1877_v60 = vpop.f32.mrb[40].mxu1 }
 0x671   : > { %v4803_v59 = vpop.f32.mrb[41].mxu1 }
 0x672   : > { %v1880_v12 = vpop.f32.mrb[42].mxu1 }
 0x673   : > { %v5081_v13 = vpack.i.bf16 %v1880_v12, %v1877_v60  ;;  %v4804_v15 = vpop.f32.mrb[43].mxu1 }
 0x675   : > { %5082 = vrot.lane.b32.xlu1 %v5081_v13, %s6551_s23 }
 0x69a   : > { %v5053_v16 = vpop.permute.xlu1 %5052 }
 0x69b   : > { %v5055_v51 = vunpack.i.h.bf16 %v5053_v16  ;;  %v5054_v21 = vunpack.i.l.bf16 %v5053_v16  ;;  %v5162_v16 = vld [vmem:[%s6530_s7 + $0x78] sm:$0xff]  }
 0x69d   : > { %v1941_v29 = vsel %vm919_vm1, %v5710_v42, %v5055_v51  ;;  %v1940_v11 = vsel %vm919_vm1, %v5706_v39, %v5054_v21  ;;  %v2116_v51 = vld [vmem:[%s569_s24 + $0x8] sm:$0xff]  ;;  %v2113_v21 = vld [vmem:[%s554_s27 + $0x10] sm:$0xff] }
 0x6a2   : > { %v5058_v18 = vpop.permute.xlu0 %5057 }
 0x6a3   : > { %v5060_v22 = vunpack.i.h.bf16 %v5058_v18  ;;  %v5059_v23 = vunpack.i.l.bf16 %v5058_v18  ;;  %v2111_v18 = vld [vmem:[%s554_s27] sm:$0xff] }
 0x6a5   : > { %v1943_v28 = vsel %vm1942_vm2, %v1940_v11, %v5059_v23  ;;  %v1944_v20 = vsel %vm1942_vm2, %v1941_v29, %v5060_v22  ;;  %v5161_v29 = vld [vmem:[%s6530_s7 + $0x8] sm:$0xff]  }
 0x6a6   : > { %4828 = vmatpush3.bf16.msra.mxu1 %v5161_v29 }
 0x6a7   : > { %4829 = vmatprep.subr.bf16.mxu1 %v5377_v1 }
 0x6bf   : > { %v5063_v19 = vpop.permute.xlu1 %5062 }
 0x6c0   : > { %v5065_v25 = vunpack.i.h.bf16 %v5063_v19  ;;  %v5064_v8 = vunpack.i.l.bf16 %v5063_v19  ;;  %v2112_v19 = vld [vmem:[%s554_s27 + $0x8] sm:$0xff] }
 0x6c1   : > { %v2127_v23 = vadd.f32 %v2116_v51, %v2112_v19 }
 0x6c2   : > { %v1946_v34 = vsel %vm1945_vm3, %v1943_v28, %v5064_v8  ;;  %v1947_v35 = vsel %vm1945_vm3, %v1944_v20, %v5065_v25  ;;  %v2117_v25 = vld [vmem:[%s569_s24 + $0x10] sm:$0xff]  ;;  %v2118_v8 = vld [vmem:[%s569_s24 + $0x18] sm:$0xff]  ;;  %v5165_v28 = vld [vmem:[%s6530_s7 + $0x20] sm:$0xff]  }
 0x6c3   : > { %v5166_v20 = vld [vmem:[%s6530_s7 + $0x28] sm:$0xff]  }
 0x6cf   : > { %v5068_v0 = vpop.permute.xlu0 %5067 }
 0x6d0   : > { %v5070_v5 = vunpack.i.h.bf16 %v5068_v0  ;;  %v5069_v27 = vunpack.i.l.bf16 %v5068_v0  ;;  %v2115_v0 = vld [vmem:[%s569_s24] sm:$0xff]  ;;  %s6555_s24 = smov 32  }
 0x6d1   : > { %v2126_v22 = vadd.f32 %v2115_v0, %v2111_v18 }
 0x6d2   : > { %v1949_v36 = vsel %vm1948_vm4, %v1946_v34, %v5069_v27  ;;  %v1950_v42 = vsel %vm1948_vm4, %v1947_v35, %v5070_v5  ;;  %v5169_v34 = vld [vmem:[%s6530_s7 + $0x80] sm:$0xff]  }
 0x6d3   : > { %v2130_v27 = vpack.c.bf16 %v2127_v23, %v2126_v22  ;;  %v4328_v23 = vld [vmem:[%s6531_s8] ss:$0 sm:$0xff] }
 0x6d7   : > { %v5073_v24 = vpop.permute.xlu1 %5072 }
 0x6d8   : > { %v5075_v30 = vunpack.i.h.bf16 %v5073_v24  ;;  %v5074_v14 = vunpack.i.l.bf16 %v5073_v24  ;;  %v2114_v24 = vld [vmem:[%s554_s27 + $0x18] sm:$0xff]  ;;  %s6552_s27 = smov 80  }
 0x6d9   : > { %v2129_v5 = vadd.f32 %v2118_v8, %v2114_v24 }
 0x6da   : > { %v1952_v39 = vsel %vm1951_vm5, %v1949_v36, %v5074_v14  ;;  %v1953_v37 = vsel %vm1951_vm5, %v1950_v42, %v5075_v30  ;;  %v5163_v30 = vld [vmem:[%s6530_s7 + $0x10] sm:$0xff]   ;;  %v5164_v14 = vld [vmem:[%s6530_s7 + $0x18] sm:$0xff]  }
 0x6db   : > { %4830 = vmatpush3.bf16.msra.mxu1 %v5163_v30 }
 0x6dc   : > { %4831 = vmatprep.subr.bf16.mxu1 %v5377_v1 }
 0x6df   : > { %v5078_v26 = vpop.permute.xlu0 %5077  ;;  %4832 = vmatpush3.bf16.msra.mxu1 %v5164_v14 }
 0x6e0   : > { %v5080_v32 = vunpack.i.h.bf16 %v5078_v26  ;;  %v5079_v33 = vunpack.i.l.bf16 %v5078_v26  ;;  %v2128_v26 = vadd.f32 %v2117_v25, %v2113_v21  ;;  %4833 = vmatprep.subr.bf16.mxu1 %v5377_v1 }
 0x6e2   : > { %v1955_v40 = vsel %vm1954_vm6, %v1952_v39, %v5079_v33  ;;  %v1956_v41 = vsel %vm1954_vm6, %v1953_v37, %v5080_v32  ;;  %v2131_v11 = vpack.c.bf16 %v2129_v5, %v2128_v26  ;;  %v5167_v32 = vld [vmem:[%s6530_s7 + $0x30] sm:$0xff]   ;;  %v5168_v33 = vld [vmem:[%s6530_s7 + $0x38] sm:$0xff]  }
 0x6e3   : > { %4834 = vmatpush3.bf16.msra.mxu1 %v5165_v28 }
 0x6e4   : > { %4835 = vmatprep.subr.bf16.mxu1 %v5377_v1 }
 0x6e7   : > { %v5083_v31 = vpop.permute.xlu1 %5082  ;;  %4836 = vmatpush3.bf16.msra.mxu1 %v5166_v20 }
 0x6e8   : > { %v5085_v38 = vunpack.i.h.bf16 %v5083_v31  ;;  %v5084_v17 = vunpack.i.l.bf16 %v5083_v31  ;;  %4837 = vmatprep.subr.bf16.mxu1 %v5377_v1 }
 0x6ea   : > { %v1958_v43 = vsel %vm1957_vm7, %v1955_v40, %v5084_v17  ;;  %v1959_v44 = vsel %vm1957_vm7, %v1956_v41, %v5085_v38  ;;  %v4326_v17 = vld [vmem:[%s6536_s13] ss:$0 sm:$0xff] }
 0x6eb   : > { %v1960_v45 = vpack.c.bf16 %v1959_v44, %v1958_v43  ;;  %4838 = vmatpush3.bf16.msra.mxu1 %v5167_v32  ;;  %v4327_v44 = vld [vmem:[%s6537_s14] ss:$0 sm:$0xff] }
 0x6ec   : > { %4839 = vmatprep.subr.bf16.mxu1 %v5377_v1 }
 0x6ed   : > { %4822 = vmatmul.mubr.bf16.vlgmr.msra.gmra.mrb[32].mxu0 %v1960_v45 }
 0x6ee   : > { %4846 = vmatpush3.bf16.msra.mxu0 %v5153_v61  ;;  %4861 = vmatprep.mubr.bf16.mxu0 %v2130_v27  ;;  %v5170_v61 = vld [vmem:[%s6530_s7 + $0x88] sm:$0xff]  }
 0x6ef   : > { %4847 = vmatprep.subr.bf16.mxu0 %v5154_v62  ;;  %4840 = vmatpush3.bf16.msra.mxu1 %v5168_v33 }
 0x6f0   : > { %4865 = vmatprep.subr.bf16.mxu1 %v5169_v34 }
 0x6f2   : > { %4848 = vmatpush3.bf16.msra.mxu0 %v5154_v62  ;;  %v5171_v62 = vld [vmem:[%s6530_s7 + $0x90] sm:$0xff]  }
 0x6f3   : > { %4849 = vmatprep.subr.bf16.mxu0 %v5155_v2 }
 0x6f6   : > { %4850 = vmatpush3.bf16.msra.mxu0 %v5155_v2  ;;  %v5173_v2 = vld [vmem:[%s6530_s7 + $0xa0] sm:$0xff]  }
 0x6f7   : > { %4851 = vmatprep.subr.bf16.mxu0 %v5156_v3 }
 0x6fa   : > { %4852 = vmatpush3.bf16.msra.mxu0 %v5156_v3  ;;  %v5174_v3 = vld [vmem:[%s6530_s7 + $0xa8] sm:$0xff]  }
 0x6fb   : > { %4853 = vmatprep.subr.bf16.mxu0 %v5157_v54 }
 0x6fe   : > { %4854 = vmatpush3.bf16.msra.mxu0 %v5157_v54  ;;  %v5175_v54 = vld [vmem:[%s6530_s7 + $0xb0] sm:$0xff]  }
 0x6ff   : > { %4855 = vmatprep.subr.bf16.mxu0 %v5158_v46 }
 0x702   : > { %4856 = vmatpush3.bf16.msra.mxu0 %v5158_v46  ;;  %v5176_v46 = vld [vmem:[%s6530_s7 + $0xb8] sm:$0xff]  }
 0x703   : > { %4857 = vmatprep.subr.bf16.mxu0 %v5160_v4 }
 0x706   : > { %4858 = vmatpush3.bf16.msra.mxu0 %v5160_v4  ;;  %v2121_v4 = vld [vmem:[%s6027_s29 + $0x10] sm:$0xff] }
 0x707   : > { %4859 = vmatprep.subr.bf16.mxu0 %v5162_v16 }
 0x70a   : > { %4860 = vmatpush3.bf16.msra.mxu0 %v5162_v16 }
 0x70b   : > { %4909 = vmatprep.subr.bf16.mxu0 %v5377_v1 }
 0x70d   : > { %4862 = vmatmul.mubr.bf16.vlgmr.msra.gmra.mrb[36].mxu0 %v2131_v11  ;;  %v4378_v11 = vld [vmem:[%s6531_s8 + $0x2] ss:$0 sm:$0xff] }
 0x70e   : > { %4913 = vmatprep.mubr.msk.bf16.mxu0 %vm5378_vm0, %v5377_v1 }
 0x7c0   : > { %v2065_v10 = vpop.f32.mrb[32].mxu0 }
 0x7c1   : > { %v2066_v50 = vadd.f32 %v4317_v48, %v2065_v10  ;;  %v4823_v52 = vpop.f32.mrb[33].mxu0 }
 0x7c2   : > { %v2068_v53 = vpop.f32.mrb[34].mxu0  ;;  %v2119_v52 = vld [vmem:[%s6027_s29] sm:$0xff] }
 0x7c3   : > { %v2069_v49 = vadd.f32 %v4317_v48, %v2068_v53  ;;  %v4824_v47 = vpop.f32.mrb[35].mxu0  ;;  %v2072_v56 = vadd.f32 %v5365_v55, %v2066_v50  ;;  %v2120_v53 = vld [vmem:[%s6027_s29 + $0x8] sm:$0xff] }
 0x7c4   : > { %v5368_v55 = vld [vmem:[%s5537_s22 + $0x8] sm:$0xff] }
 0x7c5   : > { %2076 = vadd.xlane.f32.xlu0 %v2072_v56  ;;  %v2073_v58 = vadd.f32 %v5366_v57, %v2069_v49  ;;  %v5367_v49 = vld [vmem:[%s5537_s22] sm:$0xff]  ;;  %v2132_v57 = vpack.c.bf16 %v2120_v53, %v2119_v52 }
 0x7c7   : > { %2078 = vadd.xlane.f32.xlu1 %v2073_v58 }
 0x852   : > { %v2077_v6 = vpop.xlane.xlu0 %2076 }
 0x853   : > { %v2081_v7 = vmul.f32 0.0078125, %v2077_v6  ;;  %v2122_v6 = vld [vmem:[%s6027_s29 + $0x18] sm:$0xff] }
 0x854   : > { %v2079_v9 = vpop.xlane.xlu1 %2078 }
 0x855   : > { %v5960_v60 = vsub.f32 %v2072_v56, %v2081_v7  ;;  %v2082_v59 = vmul.f32 0.0078125, %v2079_v9  ;;  %v2133_v7 = vpack.c.bf16 %v2122_v6, %v2121_v4  ;;  %v4353_v9 = vld [vmem:[%s6531_s8 + $0x1] ss:$0 sm:$0xff] }
 0x857   : > { %v5962_v12 = vsub.f32 %v2073_v58, %v2082_v59  ;;  %v2085_v13 = vmul.f32 %v5960_v60, %v5960_v60 }
 0x859   : > { %2087 = vadd.xlane.f32.xlu0 %v2085_v13  ;;  %v2086_v15 = vmul.f32 %v5962_v12, %v5962_v12 }
 0x85d   : > { %2089 = vadd.xlane.f32.xlu0 %v2086_v15 }
 0x8e6   : > { %v2088_v35 = vpop.xlane.xlu0 %2087 }
 0x8e7   : > { %v2091_v36 = vmul.f32 0.0078125, %v2088_v35 }
 0x8e9   : > { %v2093_v42 = vadd.f32 1e-05, %v2091_v36 }
 0x8ea   : > { %v2090_v31 = vpop.xlane.xlu0 %2089 }
 0x8eb   : > { %5289 = vrsqrt.f32 %v2093_v42  ;;  %v2092_v39 = vmul.f32 0.0078125, %v2090_v31 }
 0x8ed   : > { %v2094_v37 = vadd.f32 1e-05, %v2092_v39 }
 0x8ef   : > { %5291 = vrsqrt.f32 %v2094_v37 }
 0x8f5   : > { %v5290_v38 = vpop.eup %5289 }
 0x8f6   : > { %v2097_v40 = vmul.f32 %v5290_v38, %v5960_v60  ;;  %v4863_v60 = vpop.f32.mrb[36].mxu0 }
 0x8f7   : > { %v2357_v59 = vadd.f32 %v4863_v60, %v4353_v9 }
 0x8f8   : > { %v2103_v41 = vmul.f32 %v4326_v17, %v2097_v40 }
 0x8f9   : > { %v5292_v43 = vpop.eup %5291 }
 0x8fa   : > { %v2098_v45 = vmul.f32 %v5292_v43, %v5962_v12  ;;  %v6029_v10 = vadd.f32 %v4327_v44, %v2103_v41  ;;  %v2348_v12 = vpop.f32.mrb[37].mxu0 }
 0x8fb   : > { %v2349_v13 = vadd.f32 %v4353_v9, %v2348_v12  ;;  %v4864_v15 = vpop.f32.mrb[38].mxu0 }
 0x8fc   : > { %v2104_v48 = vmul.f32 %v4326_v17, %v2098_v45  ;;  %v2123_v47 = vadd.f32 %v5367_v49, %v6029_v10  ;;  %v2360_v16 = vadd.f32 %v4864_v15, %v4353_v9  ;;  %v2351_v18 = vpop.f32.mrb[39].mxu0 }
 0x8fd   : > { %v2352_v19 = vadd.f32 %v4353_v9, %v2351_v18 }
 0x8fe   : > { %v6031_v50 = vadd.f32 %v4327_v44, %v2104_v48  ;;  %v6068_v0 = vpack.c.bf16 %v2360_v16, %v2357_v59 }
 0x8ff   : > { %v6070_v51 = vpack.c.bf16 %v2352_v19, %v2349_v13 }
 0x900   : > { %v2124_v56 = vadd.f32 %v5368_v55, %v6031_v50  ;;  %v2494_v22 = vsel %vm919_vm1, %v6068_v0, 0 }
 0x901   : > { %v2491_v21 = vsel %vm919_vm1, %v6070_v51, 0 }
 0x902   : > { %v2125_v58 = vpack.c.bf16 %v2124_v56, %v2123_v47 }
 0x904   : > { %4842 = vmatmul.mubr.bf16.vlgmr.msra.gmra.mrb[44].mxu1 %v2125_v58 }
 0x905   : > { %4866 = vmatpush3.bf16.msra.mxu1 %v5169_v34  ;;  %4881 = vmatprep.mubr.bf16.mxu1 %v2132_v57 }
 0x906   : > { %4867 = vmatprep.subr.bf16.mxu1 %v5170_v61 }
 0x909   : > { %4868 = vmatpush3.bf16.msra.mxu1 %v5170_v61 }
 0x90a   : > { %4869 = vmatprep.subr.bf16.mxu1 %v5171_v62 }
 0x90d   : > { %4870 = vmatpush3.bf16.msra.mxu1 %v5171_v62 }
 0x90e   : > { %4871 = vmatprep.subr.bf16.mxu1 %v5172_v63 }
 0x911   : > { %4872 = vmatpush3.bf16.msra.mxu1 %v5172_v63 }
 0x912   : > { %4873 = vmatprep.subr.bf16.mxu1 %v5173_v2 }
 0x915   : > { %4874 = vmatpush3.bf16.msra.mxu1 %v5173_v2 }
 0x916   : > { %4875 = vmatprep.subr.bf16.mxu1 %v5174_v3 }
 0x919   : > { %4876 = vmatpush3.bf16.msra.mxu1 %v5174_v3 }
 0x91a   : > { %4877 = vmatprep.subr.bf16.mxu1 %v5175_v54 }
 0x91d   : > { %4878 = vmatpush3.bf16.msra.mxu1 %v5175_v54 }
 0x91e   : > { %4879 = vmatprep.subr.bf16.mxu1 %v5176_v46 }
 0x921   : > { %4880 = vmatpush3.bf16.msra.mxu1 %v5176_v46 }
 0x922   : > { %4885 = vmatprep.subr.bf16.mxu1 %v5377_v1 }
 0x924   : > { %4882 = vmatmul.mubr.bf16.vlgmr.msra.gmra.mrb[48].mxu1 %v2133_v7 }
 0x925   : > { %4889 = vmatprep.mubr.msk.bf16.mxu1 %vm5378_vm0, %v5377_v1 }
 0x92a   : > { %4886 = vmatpush3.bf16.xpose.msra.mxu1 %v2491_v21 }
 0x92b   : > { %4887 = vmatprep.subr.bf16.mxu1 %v5377_v1 }
 0x932   : > { %4888 = vmatpush3.bf16.xpose.msra.mxu1 %v2494_v22 }
 0x933   : > { %4893 = vmatprep.subr.bf16.mxu1 %v5377_v1 }
 0x9d7   : > { %v2237_v24 = vpop.f32.mrb[44].mxu1 }
 0x9d8   : > { %v4843_v25 = vpop.f32.mrb[45].mxu1  ;;  %v2238_v26 = vadd.f32 %v4328_v23, %v2237_v24 }
 0x9d9   : > { %v2240_v8 = vpop.f32.mrb[46].mxu1 }
 0x9da   : > { %v2241_v5 = vadd.f32 %v4328_v23, %v2240_v8  ;;  %v4844_v27 = vpop.f32.mrb[47].mxu1 }
 0x9dc   : > { %v6081_v29 = vpack.c.bf16 %v2241_v5, %v2238_v26 }
 0x9de   : > { %4890 = vmatmul.mubr.msk.bf16.vlgmr.msra.gmra.mrb[52].mxu1 %vm919_vm1, %v6081_v29 }
 0x9df   : > { %4897 = vmatprep.mubr.msk.bf16.mxu1 %vm5378_vm0, %v5377_v1 }
 0x9f7   : > { %v4883_v30 = vpop.f32.mrb[48].mxu1 }
 0x9f8   : > { %v2476_v14 = vadd.f32 %v4883_v30, %v4378_v11  ;;  %v2467_v28 = vpop.f32.mrb[49].mxu1 }
 0x9f9   : > { %v2468_v20 = vadd.f32 %v4378_v11, %v2467_v28  ;;  %v4884_v32 = vpop.f32.mrb[50].mxu1 }
 0x9fa   : > { %v2479_v33 = vadd.f32 %v4884_v32, %v4378_v11  ;;  %v2470_v34 = vpop.f32.mrb[51].mxu1 }
 0x9fb   : > { %v2471_v35 = vadd.f32 %v4378_v11, %v2470_v34 }
 0x9fc   : > { %v6090_v36 = vpack.c.bf16 %v2479_v33, %v2476_v14 }
 0x9fd   : > { %v6092_v42 = vpack.c.bf16 %v2471_v35, %v2468_v20 }
 0x9ff   : > { %4894 = vmatpush3.bf16.msra.mxu1 %v6092_v42 }
 0xa00   : > { %4895 = vmatprep.subr.bf16.mxu1 %v5377_v1 }
 0xa03   : > { %4896 = vmatpush3.bf16.msra.mxu1 %v6090_v36 }
 0xa04   : > { %4901 = vmatprep.subr.bf16.mxu1 %v5377_v1 }
 0xab1   : > { %v2530_v31 = vpop.f32.mrb[52].mxu1 }
 0xab2   : > { %v4891_v39 = vpop.f32.mrb[53].mxu1  ;;  %v2537_v37 = vsel %vm1942_vm2, %v2530_v31, -inf }
 0xab3   : > { %2538 = vmax.xlane.f32.xlu0 %v2537_v37  ;;  %v2533_v38 = vpop.f32.mrb[54].mxu1 }
 0xab4   : > { %v4892_v17 = vpop.f32.mrb[55].mxu1  ;;  %v2540_v40 = vsel %vm1942_vm2, %v2533_v38, -inf }
 0xab5   : > { %2541 = vmax.xlane.f32.xlu1 %v2540_v40 }
 0xb40   : > { %v2539_v41 = vpop.xlane.xlu0 %2538 }
 0xb41   : > { %v2543_v43 = vsub.f32 %v2530_v31, %v2539_v41 }
 0xb42   : > { %v2542_v44 = vpop.xlane.xlu1 %2541 }
 0xb43   : > { %v2545_v45 = vmul.f32 1.442695, %v2543_v43  ;;  %v2544_v48 = vsub.f32 %v2533_v38, %v2542_v44 }
 0xb45   : > { %5293 = vpow2.f32 %v2545_v45  ;;  %v2547_v52 = vmul.f32 1.442695, %v2544_v48 }
 0xb47   : > { %5295 = vpow2.f32 %v2547_v52 }
 0xb4f   : > { %v5294_v53 = vpop.eup %5293 }
 0xb50   : > { %v2549_v49 = vsel %vm1942_vm2, %v5294_v53, 0.0 }
 0xb51   : > { %v5296_v47 = vpop.eup %5295  ;;  %2550 = vadd.xlane.f32.xlu0 %v2549_v49 }
 0xb52   : > { %v2552_v55 = vsel %vm1942_vm2, %v5296_v47, 0.0 }
 0xb53   : > { %2553 = vadd.xlane.f32.xlu1 %v2552_v55 }
 0xb64   : > { %2611 = vrot.lane.b32.xlu1 %v6068_v0, %s6551_s23 }
 0xb67   : > { %2609 = vrot.lane.b32.xlu0 %v6070_v51, %s6551_s23 }
 0xb68   : > { %2605 = vrot.lane.b32.xlu1 %v6081_v29, %s6551_s23 }
 0xbde   : > { %v2551_v56 = vpop.xlane.xlu0 %2550 }
 0xbdf   : > { %5297 = vrcp.f32 %v2551_v56 }
 0xbe0   : > { %v2554_v57 = vpop.xlane.xlu1 %2553 }
 0xbe1   : > { %5299 = vrcp.f32 %v2554_v57 }
 0xbe2   : > { %v2610_v2 = vpop.permute.xlu0 %2609 }
 0xbe3   : > { %v2617_v54 = vsel %vm919_vm1, %v2610_v2, 0 }
 0xbe4   : > { %v2612_v46 = vpop.permute.xlu1 %2611 }
 0xbe5   : > { %v2620_v4 = vsel %vm919_vm1, %v2612_v46, 0 }
 0xbe8   : > { %v2606_v6 = vpop.permute.xlu1 %2605 }
 0xbe9   : > { %v5298_v58 = vpop.eup %5297 }
 0xbea   : > { %v2557_v62 = vmul.f32 %v5298_v58, %v5294_v53 }
 0xbeb   : > { %v5300_v61 = vpop.eup %5299 }
 0xbec   : > { %v2558_v63 = vmul.f32 %v5300_v61, %v5296_v47 }
 0xbee   : > { %v2559_v3 = vpack.c.bf16 %v2558_v63, %v2557_v62 }
 0xbf0   : > { %4898 = vmatmul.mubr.msk.bf16.vlgmr.msra.gmra.mrb[56].mxu1 %vm1942_vm2, %v2559_v3 }
 0xbf1   : > { %4902 = vmatpush3.bf16.xpose.msra.mxu1 %v2617_v54  ;;  %4905 = vmatprep.mubr.msk.bf16.mxu1 %vm5378_vm0, %v5377_v1 }
 0xbf2   : > { %4903 = vmatprep.subr.bf16.mxu1 %v5377_v1 }
 0xbf9   : > { %4904 = vmatpush3.bf16.xpose.msra.mxu1 %v2620_v4 }
 0xbfa   : > { %4925 = vmatprep.subr.bf16.mxu1 %v5377_v1 }
 0xc00   : > { %4906 = vmatmul.mubr.msk.bf16.vlgmr.msra.gmra.mrb[60].mxu1 %vm919_vm1, %v2606_v6 }
 0xc01   : > { %4929 = vmatprep.mubr.msk.bf16.mxu1 %vm5378_vm0, %v5377_v1 }
 0xcc3   : > { %v6118_v7 = vpop.f32.mrb[56].mxu1 }
 0xcc4   : > { %v4899_v9 = vpop.f32.mrb[57].mxu1 }
 0xcc5   : > { %v6120_v60 = vpop.f32.mrb[58].mxu1 }
 0xcc6   : > { %v4900_v59 = vpop.f32.mrb[59].mxu1 }
 0xcd3   : > { %v2656_v12 = vpop.f32.mrb[60].mxu1 }
 0xcd4   : > { %v4907_v13 = vpop.f32.mrb[61].mxu1  ;;  %v2663_v15 = vsel %vm1942_vm2, %v2656_v12, -inf }
 0xcd5   : > { %2664 = vmax.xlane.f32.xlu1 %v2663_v15  ;;  %v2659_v16 = vpop.f32.mrb[62].mxu1 }
 0xcd6   : > { %v4908_v18 = vpop.f32.mrb[63].mxu1  ;;  %v2666_v19 = vsel %vm1942_vm2, %v2659_v16, -inf }
 0xcd7   : > { %2667 = vmax.xlane.f32.xlu0 %v2666_v19 }
 0xce6   : > { %2688 = vrot.lane.b32.xlu1 %v6092_v42, %s6551_s23 }
 0xcea   : > { %2740 = vrot.lane.b32.xlu1 %v6070_v51, %s5385_s20 }
 0xcee   : > { %2742 = vrot.lane.b32.xlu1 %v6068_v0, %s5385_s20 }
 0xcf2   : > { %2738 = vrot.lane.b32.xlu1 %v6081_v29, %s5385_s20 }
 0xd62   : > { %v2665_v21 = vpop.xlane.xlu1 %2664 }
 0xd63   : > { %v2669_v22 = vsub.f32 %v2656_v12, %v2665_v21 }
 0xd64   : > { %v2668_v23 = vpop.xlane.xlu0 %2667 }
 0xd65   : > { %v2671_v24 = vmul.f32 1.442695, %v2669_v22  ;;  %v2670_v25 = vsub.f32 %v2659_v16, %v2668_v23 }
 0xd66   : > { %v2689_v8 = vpop.permute.xlu1 %2688 }
 0xd67   : > { %5301 = vpow2.f32 %v2671_v24  ;;  %v2673_v26 = vmul.f32 1.442695, %v2670_v25  ;;  %4910 = vmatpush3.bf16.msra.mxu0 %v2689_v8 }
 0xd68   : > { %4911 = vmatprep.subr.bf16.mxu0 %v5377_v1 }
 0xd69   : > { %5303 = vpow2.f32 %v2673_v26 }
 0xd6a   : > { %v2741_v31 = vpop.permute.xlu1 %2740 }
 0xd6b   : > { %v2748_v37 = vsel %vm919_vm1, %v2741_v31, 0 }
 0xd6e   : > { %v2743_v38 = vpop.permute.xlu1 %2742 }
 0xd6f   : > { %v2751_v17 = vsel %vm919_vm1, %v2743_v38, 0 }
 0xd71   : > { %v5302_v5 = vpop.eup %5301 }
 0xd72   : > { %v2675_v27 = vsel %vm1942_vm2, %v5302_v5, 0.0  ;;  %v2739_v40 = vpop.permute.xlu1 %2738 }
 0xd73   : > { %v5304_v11 = vpop.eup %5303  ;;  %2676 = vadd.xlane.f32.xlu0 %v2675_v27 }
 0xd74   : > { %v2678_v30 = vsel %vm1942_vm2, %v5304_v11, 0.0 }
 0xd77   : > { %2679 = vadd.xlane.f32.xlu0 %v2678_v30 }
 0xd8d   : > { %2690 = vrot.lane.b32.xlu0 %v6090_v36, %s6551_s23 }
 0xe00   : > { %v2677_v14 = vpop.xlane.xlu0 %2676 }
 0xe01   : > { %5305 = vrcp.f32 %v2677_v14 }
 0xe04   : > { %v2680_v28 = vpop.xlane.xlu0 %2679 }
 0xe05   : > { %5307 = vrcp.f32 %v2680_v28 }
 0xe08   : > { %v2691_v20 = vpop.permute.xlu0 %2690 }
 0xe09   : > { %4912 = vmatpush3.bf16.msra.mxu0 %v2691_v20 }
 0xe0a   : > { %4917 = vmatprep.subr.bf16.mxu0 %v5377_v1 }
 0xe0b   : > { %v5306_v32 = vpop.eup %5305 }
 0xe0c   : > { %v2683_v34 = vmul.f32 %v5306_v32, %v5302_v5 }
 0xe0f   : > { %v5308_v33 = vpop.eup %5307 }
 0xe10   : > { %v2684_v35 = vmul.f32 %v5308_v33, %v5304_v11 }
 0xe12   : > { %v2685_v39 = vpack.c.bf16 %v2684_v35, %v2683_v34 }
 0xe14   : > { %4914 = vmatmul.mubr.msk.bf16.vlgmr.msra.gmra.mrb[40].mxu0 %vm1942_vm2, %v2685_v39 }
 0xe15   : > { %4918 = vmatpush3.bf16.xpose.msra.mxu0 %v2748_v37  ;;  %4921 = vmatprep.mubr.msk.bf16.mxu0 %vm5378_vm0, %v5377_v1 }
 0xe16   : > { %4919 = vmatprep.subr.bf16.mxu0 %v5377_v1 }
 0xe1d   : > { %4920 = vmatpush3.bf16.xpose.msra.mxu0 %v2751_v17 }
 0xe1e   : > { %4941 = vmatprep.subr.bf16.mxu0 %v5377_v1 }
 0xe24   : > { %4922 = vmatmul.mubr.msk.bf16.vlgmr.msra.gmra.mrb[44].mxu0 %vm919_vm1, %v2739_v40 }
 0xe25   : > { %4945 = vmatprep.mubr.msk.bf16.mxu0 %vm5378_vm0, %v5377_v1 }
 0xee7   : > { %v6148_v41 = vpop.f32.mrb[40].mxu0 }
 0xee8   : > { %v4915_v43 = vpop.f32.mrb[41].mxu0 }
 0xee9   : > { %v6150_v44 = vpop.f32.mrb[42].mxu0 }
 0xeea   : > { %v5086_v45 = vpack.i.bf16 %v6150_v44, %v6148_v41  ;;  %v4916_v48 = vpop.f32.mrb[43].mxu0 }
 0xef7   : > { %v2787_v52 = vpop.f32.mrb[44].mxu0 }
 0xef8   : > { %v4923_v53 = vpop.f32.mrb[45].mxu0  ;;  %v2794_v49 = vsel %vm1942_vm2, %v2787_v52, -inf }
 0xef9   : > { %2795 = vmax.xlane.f32.xlu0 %v2794_v49  ;;  %v2790_v47 = vpop.f32.mrb[46].mxu0 }
 0xefa   : > { %v4924_v55 = vpop.f32.mrb[47].mxu0  ;;  %v2797_v56 = vsel %vm1942_vm2, %v2790_v47, -inf }
 0xefb   : > { %2798 = vmax.xlane.f32.xlu1 %v2797_v56 }
 0xf0c   : > { %2819 = vrot.lane.b32.xlu1 %v6090_v36, %s5385_s20 }
 0xf10   : > { %2869 = vrot.lane.b32.xlu1 %v6070_v51, %s6552_s27 }
 0xf14   : > { %2871 = vrot.lane.b32.xlu1 %v6068_v0, %s6552_s27 }
 0xf86   : > { %v2796_v57 = vpop.xlane.xlu0 %2795 }
 0xf87   : > { %v2800_v58 = vsub.f32 %v2787_v52, %v2796_v57 }
 0xf88   : > { %v2799_v61 = vpop.xlane.xlu1 %2798 }
 0xf89   : > { %v2802_v62 = vmul.f32 1.442695, %v2800_v58  ;;  %v2801_v63 = vsub.f32 %v2790_v47, %v2799_v61 }
 0xf8b   : > { %5309 = vpow2.f32 %v2802_v62  ;;  %v2804_v2 = vmul.f32 1.442695, %v2801_v63 }
 0xf8c   : > { %v2820_v12 = vpop.permute.xlu1 %2819 }
 0xf8d   : > { %5311 = vpow2.f32 %v2804_v2 }
 0xf90   : > { %v2870_v19 = vpop.permute.xlu1 %2869 }
 0xf91   : > { %v2877_v22 = vsel %vm919_vm1, %v2870_v19, 0 }
 0xf94   : > { %v2872_v23 = vpop.permute.xlu1 %2871 }
 0xf95   : > { %v5310_v3 = vpop.eup %5309  ;;  %v2880_v24 = vsel %vm919_vm1, %v2872_v23, 0 }
 0xf96   : > { %v2806_v54 = vsel %vm1942_vm2, %v5310_v3, 0.0 }
 0xf97   : > { %v5312_v46 = vpop.eup %5311  ;;  %2807 = vadd.xlane.f32.xlu0 %v2806_v54 }
 0xf98   : > { %v2809_v4 = vsel %vm1942_vm2, %v5312_v46, 0.0 }
 0xf9b   : > { %2810 = vadd.xlane.f32.xlu0 %v2809_v4 }
 0xfb1   : > { %2817 = vrot.lane.b32.xlu0 %v6092_v42, %s5385_s20 }
 0xfb5   : > { %2867 = vrot.lane.b32.xlu0 %v6081_v29, %s6552_s27 }
0x1024   : > { %v2808_v6 = vpop.xlane.xlu0 %2807 }
0x1025   : > { %5313 = vrcp.f32 %v2808_v6 }
0x1028   : > { %v2811_v9 = vpop.xlane.xlu0 %2810 }
0x1029   : > { %5315 = vrcp.f32 %v2811_v9 }
0x102c   : > { %v2818_v59 = vpop.permute.xlu0 %2817 }
0x102d   : > { %4926 = vmatpush3.bf16.msra.mxu1 %v2818_v59 }
0x102e   : > { %4927 = vmatprep.subr.bf16.mxu1 %v5377_v1 }
0x102f   : > { %v5314_v13 = vpop.eup %5313 }
0x1030   : > { %v2814_v16 = vmul.f32 %v5314_v13, %v5310_v3  ;;  %v2868_v25 = vpop.permute.xlu0 %2867 }
0x1031   : > { %4928 = vmatpush3.bf16.msra.mxu1 %v2820_v12 }
0x1032   : > { %4933 = vmatprep.subr.bf16.mxu1 %v5377_v1 }
0x1033   : > { %v5316_v15 = vpop.eup %5315 }
0x1034   : > { %v2815_v18 = vmul.f32 %v5316_v15, %v5312_v46 }
0x1036   : > { %v2816_v21 = vpack.c.bf16 %v2815_v18, %v2814_v16 }
0x1038   : > { %4930 = vmatmul.mubr.msk.bf16.vlgmr.msra.gmra.mrb[64].mxu1 %vm1942_vm2, %v2816_v21 }
0x1039   : > { %4937 = vmatprep.mubr.msk.bf16.mxu1 %vm5378_vm0, %v5377_v1 }
0x103a   : > { %4934 = vmatpush3.bf16.xpose.msra.mxu1 %v2877_v22 }
0x103b   : > { %4935 = vmatprep.subr.bf16.mxu1 %v5377_v1 }
0x1042   : > { %4936 = vmatpush3.bf16.xpose.msra.mxu1 %v2880_v24 }
0x1043   : > { %4957 = vmatprep.subr.bf16.mxu1 %v5377_v1 }
0x1049   : > { %4938 = vmatmul.mubr.msk.bf16.vlgmr.msra.gmra.mrb[68].mxu1 %vm919_vm1, %v2868_v25 }
0x104a   : > { %4961 = vmatprep.mubr.msk.bf16.mxu1 %vm5378_vm0, %v5377_v1 }
0x110b   : > { %v6180_v8 = vpop.f32.mrb[64].mxu1 }
0x110c   : > { %v4931_v26 = vpop.f32.mrb[65].mxu1 }
0x110d   : > { %v6182_v5 = vpop.f32.mrb[66].mxu1 }
0x110e   : > { %v5091_v27 = vpack.i.bf16 %v6182_v5, %v6180_v8  ;;  %v4932_v11 = vpop.f32.mrb[67].mxu1 }
0x111c   : > { %v2916_v30 = vpop.f32.mrb[68].mxu1 }
0x111d   : > { %v4939_v14 = vpop.f32.mrb[69].mxu1  ;;  %v2923_v28 = vsel %vm1942_vm2, %v2916_v30, -inf }
0x111e   : > { %2924 = vmax.xlane.f32.xlu1 %v2923_v28  ;;  %v2919_v20 = vpop.f32.mrb[70].mxu1 }
0x111f   : > { %v4940_v32 = vpop.f32.mrb[71].mxu1  ;;  %v2926_v33 = vsel %vm1942_vm2, %v2919_v20, -inf }
0x1120   : > { %2927 = vmax.xlane.f32.xlu0 %v2926_v33 }
0x112f   : > { %2946 = vrot.lane.b32.xlu1 %v6092_v42, %s6552_s27 }
0x1133   : > { %2998 = vrot.lane.b32.xlu1 %v6070_v51, %s6553_s16 }
0x1137   : > { %3000 = vrot.lane.b32.xlu1 %v6068_v0, %s6553_s16 }
0x113b   : > { %2996 = vrot.lane.b32.xlu1 %v6081_v29, %s6553_s16 }
0x11ab   : > { %v2925_v34 = vpop.xlane.xlu1 %2924 }
0x11ac   : > { %v2929_v35 = vsub.f32 %v2916_v30, %v2925_v34 }
0x11ad   : > { %v2928_v31 = vpop.xlane.xlu0 %2927 }
0x11ae   : > { %v2931_v39 = vmul.f32 1.442695, %v2929_v35  ;;  %v2930_v37 = vsub.f32 %v2919_v20, %v2928_v31 }
0x11af   : > { %v2947_v38 = vpop.permute.xlu1 %2946 }
0x11b0   : > { %5317 = vpow2.f32 %v2931_v39  ;;  %v2933_v17 = vmul.f32 1.442695, %v2930_v37  ;;  %4942 = vmatpush3.bf16.msra.mxu0 %v2947_v38 }
0x11b1   : > { %4943 = vmatprep.subr.bf16.mxu0 %v5377_v1 }
0x11b2   : > { %5319 = vpow2.f32 %v2933_v17 }
0x11b3   : > { %v2999_v61 = vpop.permute.xlu1 %2998 }
0x11b4   : > { %v3006_v63 = vsel %vm919_vm1, %v2999_v61, 0 }
0x11b7   : > { %v3001_v2 = vpop.permute.xlu1 %3000 }
0x11b8   : > { %v3009_v3 = vsel %vm919_vm1, %v3001_v2, 0 }
0x11ba   : > { %v5318_v40 = vpop.eup %5317 }
0x11bb   : > { %v2935_v43 = vsel %vm1942_vm2, %v5318_v40, 0.0  ;;  %v2997_v54 = vpop.permute.xlu1 %2996 }
0x11bc   : > { %v5320_v48 = vpop.eup %5319  ;;  %2936 = vadd.xlane.f32.xlu0 %v2935_v43 }
0x11bd   : > { %v2938_v52 = vsel %vm1942_vm2, %v5320_v48, 0.0 }
0x11c0   : > { %2939 = vadd.xlane.f32.xlu0 %v2938_v52 }
0x11d6   : > { %2948 = vrot.lane.b32.xlu0 %v6090_v36, %s6552_s27 }
0x1249   : > { %v2937_v53 = vpop.xlane.xlu0 %2936 }
0x124a   : > { %5321 = vrcp.f32 %v2937_v53 }
0x124d   : > { %v2940_v49 = vpop.xlane.xlu0 %2939 }
0x124e   : > { %5323 = vrcp.f32 %v2940_v49 }
0x1251   : > { %v2949_v47 = vpop.permute.xlu0 %2948 }
0x1252   : > { %4944 = vmatpush3.bf16.msra.mxu0 %v2949_v47 }
0x1253   : > { %4949 = vmatprep.subr.bf16.mxu0 %v5377_v1 }
0x1254   : > { %v5322_v55 = vpop.eup %5321 }
0x1255   : > { %v2943_v57 = vmul.f32 %v5322_v55, %v5318_v40 }
0x1258   : > { %v5324_v56 = vpop.eup %5323 }
0x1259   : > { %v2944_v58 = vmul.f32 %v5324_v56, %v5320_v48 }
0x125b   : > { %v2945_v62 = vpack.c.bf16 %v2944_v58, %v2943_v57 }
0x125d   : > { %4946 = vmatmul.mubr.msk.bf16.vlgmr.msra.gmra.mrb[48].mxu0 %vm1942_vm2, %v2945_v62 }
0x125e   : > { %4950 = vmatpush3.bf16.xpose.msra.mxu0 %v3006_v63  ;;  %4953 = vmatprep.mubr.msk.bf16.mxu0 %vm5378_vm0, %v5377_v1 }
0x125f   : > { %4951 = vmatprep.subr.bf16.mxu0 %v5377_v1 }
0x1266   : > { %4952 = vmatpush3.bf16.xpose.msra.mxu0 %v3009_v3 }
0x1267   : > { %4973 = vmatprep.subr.bf16.mxu0 %v5377_v1 }
0x126d   : > { %4954 = vmatmul.mubr.msk.bf16.vlgmr.msra.gmra.mrb[52].mxu0 %vm919_vm1, %v2997_v54 }
0x126e   : > { %4977 = vmatprep.mubr.msk.bf16.mxu0 %vm5378_vm0, %v5377_v1 }
0x1330   : > { %v6212_v46 = vpop.f32.mrb[48].mxu0 }
0x1331   : > { %v4947_v4 = vpop.f32.mrb[49].mxu0 }
0x1332   : > { %v6214_v6 = vpop.f32.mrb[50].mxu0 }
0x1333   : > { %v5096_v9 = vpack.i.bf16 %v6214_v6, %v6212_v46  ;;  %v4948_v59 = vpop.f32.mrb[51].mxu0 }
0x1340   : > { %v3045_v12 = vpop.f32.mrb[52].mxu0 }
0x1341   : > { %v4955_v13 = vpop.f32.mrb[53].mxu0  ;;  %v3052_v15 = vsel %vm1942_vm2, %v3045_v12, -inf }
0x1342   : > { %3053 = vmax.xlane.f32.xlu0 %v3052_v15  ;;  %v3048_v16 = vpop.f32.mrb[54].mxu0 }
0x1343   : > { %v4956_v18 = vpop.f32.mrb[55].mxu0  ;;  %v3055_v19 = vsel %vm1942_vm2, %v3048_v16, -inf }
0x1344   : > { %3056 = vmax.xlane.f32.xlu1 %v3055_v19 }
0x1355   : > { %3077 = vrot.lane.b32.xlu1 %v6090_v36, %s6553_s16 }
0x1359   : > { %3127 = vrot.lane.b32.xlu1 %v6070_v51, %s6554_s21 }
0x135d   : > { %3129 = vrot.lane.b32.xlu1 %v6068_v0, %s6554_s21 }
0x13cf   : > { %v3054_v21 = vpop.xlane.xlu0 %3053 }
0x13d0   : > { %v3058_v22 = vsub.f32 %v3045_v12, %v3054_v21 }
0x13d1   : > { %v3057_v23 = vpop.xlane.xlu1 %3056 }
0x13d2   : > { %v3060_v24 = vmul.f32 1.442695, %v3058_v22  ;;  %v3059_v25 = vsub.f32 %v3048_v16, %v3057_v23 }
0x13d4   : > { %5325 = vpow2.f32 %v3060_v24  ;;  %v3062_v26 = vmul.f32 1.442695, %v3059_v25 }
0x13d5   : > { %v3078_v34 = vpop.permute.xlu1 %3077 }
0x13d6   : > { %5327 = vpow2.f32 %v3062_v26 }
0x13d9   : > { %v3128_v38 = vpop.permute.xlu1 %3127 }
0x13da   : > { %v3135_v40 = vsel %vm919_vm1, %v3128_v38, 0 }
0x13dd   : > { %v3130_v43 = vpop.permute.xlu1 %3129 }
0x13de   : > { %v5326_v11 = vpop.eup %5325  ;;  %v3138_v48 = vsel %vm919_vm1, %v3130_v43, 0 }
0x13df   : > { %v3064_v30 = vsel %vm1942_vm2, %v5326_v11, 0.0 }
0x13e0   : > { %v5328_v14 = vpop.eup %5327  ;;  %3065 = vadd.xlane.f32.xlu0 %v3064_v30 }
0x13e1   : > { %v3067_v28 = vsel %vm1942_vm2, %v5328_v14, 0.0 }
0x13e4   : > { %3068 = vadd.xlane.f32.xlu0 %v3067_v28 }
0x13fa   : > { %3075 = vrot.lane.b32.xlu0 %v6092_v42, %s6553_s16 }
0x13fe   : > { %3125 = vrot.lane.b32.xlu0 %v6081_v29, %s6554_s21 }
0x146d   : > { %v3066_v20 = vpop.xlane.xlu0 %3065 }
0x146e   : > { %5329 = vrcp.f32 %v3066_v20 }
0x1471   : > { %v3069_v32 = vpop.xlane.xlu0 %3068 }
0x1472   : > { %5331 = vrcp.f32 %v3069_v32 }
0x1475   : > { %v3076_v33 = vpop.permute.xlu0 %3075 }
0x1476   : > { %4958 = vmatpush3.bf16.msra.mxu1 %v3076_v33 }
0x1477   : > { %4959 = vmatprep.subr.bf16.mxu1 %v5377_v1 }
0x1478   : > { %v5330_v35 = vpop.eup %5329 }
0x1479   : > { %v3072_v39 = vmul.f32 %v5330_v35, %v5326_v11  ;;  %v3126_v52 = vpop.permute.xlu0 %3125 }
0x147a   : > { %4960 = vmatpush3.bf16.msra.mxu1 %v3078_v34 }
0x147b   : > { %4965 = vmatprep.subr.bf16.mxu1 %v5377_v1 }
0x147c   : > { %v5332_v31 = vpop.eup %5331 }
0x147d   : > { %v3073_v37 = vmul.f32 %v5332_v31, %v5328_v14 }
0x147f   : > { %v3074_v17 = vpack.c.bf16 %v3073_v37, %v3072_v39 }
0x1481   : > { %4962 = vmatmul.mubr.msk.bf16.vlgmr.msra.gmra.mrb[72].mxu1 %vm1942_vm2, %v3074_v17 }
0x1482   : > { %4969 = vmatprep.mubr.msk.bf16.mxu1 %vm5378_vm0, %v5377_v1 }
0x1483   : > { %4966 = vmatpush3.bf16.xpose.msra.mxu1 %v3135_v40 }
0x1484   : > { %4967 = vmatprep.subr.bf16.mxu1 %v5377_v1 }
0x148b   : > { %4968 = vmatpush3.bf16.xpose.msra.mxu1 %v3138_v48 }
0x148c   : > { %4989 = vmatprep.subr.bf16.mxu1 %v5377_v1 }
0x1492   : > { %4970 = vmatmul.mubr.msk.bf16.vlgmr.msra.gmra.mrb[76].mxu1 %vm919_vm1, %v3126_v52 }
0x1493   : > { %4993 = vmatprep.mubr.msk.bf16.mxu1 %vm5378_vm0, %v5377_v1 }
0x1554   : > { %v6244_v53 = vpop.f32.mrb[72].mxu1 }
0x1555   : > { %v4963_v49 = vpop.f32.mrb[73].mxu1 }
0x1556   : > { %v6246_v47 = vpop.f32.mrb[74].mxu1 }
0x1557   : > { %v5101_v55 = vpack.i.bf16 %v6246_v47, %v6244_v53  ;;  %v4964_v56 = vpop.f32.mrb[75].mxu1  ;;  %v5177_v53 = vld [vmem:[%s6530_s7 + $0xc0] sm:$0xff]   ;;  %v5178_v47 = vld [vmem:[%s6530_s7 + $0xc8] sm:$0xff]  }
0x1565   : > { %v3174_v57 = vpop.f32.mrb[76].mxu1 }
0x1566   : > { %v4971_v58 = vpop.f32.mrb[77].mxu1  ;;  %v3181_v61 = vsel %vm1942_vm2, %v3174_v57, -inf }
0x1567   : > { %3182 = vmax.xlane.f32.xlu1 %v3181_v61  ;;  %v3177_v62 = vpop.f32.mrb[78].mxu1 }
0x1568   : > { %v4972_v63 = vpop.f32.mrb[79].mxu1  ;;  %v3184_v2 = vsel %vm1942_vm2, %v3177_v62, -inf }
0x1569   : > { %3185 = vmax.xlane.f32.xlu0 %v3184_v2 }
0x1578   : > { %3204 = vrot.lane.b32.xlu1 %v6092_v42, %s6554_s21 }
0x157c   : > { %3256 = vrot.lane.b32.xlu1 %v6070_v51, %s6555_s24 }
0x1580   : > { %3258 = vrot.lane.b32.xlu1 %v6068_v0, %s6555_s24 }
0x1584   : > { %3254 = vrot.lane.b32.xlu1 %v6081_v29, %s6555_s24 }
0x15f4   : > { %v3183_v3 = vpop.xlane.xlu1 %3182 }
0x15f5   : > { %v3187_v54 = vsub.f32 %v3174_v57, %v3183_v3 }
0x15f6   : > { %v3186_v4 = vpop.xlane.xlu0 %3185 }
0x15f7   : > { %v3189_v59 = vmul.f32 1.442695, %v3187_v54  ;;  %v3188_v12 = vsub.f32 %v3177_v62, %v3186_v4 }
0x15f8   : > { %v3205_v13 = vpop.permute.xlu1 %3204 }
0x15f9   : > { %5333 = vpow2.f32 %v3189_v59  ;;  %v3191_v15 = vmul.f32 1.442695, %v3188_v12  ;;  %4974 = vmatpush3.bf16.msra.mxu0 %v3205_v13 }
0x15fa   : > { %4975 = vmatprep.subr.bf16.mxu0 %v5377_v1 }
0x15fb   : > { %5335 = vpow2.f32 %v3191_v15 }
0x15fc   : > { %v3257_v14 = vpop.permute.xlu1 %3256 }
0x15fd   : > { %v3264_v20 = vsel %vm919_vm1, %v3257_v14, 0 }
0x1600   : > { %v3259_v32 = vpop.permute.xlu1 %3258 }
0x1601   : > { %v3267_v33 = vsel %vm919_vm1, %v3259_v32, 0 }
0x1603   : > { %v5334_v16 = vpop.eup %5333 }
0x1604   : > { %v3193_v18 = vsel %vm1942_vm2, %v5334_v16, 0.0  ;;  %v3255_v34 = vpop.permute.xlu1 %3254 }
0x1605   : > { %v5336_v19 = vpop.eup %5335  ;;  %3194 = vadd.xlane.f32.xlu0 %v3193_v18 }
0x1606   : > { %v3196_v21 = vsel %vm1942_vm2, %v5336_v19, 0.0 }
0x1609   : > { %3197 = vadd.xlane.f32.xlu0 %v3196_v21 }
0x161f   : > { %3206 = vrot.lane.b32.xlu0 %v6090_v36, %s6554_s21 }
0x1692   : > { %v3195_v22 = vpop.xlane.xlu0 %3194 }
0x1693   : > { %5337 = vrcp.f32 %v3195_v22 }
0x1696   : > { %v3198_v23 = vpop.xlane.xlu0 %3197 }
0x1697   : > { %5339 = vrcp.f32 %v3198_v23 }
0x169a   : > { %v3207_v24 = vpop.permute.xlu0 %3206 }
0x169b   : > { %4976 = vmatpush3.bf16.msra.mxu0 %v3207_v24 }
0x169c   : > { %4981 = vmatprep.subr.bf16.mxu0 %v5377_v1 }
0x169d   : > { %v5338_v25 = vpop.eup %5337 }
0x169e   : > { %v3201_v11 = vmul.f32 %v5338_v25, %v5334_v16 }
0x16a1   : > { %v5340_v26 = vpop.eup %5339 }
0x16a2   : > { %v3202_v30 = vmul.f32 %v5340_v26, %v5336_v19 }
0x16a4   : > { %v3203_v28 = vpack.c.bf16 %v3202_v30, %v3201_v11 }
0x16a6   : > { %4978 = vmatmul.mubr.msk.bf16.vlgmr.msra.gmra.mrb[56].mxu0 %vm1942_vm2, %v3203_v28 }
0x16a7   : > { %4982 = vmatpush3.bf16.xpose.msra.mxu0 %v3264_v20  ;;  %4985 = vmatprep.mubr.msk.bf16.mxu0 %vm5378_vm0, %v5377_v1 }
0x16a8   : > { %4983 = vmatprep.subr.bf16.mxu0 %v5377_v1 }
0x16af   : > { %4984 = vmatpush3.bf16.xpose.msra.mxu0 %v3267_v33 }
0x16b0   : > { %5005 = vmatprep.subr.bf16.mxu0 %v5377_v1 }
0x16b6   : > { %4986 = vmatmul.mubr.msk.bf16.vlgmr.msra.gmra.mrb[60].mxu0 %vm919_vm1, %v3255_v34 }
0x16b7   : > { %5009 = vmatprep.mubr.msk.bf16.mxu0 %vm5378_vm0, %v5377_v1 }
0x1779   : > { %v6276_v35 = vpop.f32.mrb[56].mxu0 }
0x177a   : > { %v4979_v31 = vpop.f32.mrb[57].mxu0 }
0x177b   : > { %v6278_v39 = vpop.f32.mrb[58].mxu0 }
0x177c   : > { %v5106_v37 = vpack.i.bf16 %v6278_v39, %v6276_v35  ;;  %v4980_v38 = vpop.f32.mrb[59].mxu0 }
0x1789   : > { %v3303_v17 = vpop.f32.mrb[60].mxu0 }
0x178a   : > { %v4987_v40 = vpop.f32.mrb[61].mxu0  ;;  %v3310_v43 = vsel %vm1942_vm2, %v3303_v17, -inf }
0x178b   : > { %3311 = vmax.xlane.f32.xlu0 %v3310_v43  ;;  %v3306_v48 = vpop.f32.mrb[62].mxu0 }
0x178c   : > { %v4988_v52 = vpop.f32.mrb[63].mxu0  ;;  %v3313_v49 = vsel %vm1942_vm2, %v3306_v48, -inf }
0x178d   : > { %3314 = vmax.xlane.f32.xlu1 %v3313_v49  ;;  %v5180_v52 = vld [vmem:[%s6530_s7 + $0xd8] sm:$0xff]   ;;  %v5181_v49 = vld [vmem:[%s6530_s7 + $0xe0] sm:$0xff]  }
0x179e   : > { %3335 = vrot.lane.b32.xlu1 %v6090_v36, %s6555_s24 }
0x17a2   : > { %3385 = vrot.lane.b32.xlu1 %v6070_v51, %s6556_s26 }
0x17a6   : > { %3387 = vrot.lane.b32.xlu1 %v6068_v0, %s6556_s26 }
0x1818   : > { %v3312_v56 = vpop.xlane.xlu0 %3311 }
0x1819   : > { %v3316_v57 = vsub.f32 %v3303_v17, %v3312_v56  ;;  %v5182_v56 = vld [vmem:[%s6530_s7 + $0xe8] sm:$0xff]  }
0x181a   : > { %v3315_v58 = vpop.xlane.xlu1 %3314 }
0x181b   : > { %v3318_v61 = vmul.f32 1.442695, %v3316_v57  ;;  %v3317_v62 = vsub.f32 %v3306_v48, %v3315_v58  ;;  %v5183_v57 = vld [vmem:[%s6530_s7 + $0xf0] sm:$0xff]   ;;  %v5184_v58 = vld [vmem:[%s6530_s7 + $0xf8] sm:$0xff]  }
0x181d   : > { %5341 = vpow2.f32 %v3318_v61  ;;  %v3320_v63 = vmul.f32 1.442695, %v3317_v62 }
0x181e   : > { %v3336_v12 = vpop.permute.xlu1 %3335 }
0x181f   : > { %5343 = vpow2.f32 %v3320_v63 }
0x1822   : > { %v3386_v19 = vpop.permute.xlu1 %3385 }
0x1826   : > { %v3388_v22 = vpop.permute.xlu1 %3387 }
0x1827   : > { %v5342_v2 = vpop.eup %5341  ;;  %v3396_v23 = vsel %vm919_vm1, %v3388_v22, 0 }
0x1828   : > { %v3322_v3 = vsel %vm1942_vm2, %v5342_v2, 0.0 }
0x1829   : > { %v5344_v54 = vpop.eup %5343  ;;  %3323 = vadd.xlane.f32.xlu0 %v3322_v3 }
0x182a   : > { %v3325_v4 = vsel %vm1942_vm2, %v5344_v54, 0.0 }
0x182d   : > { %3326 = vadd.xlane.f32.xlu0 %v3325_v4 }
0x1843   : > { %3333 = vrot.lane.b32.xlu0 %v6092_v42, %s6555_s24 }
0x1847   : > { %3383 = vrot.lane.b32.xlu0 %v6081_v29, %s6556_s26  ;;  %v3393_v29 = vsel %vm919_vm1, %v3386_v19, 0 }
0x18b6   : > { %v3324_v0 = vpop.xlane.xlu0 %3323 }
0x18b7   : > { %5345 = vrcp.f32 %v3324_v0 }
0x18ba   : > { %v3327_v51 = vpop.xlane.xlu0 %3326 }
0x18bb   : > { %5347 = vrcp.f32 %v3327_v51 }
0x18be   : > { %v3334_v59 = vpop.permute.xlu0 %3333 }
0x18bf   : > { %4990 = vmatpush3.bf16.msra.mxu1 %v3334_v59 }
0x18c0   : > { %4991 = vmatprep.subr.bf16.mxu1 %v5377_v1 }
0x18c1   : > { %v5346_v13 = vpop.eup %5345 }
0x18c2   : > { %v3330_v16 = vmul.f32 %v5346_v13, %v5342_v2  ;;  %v3384_v24 = vpop.permute.xlu0 %3383 }
0x18c3   : > { %4992 = vmatpush3.bf16.msra.mxu1 %v3336_v12 }
0x18c4   : > { %4997 = vmatprep.subr.bf16.mxu1 %v5377_v1 }
0x18c5   : > { %v5348_v15 = vpop.eup %5347 }
0x18c6   : > { %v3331_v18 = vmul.f32 %v5348_v15, %v5344_v54 }
0x18c8   : > { %v3332_v21 = vpack.c.bf16 %v3331_v18, %v3330_v16 }
0x18ca   : > { %4994 = vmatmul.mubr.msk.bf16.vlgmr.msra.gmra.mrb[80].mxu1 %vm1942_vm2, %v3332_v21 }
0x18cb   : > { %5001 = vmatprep.mubr.msk.bf16.mxu1 %vm5378_vm0, %v5377_v1 }
0x18cc   : > { %4998 = vmatpush3.bf16.xpose.msra.mxu1 %v3393_v29 }
0x18cd   : > { %4999 = vmatprep.subr.bf16.mxu1 %v5377_v1 }
0x18d4   : > { %5000 = vmatpush3.bf16.xpose.msra.mxu1 %v3396_v23 }
0x18db   : > { %5002 = vmatmul.mubr.msk.bf16.vlgmr.msra.gmra.mrb[84].mxu1 %vm919_vm1, %v3384_v24 }
0x199d   : > { %v3376_v25 = vpop.f32.mrb[80].mxu1 }
0x199e   : > { %v4995_v26 = vpop.f32.mrb[81].mxu1 }
0x199f   : > { %v3379_v11 = vpop.f32.mrb[82].mxu1 }
0x19a0   : > { %v5111_v30 = vpack.i.bf16 %v3379_v11, %v3376_v25  ;;  %v4996_v14 = vpop.f32.mrb[83].mxu1 }
0x19ae   : > { %v3432_v28 = vpop.f32.mrb[84].mxu1 }
0x19af   : > { %v5003_v20 = vpop.f32.mrb[85].mxu1  ;;  %v3439_v32 = vsel %vm1942_vm2, %v3432_v28, -inf }
0x19b0   : > { %3440 = vmax.xlane.f32.xlu1 %v3439_v32  ;;  %v3435_v33 = vpop.f32.mrb[86].mxu1 }
0x19b1   : > { %v5004_v34 = vpop.f32.mrb[87].mxu1  ;;  %v3442_v31 = vsel %vm1942_vm2, %v3435_v33, -inf }
0x19b2   : > { %3443 = vmax.xlane.f32.xlu0 %v3442_v31 }
0x19c1   : > { %3462 = vrot.lane.b32.xlu1 %v6092_v42, %s6556_s26 }
0x19c5   : > { %5087 = vrot.lane.b32.xlu1 %v5086_v45, %s6556_s26 }
0x19c9   : > { %5092 = vrot.lane.b32.xlu1 %v5091_v27, %s6555_s24 }
0x19cd   : > { %5097 = vrot.lane.b32.xlu1 %v5096_v9, %s6554_s21 }
0x19d1   : > { %5107 = vrot.lane.b32.xlu1 %v5106_v37, %s6552_s27 }
0x1a3d   : > { %v3441_v42 = vpop.xlane.xlu1 %3440 }
0x1a3e   : > { %v3445_v38 = vsub.f32 %v3432_v28, %v3441_v42 }
0x1a3f   : > { %v3444_v17 = vpop.xlane.xlu0 %3443 }
0x1a40   : > { %v3447_v41 = vmul.f32 1.442695, %v3445_v38  ;;  %v3446_v44 = vsub.f32 %v3435_v33, %v3444_v17 }
0x1a41   : > { %v3463_v45 = vpop.permute.xlu1 %3462 }
0x1a42   : > { %5349 = vpow2.f32 %v3447_v41  ;;  %v3449_v40 = vmul.f32 1.442695, %v3446_v44  ;;  %5006 = vmatpush3.bf16.msra.mxu0 %v3463_v45 }
0x1a43   : > { %5007 = vmatprep.subr.bf16.mxu0 %v5377_v1 }
0x1a44   : > { %5351 = vpow2.f32 %v3449_v40  ;;  %v4419_v40 = vld [vmem:[%s6531_s8 + $0x3] ss:$0 sm:$0xff] }
0x1a45   : > { %v5088_v54 = vpop.permute.xlu1 %5087 }
0x1a46   : > { %v5090_v59 = vunpack.i.h.bf16 %v5088_v54  ;;  %v5089_v12 = vunpack.i.l.bf16 %v5088_v54  ;;  %v5200_v54 = vld [vmem:[%s6532_s9 + $0x50] ss:$8 sps:$4 sm:$0xff]  }
0x1a48   : > { %v3569_v21 = vsel %vm919_vm1, %v6120_v60, %v5090_v59  ;;  %v3568_v29 = vsel %vm919_vm1, %v6118_v7, %v5089_v12  ;;  %v5206_v59 = vld [vmem:[%s6532_s9 + $0x70] ss:$8 sps:$4 sm:$0xff]   ;;  %v5386_v12 = vmov 0  }
0x1a49   : > { %v5093_v4 = vpop.permute.xlu1 %5092  ;;  %3873 = vmatprep.mubr.bf16.mxu1 %v5386_v12 }
0x1a4a   : > { %v5095_v13 = vunpack.i.h.bf16 %v5093_v4 }
0x1a4c   : > { %v5350_v8 = vpop.eup %5349  ;;  %v3571_v24 = vsel %vm1942_vm2, %v3569_v21, %v5095_v13  ;;  %v5209_v13 = vld [vmem:[%s6534_s11 + $0x40] sm:$0xff]   ;;  %v5215_v21 = vld [vmem:[%s6534_s11 + $0x58] sm:$0xff]  }
0x1a4d   : > { %v3451_v5 = vsel %vm1942_vm2, %v5350_v8, 0.0  ;;  %v5098_v51 = vpop.permute.xlu1 %5097 }
0x1a4e   : > { %v5352_v27 = vpop.eup %5351  ;;  %3452 = vadd.xlane.f32.xlu0 %v3451_v5  ;;  %v5100_v15 = vunpack.i.h.bf16 %v5098_v51  ;;  %v5099_v16 = vunpack.i.l.bf16 %v5098_v51  ;;  %v5208_v51 = vld [vmem:[%s6532_s9 + $0x74] ss:$8 sps:$4 sm:$0xff]  }
0x1a4f   : > { %v3454_v46 = vsel %vm1942_vm2, %v5352_v27, 0.0 }
0x1a50   : > { %v3573_v11 = vsel %vm1945_vm3, %v3571_v24, %v5100_v15  ;;  %v5211_v15 = vld [vmem:[%s6534_s11 + $0x48] sm:$0xff]  }
0x1a51   : > { %v5108_v25 = vpop.permute.xlu1 %5107  ;;  %v5219_v24 = vld [vmem:[%s6534_s11 + $0x68] sm:$0xff]  }
0x1a52   : > { %3455 = vadd.xlane.f32.xlu0 %v3454_v46  ;;  %v5110_v60 = vunpack.i.h.bf16 %v5108_v25  ;;  %v5109_v32 = vunpack.i.l.bf16 %v5108_v25 }
0x1a68   : > { %3464 = vrot.lane.b32.xlu0 %v6090_v36, %s6556_s26 }
0x1a6c   : > { %5102 = vrot.lane.b32.xlu0 %v5101_v55, %s6553_s16  ;;  %v5179_v55 = vld [vmem:[%s6530_s7 + $0xd0] sm:$0xff]  }
0x1a70   : > { %5112 = vrot.lane.b32.xlu0 %v5111_v30, %s5385_s20 }
0x1adb   : > { %v3453_v6 = vpop.xlane.xlu0 %3452 }
0x1adc   : > { %5353 = vrcp.f32 %v3453_v6 }
0x1adf   : > { %v3456_v9 = vpop.xlane.xlu0 %3455 }
0x1ae0   : > { %5355 = vrcp.f32 %v3456_v9 }
0x1ae3   : > { %v3465_v35 = vpop.permute.xlu0 %3464 }
0x1ae4   : > { %5008 = vmatpush3.bf16.msra.mxu0 %v3465_v35 }
0x1ae5   : > { %5013 = vmatprep.subr.bf16.mxu0 %v5377_v1 }
0x1ae6   : > { %v5354_v39 = vpop.eup %5353 }
0x1ae7   : > { %v3459_v43 = vmul.f32 %v5354_v39, %v5350_v8  ;;  %v5103_v0 = vpop.permute.xlu0 %5102 }
0x1ae8   : > { %v5105_v18 = vunpack.i.h.bf16 %v5103_v0  ;;  %v5104_v19 = vunpack.i.l.bf16 %v5103_v0  ;;  %v5203_v0 = vld [vmem:[%s6532_s9 + $0x60] ss:$8 sps:$4 sm:$0xff]  }
0x1aea   : > { %v5356_v37 = vpop.eup %5355  ;;  %v3575_v30 = vsel %vm1948_vm4, %v3573_v11, %v5105_v18  ;;  %v5213_v18 = vld [vmem:[%s6534_s11 + $0x50] sm:$0xff]  }
0x1aeb   : > { %v3460_v48 = vmul.f32 %v5356_v37, %v5352_v27  ;;  %v5113_v22 = vpop.permute.xlu0 %5112  ;;  %v3577_v34 = vsel %vm1951_vm5, %v3575_v30, %v5110_v60  ;;  %v5185_v37 = vld [vmem:[%s6532_s9] ss:$8 sps:$4 sm:$0xff]  }
0x1aec   : > { %v5115_v28 = vunpack.i.h.bf16 %v5113_v22  ;;  %v5114_v20 = vunpack.i.l.bf16 %v5113_v22  ;;  %v5217_v22 = vld [vmem:[%s6534_s11 + $0x60] sm:$0xff]  }
0x1aed   : > { %v3461_v36 = vpack.c.bf16 %v3460_v48, %v3459_v43  ;;  %v5187_v43 = vld [vmem:[%s6532_s9 + $0x4] ss:$8 sps:$4 sm:$0xff]   ;;  %v5190_v48 = vld [vmem:[%s6532_s9 + $0x14] ss:$8 sps:$4 sm:$0xff]  }
0x1aee   : > { %v3579_v17 = vsel %vm1954_vm6, %v3577_v34, %v5115_v28  ;;  %3841 = vmatprep.subr.bf16.mxu1 %v5187_v43 }
0x1aef   : > { %5010 = vmatmul.mubr.msk.bf16.vlgmr.msra.gmra.mrb[64].mxu0 %vm1942_vm2, %v3461_v36  ;;  %3842 = vmatpush1.bf16.msra.mxu1 %v5185_v37 }
0x1af0   : > { %5029 = vmatprep.mubr.msk.bf16.mxu0 %vm5378_vm0, %v5377_v1  ;;  %5014 = vmatpush3.bf16.msra.mxu0 %v5177_v53 }
0x1af1   : > { %5015 = vmatprep.subr.bf16.mxu0 %v5377_v1  ;;  %3843 = vmatprep.subr.bf16.mxu1 %v5190_v48 }
0x1af4   : > { %5016 = vmatpush3.bf16.msra.mxu0 %v5178_v47 }
0x1af5   : > { %5017 = vmatprep.subr.bf16.mxu0 %v5377_v1 }
0x1af8   : > { %5018 = vmatpush3.bf16.msra.mxu0 %v5179_v55 }
0x1af9   : > { %5019 = vmatprep.subr.bf16.mxu0 %v5377_v1 }
0x1afc   : > { %5020 = vmatpush3.bf16.msra.mxu0 %v5180_v52 }
0x1afd   : > { %5021 = vmatprep.subr.bf16.mxu0 %v5377_v1 }
0x1b00   : > { %5022 = vmatpush3.bf16.msra.mxu0 %v5181_v49 }
0x1b01   : > { %5023 = vmatprep.subr.bf16.mxu0 %v5377_v1 }
0x1b04   : > { %5024 = vmatpush3.bf16.msra.mxu0 %v5182_v56 }
0x1b05   : > { %5025 = vmatprep.subr.bf16.mxu0 %v5377_v1 }
0x1b08   : > { %5026 = vmatpush3.bf16.msra.mxu0 %v5183_v57  ;;  %v5193_v57 = vld [vmem:[%s6532_s9 + $0x24] ss:$8 sps:$4 sm:$0xff]  }
0x1b09   : > { %5027 = vmatprep.subr.bf16.mxu0 %v5377_v1  ;;  %v5094_v1 = vunpack.i.l.bf16 %v5093_v4  ;;  %v5205_v4 = vld [vmem:[%s6532_s9 + $0x64] ss:$8 sps:$4 sm:$0xff]  }
0x1b0b   : > { %v3570_v23 = vsel %vm1942_vm2, %v3568_v29, %v5094_v1  ;;  %v5210_v1 = vld [vmem:[%s6534_s11] sm:$0xff]   ;;  %v5216_v29 = vld [vmem:[%s6534_s11 + $0x18] sm:$0xff]  }
0x1b0c   : > { %5028 = vmatpush3.bf16.msra.mxu0 %v5184_v58  ;;  %v3572_v26 = vsel %vm1945_vm3, %v3570_v23, %v5099_v16  ;;  %v5191_v58 = vld [vmem:[%s6532_s9 + $0x20] ss:$8 sps:$4 sm:$0xff]  }
0x1b0d   : > { %v3574_v14 = vsel %vm1948_vm4, %v3572_v26, %v5104_v19  ;;  %4627 = vmatprep.subr.bf16.mxu0 %v5209_v13  ;;  %v5212_v16 = vld [vmem:[%s6534_s11 + $0x8] sm:$0xff]   ;;  %v5214_v19 = vld [vmem:[%s6534_s11 + $0x10] sm:$0xff]   ;;  %v5218_v23 = vld [vmem:[%s6534_s11 + $0x20] sm:$0xff]  }
0x1b0e   : > { %v3576_v7 = vsel %vm1951_vm5, %v3574_v14, %v5109_v32  ;;  %v4428_v32 = vld [vmem:[%s6536_s13 + $0x1] ss:$0 sm:$0xff] }
0x1b0f   : > { %v3578_v38 = vsel %vm1954_vm6, %v3576_v7, %v5114_v20 }
0x1bc2   : > { %v3505_v61 = vpop.f32.mrb[64].mxu0 }
0x1bc3   : > { %v5011_v62 = vpop.f32.mrb[65].mxu0 }
0x1bc4   : > { %v3508_v63 = vpop.f32.mrb[66].mxu0  ;;  %v5194_v62 = vld [vmem:[%s6532_s9 + $0x30] ss:$8 sps:$4 sm:$0xff]  }
0x1bc5   : > { %v5116_v2 = vpack.i.bf16 %v3508_v63, %v3505_v61  ;;  %v5012_v3 = vpop.f32.mrb[67].mxu0  ;;  %v5196_v61 = vld [vmem:[%s6532_s9 + $0x34] ss:$8 sps:$4 sm:$0xff]   ;;  %v5199_v63 = vld [vmem:[%s6532_s9 + $0x44] ss:$8 sps:$4 sm:$0xff]  }
0x1bc6   : > { %v5202_v3 = vld [vmem:[%s6532_s9 + $0x54] ss:$8 sps:$4 sm:$0xff]  }
0x1bc7   : > { %5117 = vrot.lane.b32.xlu1 %v5116_v2, %s6551_s23  ;;  %v5197_v2 = vld [vmem:[%s6532_s9 + $0x40] ss:$8 sps:$4 sm:$0xff]  }
0x1c39   : > { %v5118_v33 = vpop.permute.xlu1 %5117 }
0x1c3a   : > { %v5120_v31 = vunpack.i.h.bf16 %v5118_v33  ;;  %v5119_v42 = vunpack.i.l.bf16 %v5118_v33 }
0x1c3c   : > { %v3580_v41 = vsel %vm1957_vm7, %v3578_v38, %v5119_v42  ;;  %v3581_v44 = vsel %vm1957_vm7, %v3579_v17, %v5120_v31  ;;  %v4429_v31 = vld [vmem:[%s6537_s14 + $0x1] ss:$0 sm:$0xff] }
0x1c3d   : > { %v3582_v45 = vpack.c.bf16 %v3581_v44, %v3580_v41  ;;  %v5220_v44 = vld [vmem:[%s6534_s11 + $0x28] sm:$0xff]  }
0x1c3f   : > { %5030 = vmatmul.mubr.bf16.vlgmr.msra.gmra.mrb[68].mxu0 %v3582_v45  ;;  %v5221_v45 = vld [vmem:[%s6534_s11 + $0x70] sm:$0xff]  }
0x1c40   : > { %4628 = vmatpush3.bf16.msra.mxu0 %v5210_v1 }
0x1c41   : > { %4629 = vmatprep.subr.bf16.mxu0 %v5211_v15 }
0x1c44   : > { %4630 = vmatpush3.bf16.msra.mxu0 %v5212_v16 }
0x1c45   : > { %4631 = vmatprep.subr.bf16.mxu0 %v5213_v18 }
0x1c48   : > { %4632 = vmatpush3.bf16.msra.mxu0 %v5214_v19 }
0x1c49   : > { %4633 = vmatprep.subr.bf16.mxu0 %v5215_v21 }
0x1c4c   : > { %4634 = vmatpush3.bf16.msra.mxu0 %v5216_v29 }
0x1c4d   : > { %4635 = vmatprep.subr.bf16.mxu0 %v5217_v22 }
0x1c50   : > { %4636 = vmatpush3.bf16.msra.mxu0 %v5218_v23 }
0x1c51   : > { %4637 = vmatprep.subr.bf16.mxu0 %v5219_v24 }
0x1c54   : > { %4638 = vmatpush3.bf16.msra.mxu0 %v5220_v44 }
0x1c55   : > { %4639 = vmatprep.subr.bf16.mxu0 %v5221_v45 }
0x1d12   : > { %v3687_v8 = vpop.f32.mrb[68].mxu0 }
0x1d13   : > { %v3688_v5 = vadd.f32 %v4419_v40, %v3687_v8  ;;  %v5031_v27 = vpop.f32.mrb[69].mxu0  ;;  %v5223_v8 = vld [vmem:[%s6534_s11 + $0x78] sm:$0xff]  }
0x1d14   : > { %v3690_v46 = vpop.f32.mrb[70].mxu0  ;;  %v3751_v27 = vlaneseq }
0x1d15   : > { %v3694_v6 = vadd.f32 %v3688_v5, %v6029_v10  ;;  %v3691_v9 = vadd.f32 %v4419_v40, %v3690_v46  ;;  %v5032_v35 = vpop.f32.mrb[71].mxu0  ;;  %v5188_v10 = vld [vmem:[%s6532_s9 + $0x10] ss:$8 sps:$4 sm:$0xff]  }
0x1d16   : > { %3844 = vmatpush1.bf16.msra.mxu1 %v5188_v10  ;;  %v5222_v40 = vld [vmem:[%s6534_s11 + $0x30] sm:$0xff]   ;;  %v5224_v5 = vld [vmem:[%s6534_s11 + $0x38] sm:$0xff]   ;;  %v3752_v46 = vshrl.u32 %v3751_v27, 7 }
0x1d17   : > { %v3695_v39 = vadd.f32 %v3691_v9, %v6031_v50  ;;  %3698 = vadd.xlane.f32.xlu0 %v3694_v6  ;;  %3845 = vmatprep.subr.bf16.mxu1 %v5193_v57  ;;  %v3749_v9 = vld [vmem:[%s6533_s10] sm:$0x3] }
0x1d18   : > { %4640 = vmatpush3.bf16.msra.mxu0 %v5222_v40  ;;  %v3757_v35 = vsub.s32 1, %v3752_v46 }
0x1d19   : > { %3700 = vadd.xlane.f32.xlu1 %v3695_v39  ;;  %4641 = vmatprep.subr.bf16.mxu0 %v5223_v8 }
0x1d1a   : > { %3846 = vmatpush1.bf16.msra.mxu1 %v5191_v58  ;;  %v3758_v37 = vrot.slane %v3749_v9, %v3757_v35 }
0x1d1b   : > { %3847 = vmatprep.subr.bf16.mxu1 %v5196_v61 }
0x1d1c   : > { %4642 = vmatpush3.bf16.msra.mxu0 %v5224_v5 }
0x1d1e   : > { %3848 = vmatpush1.bf16.msra.mxu1 %v5194_v62 }
0x1d1f   : > { %3849 = vmatprep.subr.bf16.mxu1 %v5199_v63  ;;  %v4446_v63 = vld [vmem:[%s6535_s12] ss:$0 sm:$0xff] }
0x1d22   : > { %3850 = vmatpush1.bf16.msra.mxu1 %v5197_v2 }
0x1d23   : > { %3851 = vmatprep.subr.bf16.mxu1 %v5202_v3 }
0x1d26   : > { %3852 = vmatpush1.bf16.msra.mxu1 %v5200_v54 }
0x1d27   : > { %3853 = vmatprep.subr.bf16.mxu1 %v5205_v4 }
0x1d2a   : > { %3854 = vmatpush1.bf16.msra.mxu1 %v5203_v0 }
0x1d2b   : > { %3855 = vmatprep.subr.bf16.mxu1 %v5208_v51 }
0x1d2e   : > { %3856 = vmatpush1.bf16.msra.mxu1 %v5206_v59 }
0x1da4   : > { %v3699_v50 = vpop.xlane.xlu0 %3698 }
0x1da5   : > { %v3702_v36 = vmul.f32 0.0078125, %v3699_v50 }
0x1da6   : > { %v3701_v53 = vpop.xlane.xlu1 %3700 }
0x1da7   : > { %v6404_v47 = vsub.f32 %v3694_v6, %v3702_v36  ;;  %v3703_v55 = vmul.f32 0.0078125, %v3701_v53  ;;  %v3753_v6 = vsub.s32 0, %v3752_v46 }
0x1da9   : > { %v6406_v52 = vsub.f32 %v3695_v39, %v3703_v55  ;;  %v3706_v49 = vmul.f32 %v6404_v47, %v6404_v47  ;;  %v3754_v39 = vrot.slane %v3749_v9, %v3753_v6 }
0x1dab   : > { %3708 = vadd.xlane.f32.xlu0 %v3706_v49  ;;  %v3707_v56 = vmul.f32 %v6406_v52, %v6406_v52 }
0x1daf   : > { %3710 = vadd.xlane.f32.xlu0 %v3707_v56 }
0x1e38   : > { %v3709_v25 = vpop.xlane.xlu0 %3708 }
0x1e39   : > { %v3712_v26 = vmul.f32 0.0078125, %v3709_v25 }
0x1e3b   : > { %v3714_v11 = vadd.f32 1e-05, %v3712_v26 }
0x1e3c   : > { %v3711_v30 = vpop.xlane.xlu0 %3710 }
0x1e3d   : > { %5357 = vrsqrt.f32 %v3714_v11  ;;  %v3713_v14 = vmul.f32 0.0078125, %v3711_v30 }
0x1e3f   : > { %v3715_v28 = vadd.f32 1e-05, %v3713_v14 }
0x1e41   : > { %5359 = vrsqrt.f32 %v3715_v28  ;;  %v4463_v28 = vld [vmem:[%s6536_s13 + $0x2] ss:$0 sm:$0xff] }
0x1e47   : > { %v5358_v20 = vpop.eup %5357 }
0x1e48   : > { %v3718_v60 = vmul.f32 %v5358_v20, %v6404_v47 }
0x1e4a   : > { %v3724_v34 = vmul.f32 %v4428_v32, %v3718_v60 }
0x1e4b   : > { %v5360_v33 = vpop.eup %5359 }
0x1e4c   : > { %v3719_v7 = vmul.f32 %v5360_v33, %v6406_v52  ;;  %v3730_v38 = vadd.f32 %v4429_v31, %v3724_v34 }
0x1e4e   : > { %v3725_v42 = vmul.f32 %v4428_v32, %v3719_v7  ;;  %v4464_v32 = vld [vmem:[%s6537_s14 + $0x2] ss:$0 sm:$0xff] }
0x1e50   : > { %v3731_v17 = vadd.f32 %v4429_v31, %v3725_v42 }
0x1e52   : > { %v3732_v41 = vpack.c.bf16 %v3731_v17, %v3730_v38 }
0x1e54   : > { %3874 = vmatmul.mubr.bf16.vlgmr.msra.gmra.mrb[88].mxu1 %v3732_v41 }
0x1f27   : > { %v3875_v43 = vpop.f32.mrb[88].mxu1 }
0x1f28   : > { %v3876_v48 = vadd.f32 %v3875_v43, %v3754_v39  ;;  %v3877_v10 = vpop.f32.mrb[89].mxu1 }
0x1f29   : > { %v3878_v50 = vadd.f32 %v3877_v10, %v3758_v37  ;;  %v3879_v36 = vpop.f32.mrb[90].mxu1 }
0x1f2a   : > { %v3880_v53 = vadd.f32 %v3879_v36, %v3754_v39  ;;  %v3881_v47 = vpop.f32.mrb[91].mxu1  ;;  %v3884_v52 = vmax.f32 %v3876_v48, 0.0 }
0x1f2b   : > { %v3882_v55 = vadd.f32 %v3881_v47, %v3758_v37  ;;  %v3885_v56 = vmax.f32 %v3878_v50, 0.0 }
0x1f2c   : > { %v3886_v49 = vmax.f32 %v3880_v53, 0.0 }
0x1f2d   : > { %v3887_v57 = vmax.f32 %v3882_v55, 0.0 }
0x1f2e   : > { %v3888_v58 = vpack.c.bf16 %v3886_v49, %v3884_v52 }
0x1f2f   : > { %v3889_v61 = vpack.c.bf16 %v3887_v57, %v3885_v56 }
0x1f31   : > { %4057 = vmatprep.mubr.bf16.mxu0 %v3889_v61 }
0x1f32   : > { %4058 = vmatmul.mubr.bf16.vlgmr.msra.gmra.mrb[72].mxu0 %v3888_v58 }
0x2005   : > { %v4643_v62 = vpop.f32.mrb[72].mxu0 }
0x2006   : > { %v4644_v2 = vpop.f32.mrb[73].mxu0 }
0x2007   : > { %v4645_v3 = vadd.f32 %v4644_v2, %v4643_v62  ;;  %v4646_v54 = vpop.f32.mrb[74].mxu0 }
0x2008   : > { %v4647_v4 = vpop.f32.mrb[75].mxu0 }
0x2009   : > { %v4060_v0 = vadd.f32 %v4645_v3, %v4446_v63  ;;  %v4648_v51 = vadd.f32 %v4647_v4, %v4646_v54 }
0x200b   : > { %v4063_v59 = vadd.f32 %v4648_v51, %v4446_v63  ;;  %v4066_v12 = vadd.f32 %v4060_v0, %v3730_v38 }
0x200d   : > { %4070 = vadd.xlane.f32.xlu0 %v4066_v12  ;;  %v4067_v13 = vadd.f32 %v4063_v59, %v3731_v17 }
0x200f   : > { %4072 = vadd.xlane.f32.xlu1 %v4067_v13 }
0x209a   : > { %v4071_v1 = vpop.xlane.xlu0 %4070 }
0x209b   : > { %v4074_v15 = vmul.f32 0.0078125, %v4071_v1 }
0x209c   : > { %v4073_v16 = vpop.xlane.xlu1 %4072 }
0x209d   : > { %v4076_v18 = vsub.f32 %v4066_v12, %v4074_v15  ;;  %v4075_v19 = vmul.f32 0.0078125, %v4073_v16 }
0x209f   : > { %v4077_v21 = vsub.f32 %v4067_v13, %v4075_v19  ;;  %v4078_v29 = vmul.f32 %v4076_v18, %v4076_v18 }
0x20a1   : > { %4080 = vadd.xlane.f32.xlu0 %v4078_v29  ;;  %v4079_v22 = vmul.f32 %v4077_v21, %v4077_v21 }
0x20a3   : > { %4082 = vadd.xlane.f32.xlu1 %v4079_v22 }
0x212e   : > { %v4081_v23 = vpop.xlane.xlu0 %4080 }
0x212f   : > { %v4084_v24 = vmul.f32 0.0078125, %v4081_v23 }
0x2130   : > { %v4083_v25 = vpop.xlane.xlu1 %4082 }
0x2131   : > { %v4086_v26 = vadd.f32 1e-05, %v4084_v24  ;;  %v4085_v11 = vmul.f32 0.0078125, %v4083_v25 }
0x2133   : > { %5361 = vrsqrt.f32 %v4086_v26  ;;  %v4087_v30 = vadd.f32 1e-05, %v4085_v11 }
0x2135   : > { %5363 = vrsqrt.f32 %v4087_v30 }
0x213d   : > { %v5362_v14 = vpop.eup %5361 }
0x213e   : > { %v4090_v20 = vmul.f32 %v5362_v14, %v4076_v18 }
0x213f   : > { %v5364_v60 = vpop.eup %5363 }
0x2140   : > { %v4096_v33 = vmul.f32 %v4463_v28, %v4090_v20  ;;  %v4091_v7 = vmul.f32 %v5364_v60, %v4077_v21 }
0x2142   : > { %v4102_v34 = vadd.f32 %v4464_v32, %v4096_v33  ;;  %v4097_v31 = vmul.f32 %v4463_v28, %v4091_v7 }
0x2144   : > { %4104 = vst [vmem:[%s574_s17] sm:$0xff] %v4102_v34  ;;  %v4103_v42 = vadd.f32 %v4464_v32, %v4097_v31 }
0x2146   : > { %4105 = vst [vmem:[%s574_s17 + $0x8] sm:$0xff] %v4103_v42 }
0x2147 PF: > { %s25_s18 = sadd.s32 1, %s5375_s18  }
0x2148   : > { %p22_p4 = scmp.ge.s32.totalorder %s25_s18, 4  }
0x214a   :  { %24 = sbr.rel (!%p22_p4) target bundleno = 1 (0x1), region = 128 }

</bundles_post_ra>
